<compile_context>
chip_gen: v7x
topology: tpu7x:2x2x1
jax: 0.10.0
libtpu: 0.0.40
codegen_flags: <defaults>
</compile_context>

<pallas_src>
import math

import jax
import jax.numpy as jnp
from jax.experimental import pallas as pl
from jax.experimental.pallas import tpu as pltpu

BATCH = 2
D_MODEL = 4
NHEAD = 2
HEAD_DIM = D_MODEL // NHEAD
SEQ = 50
VOCAB = 100

LANES = 128                       # one vreg lane width; mask slab is (SEQ, LANES)
BIG = 1000.0                      # folded move-mask: sigmoid arg pushed to ~ -inf
CLAMP = 80.0                      # keep exp() finite for the approx reciprocal

# packed (8, 128) parameter-slab column offsets
QCOL, KCOL, VCOL = 0, D_MODEL, 2 * D_MODEL    # per-head q/k/v projection blocks (4 cols each)
WCOL = 3 * D_MODEL                            # converable_width weight column (+ bias in row D)
OCOL = 16                                     # fc_out blocks: one 8-wide lane-placing block per batch


def _sigmoid(z):
    # explicit formula (used only by the pure-JAX reference)
    return 1.0 / (1.0 + jnp.exp(-z))


# ---------------------------------------------------------------------------
# Pallas kernel: fused "converable mask" + multi-head attention forward.
# Single shot (no grid): total I/O is ~30 KB, so pipelining/grid would only add
# fixed per-step overhead and duplicate constant DMAs.
# ---------------------------------------------------------------------------
def simple_model_kernel(x_ref, w_ref, prof_ref, out_ref, mask_ref):
    """
    x_ref    (B, S, D)    embedded + position-encoded input
    w_ref    (8, 128)     packed parameters:
                            [0:D, QCOL+h*hd : +hd]   per-head Q projection (1/sqrt(D) folded in)
                            [0:D, KCOL+h*hd : +hd]   per-head K projection
                            [0:D, VCOL+h*hd : +hd]   per-head V projection
                            [0:D, WCOL] / [D, WCOL]  converable_width weight / bias
                            [0:D, OCOL+b*8 : +8]     fc_out^T, lane-placed into batch b's band
                            [D,   OCOL : OCOL+8]     fc_out bias, duplicated per batch band
    prof_ref (S, 128)     profile[indices]*100 + BIG*(1-move), duplicated at lanes [0:S) and [S:2S)
    out_ref  (S, B*D)     attention output, batch b at lanes [b*D, (b+1)*D)
    mask_ref (S, 128)     converable mask, batch b at lanes [b*S, (b+1)*S)
    """
    w = w_ref[...]
    w_width = w[0:D_MODEL, WCOL:WCOL + 1]                              # (D, 1)
    b_width = w[D_MODEL:D_MODEL + 1, WCOL:WCOL + 1]                    # (1, 1)
    bias_ext = w[D_MODEL:D_MODEL + 1, OCOL:OCOL + BATCH * D_MODEL]     # (1, B*D) = [bout | bout]

    # ---- converable width + min-max normalization (per batch) -------------------
    xs, wns = [], []
    for b in range(BATCH):
        xb = x_ref[b]                                                  # (S, D) clean load, no relayout
        xs.append(xb)
        wb = jnp.dot(xb, w_width, preferred_element_type=jnp.float32) + b_width   # (S, 1)
        lo = jnp.min(wb, axis=0, keepdims=True)
        hi = jnp.max(wb, axis=0, keepdims=True)
        # NOTE: no epsilon on (hi - lo), matching the PyTorch reference exactly.
        wns.append((wb - lo) * (100.0 / (hi - lo)))                    # (S, 1), sigmoid's *100 folded in

    # ---- lane-packed mask: both batches computed on one (S, 128) slab -----------
    # lanes [0:S) use batch 0's width, [S:2S) batch 1's; lanes >= 2S fall through to ~0.
    lane = jax.lax.broadcasted_iota(jnp.int32, (SEQ, LANES), 1)
    wn_lanes = jnp.where(lane < SEQ,
                         jnp.broadcast_to(wns[0], (SEQ, LANES)),
                         jnp.broadcast_to(wns[1], (SEQ, LANES)))
    # 1 - sigmoid((prof - w)*100) == 1/(1 + exp(prof*100 - w*100)); the move mask is
    # folded into prof as +BIG, and the clamp keeps exp() finite (exp(80) -> ~1.8e-35 after recip).
    t = jnp.minimum(prof_ref[...] - wn_lanes, CLAMP)
    mask_slab = pl.reciprocal(1.0 + jnp.exp(t), approx=True)          # (S, 128)
    mask_ref[...] = mask_slab                                         # one full-lane store

    # Per-head masks re-used from the in-register slab (no store->reload roundtrip).
    # PyTorch broadcast quirk: energy[b, h] is multiplied by mask[h] (batch h's mask);
    # only valid because BATCH == NHEAD (asserted in the wrapper).
    masks = [mask_slab[:, h * SEQ:(h + 1) * SEQ] for h in range(NHEAD)]

    # ---- multi-head attention ----------------------------------------------------
    # Output accumulated directly in its lane-packed layout: the fc_out weight block for
    # batch b is zero outside lanes [b*D, (b+1)*D), so the MXU does the lane placement.
    acc = jnp.broadcast_to(bias_ext, (SEQ, BATCH * D_MODEL))          # (S, B*D)
    for b in range(BATCH):
        xb = xs[b]
        for h in range(NHEAD):
            c = h * HEAD_DIM
            # per-head projections straight from x against 2-lane slices of the 1-vreg
            # weight slab (avoids lane-granular slicing of a wide activation tensor).
            q = jnp.dot(xb, w[0:D_MODEL, QCOL + c:QCOL + c + HEAD_DIM],
                        preferred_element_type=jnp.float32)           # (S, hd), scale folded in
            k = jnp.dot(xb, w[0:D_MODEL, KCOL + c:KCOL + c + HEAD_DIM],
                        preferred_element_type=jnp.float32)
            v = jnp.dot(xb, w[0:D_MODEL, VCOL + c:VCOL + c + HEAD_DIM],
                        preferred_element_type=jnp.float32)
            e = jax.lax.dot_general(q, k, (((1,), (1,)), ((), ())),
                                    preferred_element_type=jnp.float32)   # (S, S)
            e = e * masks[h]
            e = e - jnp.max(e, axis=-1, keepdims=True)
            p = jnp.exp(e)
            att = p * pl.reciprocal(jnp.sum(p, axis=-1, keepdims=True), approx=True)
            head = jnp.dot(att, v, preferred_element_type=jnp.float32)    # (S, hd)
            # fc_out rows for this head, lane-placed into batch b's band (no concat/stack).
            acc = acc + jnp.dot(
                head,
                w[c:c + HEAD_DIM, OCOL + b * (BATCH * D_MODEL):OCOL + (b + 1) * (BATCH * D_MODEL)],
                preferred_element_type=jnp.float32)                       # (S, B*D)
    out_ref[...] = acc                                                     # one store


# ---------------------------------------------------------------------------
# Plain-JAX glue: constants, embedding gather, parameter packing, jitted wrapper.
# All token-independent constants are built once and closed over.
# ---------------------------------------------------------------------------
def positional_encoding(seq, d):
    pos = jnp.arange(seq, dtype=jnp.float32)[:, None]
    div = jnp.exp(jnp.arange(0, d, 2, dtype=jnp.float32) * (-math.log(10000.0) / d))
    pe = jnp.zeros((seq, d), jnp.float32)
    pe = pe.at[:, 0::2].set(jnp.sin(pos * div))
    pe = pe.at[:, 1::2].set(jnp.cos(pos * div))
    return pe


def mask_constants(seq):
    half = seq // 2
    shift = math.ceil(seq / 2)
    profile = jnp.concatenate([jnp.linspace(1.0, 0.0, half),
                               jnp.linspace(0.0, 1.0, seq - half)]).astype(jnp.float32)
    idx = (jnp.arange(seq - 1, -1, -1)[:, None] + jnp.arange(seq)[None, :]) % seq
    idx = jnp.roll(idx, shift, axis=0)
    # torch.roll on dim 0 of a (1, S) tensor is a no-op, so move_mask is just:
    move = idx >= jnp.arange(seq)[None, :]
    move = jnp.concatenate([move[:shift], ~move[shift:]], axis=0)
    profile_g = profile[idx]                                          # constant-index gather (glue)
    return profile, idx, profile_g, move.astype(jnp.float32)


def build_prof_slab():
    """(S, 128) constant: profile*100 with the move mask folded in as +BIG, duplicated per batch."""
    _, _, profile_g, move = mask_constants(SEQ)
    prof_masked = profile_g * 100.0 + BIG * (1.0 - move)
    slab = jnp.full((SEQ, LANES), BIG, jnp.float32)
    slab = slab.at[:, 0:SEQ].set(prof_masked)
    slab = slab.at[:, SEQ:2 * SEQ].set(prof_masked)
    return slab


def init_params(key):
    ks = jax.random.split(key, 8)

    def lin_w(k, out_f, in_f):
        bound = 1.0 / math.sqrt(in_f)
        return jax.random.uniform(k, (out_f, in_f), jnp.float32, -bound, bound)

    def lin_b(k, out_f, in_f):
        bound = 1.0 / math.sqrt(in_f)
        return jax.random.uniform(k, (out_f,), jnp.float32, -bound, bound)

    return {
        "embedding": jax.random.normal(ks[0], (VOCAB, D_MODEL), jnp.float32),
        "wq": lin_w(ks[1], HEAD_DIM, HEAD_DIM),
        "wk": lin_w(ks[2], HEAD_DIM, HEAD_DIM),
        "wv": lin_w(ks[3], HEAD_DIM, HEAD_DIM),
        "wout": lin_w(ks[4], D_MODEL, D_MODEL),
        "bout": lin_b(ks[5], D_MODEL, D_MODEL),
        "w_width": lin_w(ks[6], 1, D_MODEL),
        "b_width": lin_b(ks[7], 1, D_MODEL),
    }


def pack_params(params):
    """Pack all small weights into a single (8, 128) f32 slab (one prologue DMA, one vreg)."""
    scale = 1.0 / math.sqrt(D_MODEL)                 # folded into the Q blocks (0.5 is exact)
    slab = jnp.zeros((8, LANES), jnp.float32)
    for h in range(NHEAD):
        r = slice(h * HEAD_DIM, (h + 1) * HEAD_DIM)
        c = h * HEAD_DIM
        slab = slab.at[r, QCOL + c:QCOL + c + HEAD_DIM].set(params["wq"].T * scale)
        slab = slab.at[r, KCOL + c:KCOL + c + HEAD_DIM].set(params["wk"].T)
        slab = slab.at[r, VCOL + c:VCOL + c + HEAD_DIM].set(params["wv"].T)
    slab = slab.at[0:D_MODEL, WCOL].set(params["w_width"][0])
    slab = slab.at[D_MODEL, WCOL].set(params["b_width"][0])
    woutT = params["wout"].T                          # (D, D)
    for b in range(BATCH):
        col0 = OCOL + b * (BATCH * D_MODEL) + b * D_MODEL   # lane-placing block: zero outside batch b's band
        slab = slab.at[0:D_MODEL, col0:col0 + D_MODEL].set(woutT)
    slab = slab.at[D_MODEL, OCOL:OCOL + BATCH * D_MODEL].set(jnp.tile(params["bout"], BATCH))
    return slab


def make_forward(params):
    assert BATCH == NHEAD, "reference module's mask/energy broadcast requires batch == nhead"
    # Token-independent constants: built once, closed over (not rebuilt per call).
    pe = positional_encoding(SEQ, D_MODEL)
    prof_slab = build_prof_slab()
    w_slab = pack_params(params)
    emb = params["embedding"]

    vmem = lambda: pl.BlockSpec(memory_space=pltpu.MemorySpace.VMEM)
    call = pl.pallas_call(
        simple_model_kernel,
        out_shape=(jax.ShapeDtypeStruct((SEQ, BATCH * D_MODEL), jnp.float32),
                   jax.ShapeDtypeStruct((SEQ, LANES), jnp.float32)),
        in_specs=[vmem(), vmem(), vmem()],
        out_specs=(vmem(), vmem()),
    )

    @jax.jit
    def forward(tokens):
        x = emb[tokens] + pe[None]                                   # (B, S, D) embedding gather (glue)
        out_slab, mask_slab = call(x.astype(jnp.float32), w_slab, prof_slab)
        out = out_slab.reshape(SEQ, BATCH, D_MODEL).transpose(1, 0, 2)          # (B, S, D)
        mask = mask_slab[:, :BATCH * SEQ].reshape(SEQ, BATCH, SEQ).transpose(1, 0, 2)  # (B, S, S)
        return out, mask

    return forward


def reference_forward(tokens, params):
    """Pure-JAX mirror of the PyTorch module (used only as a correctness check)."""
    emb = params["embedding"][tokens]
    x = emb + positional_encoding(SEQ, D_MODEL)[None]
    profile, idx, _, move = mask_constants(SEQ)
    width = jnp.einsum("bsd,od->bso", x, params["w_width"])[..., 0] + params["b_width"][0]
    wmin = width.min(-1, keepdims=True)
    wmax = width.max(-1, keepdims=True)
    width = ((width - wmin) / (wmax - wmin))[..., None]              # (B, S, 1)
    origin = 1.0 - _sigmoid((profile[None, None, :] - width) * 100.0)  # (B, S, S)
    mask = origin[:, jnp.arange(SEQ)[:, None], idx] * move
    xh = x.reshape(BATCH, SEQ, NHEAD, HEAD_DIM)
    q = jnp.einsum("bshd,od->bsho", xh, params["wq"])
    k = jnp.einsum("bshd,od->bsho", xh, params["wk"])
    v = jnp.einsum("bshd,od->bsho", xh, params["wv"])
    energy = jnp.einsum("bqhd,bkhd->bhqk", q, k)
    energy = energy * mask[None]          # (1,B,S,S) vs (B,H,S,S): valid since B == H
    att = jax.nn.softmax(energy / math.sqrt(D_MODEL), axis=3)
    out = jnp.einsum("bhqk,bkhd->bqhd", att, v).reshape(BATCH, SEQ, D_MODEL)
    out = out @ params["wout"].T + params["bout"]
    return out, mask


if __name__ == "__main__":
    root = jax.random.PRNGKey(0)
    k_tok, k_par = jax.random.split(root)
    tokens = jax.random.randint(k_tok, (BATCH, SEQ), 0, VOCAB, dtype=jnp.int32)
    params = init_params(k_par)

    forward = make_forward(params)
    out, mask = forward(tokens)
    jax.block_until_ready((out, mask))

    ref_out, ref_mask = reference_forward(tokens, params)
    assert out.shape == (BATCH, SEQ, D_MODEL) and mask.shape == (BATCH, SEQ, SEQ)
    # folded move-mask gives ~1.8e-35 instead of exact 0 at masked entries; approx
    # reciprocals give ~1e-3 level error in softmax — both well inside 1e-2 tolerance.
    assert jnp.allclose(mask, ref_mask, atol=1e-2, rtol=1e-2)
    assert jnp.allclose(out, ref_out, atol=1e-2, rtol=1e-2)
    print("KERNEL_OK")
</pallas_src>

<mosaic_0001>
module attributes {stable_mosaic.version = 11 : i64} {
  func.func @simple_model_kernel(%arg0: memref<2x50x4xf32, #tpu.memory_space<vmem>>, %arg1: memref<8x128xf32, #tpu.memory_space<vmem>>, %arg2: memref<50x128xf32, #tpu.memory_space<vmem>>, %arg3: memref<50x8xf32, #tpu.memory_space<vmem>>, %arg4: memref<50x128xf32, #tpu.memory_space<vmem>>) attributes {dimension_semantics = [], scalar_prefetch = 0 : i64, scratch_operands = 0 : i64, tpu.core_type = #tpu.core_type<tc>} {
    %c0 = arith.constant 0 : index
    %c0_0 = arith.constant 0 : index
    %0 = vector.load %arg1[%c0, %c0_0] : memref<8x128xf32, #tpu.memory_space<vmem>>, vector<8x128xf32>
    %1 = vector.extract_strided_slice %0 {offsets = [0, 12], sizes = [4, 1], strides = [1, 1]} : vector<8x128xf32> to vector<4x1xf32>
    %2 = vector.extract_strided_slice %0 {offsets = [4, 12], sizes = [1, 1], strides = [1, 1]} : vector<8x128xf32> to vector<1x1xf32>
    %3 = vector.extract_strided_slice %0 {offsets = [4, 16], sizes = [1, 8], strides = [1, 1]} : vector<8x128xf32> to vector<1x8xf32>
    %c0_1 = arith.constant 0 : index
    %c0_2 = arith.constant 0 : index
    %c0_3 = arith.constant 0 : index
    %4 = vector.load %arg0[%c0_1, %c0_2, %c0_3] : memref<2x50x4xf32, #tpu.memory_space<vmem>>, vector<1x50x4xf32>
    %5 = vector.shape_cast %4 : vector<1x50x4xf32> to vector<50x4xf32>
    %cst = arith.constant dense<0.000000e+00> : vector<50x1xf32>
    %6 = tpu.matmul %5, %1, %cst {dimension_numbers = #tpu.dot_dimension_numbers<[1], [0], [0], [1], [0, 0, 1, 1], [], []>} : vector<50x4xf32>, vector<4x1xf32>, vector<50x1xf32> -> vector<50x1xf32>
    %7 = vector.broadcast %2 : vector<1x1xf32> to vector<50x1xf32>
    %8 = arith.addf %6, %7 : vector<50x1xf32>
    %cst_4 = arith.constant dense<0x7F800000> : vector<1xf32>
    %9 = vector.multi_reduction <minimumf>, %8, %cst_4 [0] : vector<50x1xf32> to vector<1xf32>
    %10 = vector.shape_cast %9 : vector<1xf32> to vector<1x1xf32>
    %cst_5 = arith.constant dense<0xFF800000> : vector<1xf32>
    %11 = vector.multi_reduction <maximumf>, %8, %cst_5 [0] : vector<50x1xf32> to vector<1xf32>
    %12 = vector.shape_cast %11 : vector<1xf32> to vector<1x1xf32>
    %13 = vector.broadcast %10 : vector<1x1xf32> to vector<50x1xf32>
    %14 = arith.subf %8, %13 : vector<50x1xf32>
    %15 = arith.subf %12, %10 : vector<1x1xf32>
    %cst_6 = arith.constant 1.000000e+02 : f32
    %16 = vector.broadcast %cst_6 : f32 to vector<1x1xf32>
    %17 = arith.divf %16, %15 : vector<1x1xf32>
    %18 = vector.broadcast %17 : vector<1x1xf32> to vector<50x1xf32>
    %19 = arith.mulf %14, %18 : vector<50x1xf32>
    %c1 = arith.constant 1 : index
    %c0_7 = arith.constant 0 : index
    %c0_8 = arith.constant 0 : index
    %20 = vector.load %arg0[%c1, %c0_7, %c0_8] : memref<2x50x4xf32, #tpu.memory_space<vmem>>, vector<1x50x4xf32>
    %21 = vector.shape_cast %20 : vector<1x50x4xf32> to vector<50x4xf32>
    %cst_9 = arith.constant dense<0.000000e+00> : vector<50x1xf32>
    %22 = tpu.matmul %21, %1, %cst_9 {dimension_numbers = #tpu.dot_dimension_numbers<[1], [0], [0], [1], [0, 0, 1, 1], [], []>} : vector<50x4xf32>, vector<4x1xf32>, vector<50x1xf32> -> vector<50x1xf32>
    %23 = vector.broadcast %2 : vector<1x1xf32> to vector<50x1xf32>
    %24 = arith.addf %22, %23 : vector<50x1xf32>
    %cst_10 = arith.constant dense<0x7F800000> : vector<1xf32>
    %25 = vector.multi_reduction <minimumf>, %24, %cst_10 [0] : vector<50x1xf32> to vector<1xf32>
    %26 = vector.shape_cast %25 : vector<1xf32> to vector<1x1xf32>
    %cst_11 = arith.constant dense<0xFF800000> : vector<1xf32>
    %27 = vector.multi_reduction <maximumf>, %24, %cst_11 [0] : vector<50x1xf32> to vector<1xf32>
    %28 = vector.shape_cast %27 : vector<1xf32> to vector<1x1xf32>
    %29 = vector.broadcast %26 : vector<1x1xf32> to vector<50x1xf32>
    %30 = arith.subf %24, %29 : vector<50x1xf32>
    %31 = arith.subf %28, %26 : vector<1x1xf32>
    %cst_12 = arith.constant 1.000000e+02 : f32
    %32 = vector.broadcast %cst_12 : f32 to vector<1x1xf32>
    %33 = arith.divf %32, %31 : vector<1x1xf32>
    %34 = vector.broadcast %33 : vector<1x1xf32> to vector<50x1xf32>
    %35 = arith.mulf %30, %34 : vector<50x1xf32>
    %36 = tpu.iota {dimensions = array<i32: 1>} : vector<50x128xi32>
    %c50_i32 = arith.constant 50 : i32
    %37 = vector.broadcast %c50_i32 : i32 to vector<50x128xi32>
    %38 = arith.cmpi slt, %36, %37 : vector<50x128xi32>
    %39 = vector.shape_cast %19 : vector<50x1xf32> to vector<50x1xf32>
    %40 = vector.broadcast %39 : vector<50x1xf32> to vector<50x128xf32>
    %41 = vector.shape_cast %35 : vector<50x1xf32> to vector<50x1xf32>
    %42 = vector.broadcast %41 : vector<50x1xf32> to vector<50x128xf32>
    %43 = arith.select %38, %40, %42 : vector<50x128xi1>, vector<50x128xf32>
    %c0_13 = arith.constant 0 : index
    %c0_14 = arith.constant 0 : index
    %44 = vector.load %arg2[%c0_13, %c0_14] : memref<50x128xf32, #tpu.memory_space<vmem>>, vector<50x128xf32>
    %45 = arith.subf %44, %43 : vector<50x128xf32>
    %cst_15 = arith.constant 8.000000e+01 : f32
    %46 = vector.broadcast %cst_15 : f32 to vector<50x128xf32>
    %47 = arith.minimumf %45, %46 : vector<50x128xf32>
    %48 = math.exp %47 : vector<50x128xf32>
    %cst_16 = arith.constant 1.000000e+00 : f32
    %49 = vector.broadcast %cst_16 : f32 to vector<50x128xf32>
    %50 = arith.addf %49, %48 : vector<50x128xf32>
    %51 = tpu.reciprocal %50 {approx = true} : vector<50x128xf32> -> vector<50x128xf32>
    %c0_17 = arith.constant 0 : index
    %c0_18 = arith.constant 0 : index
    %52 = vector.load %arg4[%c0_17, %c0_18] : memref<50x128xf32, #tpu.memory_space<vmem>>, vector<50x128xf32>
    tpu.vector_store %arg4[%c0_17, %c0_18], %51 {strides = array<i32>} : memref<50x128xf32, #tpu.memory_space<vmem>>, vector<50x128xf32>,
    %53 = vector.extract_strided_slice %51 {offsets = [0, 0], sizes = [50, 50], strides = [1, 1]} : vector<50x128xf32> to vector<50x50xf32>
    %54 = vector.extract_strided_slice %51 {offsets = [0, 50], sizes = [50, 50], strides = [1, 1]} : vector<50x128xf32> to vector<50x50xf32>
    %55 = vector.shape_cast %3 : vector<1x8xf32> to vector<1x8xf32>
    %56 = vector.broadcast %55 : vector<1x8xf32> to vector<50x8xf32>
    %57 = vector.extract_strided_slice %0 {offsets = [0, 0], sizes = [4, 2], strides = [1, 1]} : vector<8x128xf32> to vector<4x2xf32>
    %cst_19 = arith.constant dense<0.000000e+00> : vector<50x2xf32>
    %58 = tpu.matmul %5, %57, %cst_19 {dimension_numbers = #tpu.dot_dimension_numbers<[1], [0], [0], [1], [0, 0, 1, 1], [], []>} : vector<50x4xf32>, vector<4x2xf32>, vector<50x2xf32> -> vector<50x2xf32>
    %59 = vector.extract_strided_slice %0 {offsets = [0, 4], sizes = [4, 2], strides = [1, 1]} : vector<8x128xf32> to vector<4x2xf32>
    %cst_20 = arith.constant dense<0.000000e+00> : vector<50x2xf32>
    %60 = tpu.matmul %5, %59, %cst_20 {dimension_numbers = #tpu.dot_dimension_numbers<[1], [0], [0], [1], [0, 0, 1, 1], [], []>} : vector<50x4xf32>, vector<4x2xf32>, vector<50x2xf32> -> vector<50x2xf32>
    %61 = vector.extract_strided_slice %0 {offsets = [0, 8], sizes = [4, 2], strides = [1, 1]} : vector<8x128xf32> to vector<4x2xf32>
    %cst_21 = arith.constant dense<0.000000e+00> : vector<50x2xf32>
    %62 = tpu.matmul %5, %61, %cst_21 {dimension_numbers = #tpu.dot_dimension_numbers<[1], [0], [0], [1], [0, 0, 1, 1], [], []>} : vector<50x4xf32>, vector<4x2xf32>, vector<50x2xf32> -> vector<50x2xf32>
    %cst_22 = arith.constant dense<0.000000e+00> : vector<50x50xf32>
    %63 = tpu.matmul %58, %60, %cst_22 {dimension_numbers = #tpu.dot_dimension_numbers<[1], [1], [0], [0], [0, 0, 1, 0], [], []>} : vector<50x2xf32>, vector<50x2xf32>, vector<50x50xf32> -> vector<50x50xf32>
    %64 = arith.mulf %63, %53 : vector<50x50xf32>
    %cst_23 = arith.constant dense<0xFF800000> : vector<50xf32>
    %65 = vector.multi_reduction <maximumf>, %64, %cst_23 [1] : vector<50x50xf32> to vector<50xf32>
    %66 = vector.shape_cast %65 : vector<50xf32> to vector<50x1xf32>
    %67 = vector.broadcast %66 : vector<50x1xf32> to vector<50x50xf32>
    %68 = arith.subf %64, %67 : vector<50x50xf32>
    %69 = math.exp %68 : vector<50x50xf32>
    %cst_24 = arith.constant dense<0.000000e+00> : vector<50xf32>
    %70 = vector.multi_reduction <add>, %69, %cst_24 [1] : vector<50x50xf32> to vector<50xf32>
    %71 = vector.shape_cast %70 : vector<50xf32> to vector<50x1xf32>
    %72 = tpu.reciprocal %71 {approx = true} : vector<50x1xf32> -> vector<50x1xf32>
    %73 = vector.broadcast %72 : vector<50x1xf32> to vector<50x50xf32>
    %74 = arith.mulf %69, %73 : vector<50x50xf32>
    %cst_25 = arith.constant dense<0.000000e+00> : vector<50x2xf32>
    %75 = tpu.matmul %74, %62, %cst_25 {dimension_numbers = #tpu.dot_dimension_numbers<[1], [0], [0], [1], [0, 0, 1, 1], [], []>} : vector<50x50xf32>, vector<50x2xf32>, vector<50x2xf32> -> vector<50x2xf32>
    %76 = vector.extract_strided_slice %0 {offsets = [0, 16], sizes = [2, 8], strides = [1, 1]} : vector<8x128xf32> to vector<2x8xf32>
    %cst_26 = arith.constant dense<0.000000e+00> : vector<50x8xf32>
    %77 = tpu.matmul %75, %76, %cst_26 {dimension_numbers = #tpu.dot_dimension_numbers<[1], [0], [0], [1], [0, 0, 1, 1], [], []>} : vector<50x2xf32>, vector<2x8xf32>, vector<50x8xf32> -> vector<50x8xf32>
    %78 = arith.addf %56, %77 : vector<50x8xf32>
    %79 = vector.extract_strided_slice %0 {offsets = [0, 2], sizes = [4, 2], strides = [1, 1]} : vector<8x128xf32> to vector<4x2xf32>
    %cst_27 = arith.constant dense<0.000000e+00> : vector<50x2xf32>
    %80 = tpu.matmul %5, %79, %cst_27 {dimension_numbers = #tpu.dot_dimension_numbers<[1], [0], [0], [1], [0, 0, 1, 1], [], []>} : vector<50x4xf32>, vector<4x2xf32>, vector<50x2xf32> -> vector<50x2xf32>
    %81 = vector.extract_strided_slice %0 {offsets = [0, 6], sizes = [4, 2], strides = [1, 1]} : vector<8x128xf32> to vector<4x2xf32>
    %cst_28 = arith.constant dense<0.000000e+00> : vector<50x2xf32>
    %82 = tpu.matmul %5, %81, %cst_28 {dimension_numbers = #tpu.dot_dimension_numbers<[1], [0], [0], [1], [0, 0, 1, 1], [], []>} : vector<50x4xf32>, vector<4x2xf32>, vector<50x2xf32> -> vector<50x2xf32>
    %83 = vector.extract_strided_slice %0 {offsets = [0, 10], sizes = [4, 2], strides = [1, 1]} : vector<8x128xf32> to vector<4x2xf32>
    %cst_29 = arith.constant dense<0.000000e+00> : vector<50x2xf32>
    %84 = tpu.matmul %5, %83, %cst_29 {dimension_numbers = #tpu.dot_dimension_numbers<[1], [0], [0], [1], [0, 0, 1, 1], [], []>} : vector<50x4xf32>, vector<4x2xf32>, vector<50x2xf32> -> vector<50x2xf32>
    %cst_30 = arith.constant dense<0.000000e+00> : vector<50x50xf32>
    %85 = tpu.matmul %80, %82, %cst_30 {dimension_numbers = #tpu.dot_dimension_numbers<[1], [1], [0], [0], [0, 0, 1, 0], [], []>} : vector<50x2xf32>, vector<50x2xf32>, vector<50x50xf32> -> vector<50x50xf32>
    %86 = arith.mulf %85, %54 : vector<50x50xf32>
    %cst_31 = arith.constant dense<0xFF800000> : vector<50xf32>
    %87 = vector.multi_reduction <maximumf>, %86, %cst_31 [1] : vector<50x50xf32> to vector<50xf32>
    %88 = vector.shape_cast %87 : vector<50xf32> to vector<50x1xf32>
    %89 = vector.broadcast %88 : vector<50x1xf32> to vector<50x50xf32>
    %90 = arith.subf %86, %89 : vector<50x50xf32>
    %91 = math.exp %90 : vector<50x50xf32>
    %cst_32 = arith.constant dense<0.000000e+00> : vector<50xf32>
    %92 = vector.multi_reduction <add>, %91, %cst_32 [1] : vector<50x50xf32> to vector<50xf32>
    %93 = vector.shape_cast %92 : vector<50xf32> to vector<50x1xf32>
    %94 = tpu.reciprocal %93 {approx = true} : vector<50x1xf32> -> vector<50x1xf32>
    %95 = vector.broadcast %94 : vector<50x1xf32> to vector<50x50xf32>
    %96 = arith.mulf %91, %95 : vector<50x50xf32>
    %cst_33 = arith.constant dense<0.000000e+00> : vector<50x2xf32>
    %97 = tpu.matmul %96, %84, %cst_33 {dimension_numbers = #tpu.dot_dimension_numbers<[1], [0], [0], [1], [0, 0, 1, 1], [], []>} : vector<50x50xf32>, vector<50x2xf32>, vector<50x2xf32> -> vector<50x2xf32>
    %98 = vector.extract_strided_slice %0 {offsets = [2, 16], sizes = [2, 8], strides = [1, 1]} : vector<8x128xf32> to vector<2x8xf32>
    %cst_34 = arith.constant dense<0.000000e+00> : vector<50x8xf32>
    %99 = tpu.matmul %97, %98, %cst_34 {dimension_numbers = #tpu.dot_dimension_numbers<[1], [0], [0], [1], [0, 0, 1, 1], [], []>} : vector<50x2xf32>, vector<2x8xf32>, vector<50x8xf32> -> vector<50x8xf32>
    %100 = arith.addf %78, %99 : vector<50x8xf32>
    %101 = vector.extract_strided_slice %0 {offsets = [0, 0], sizes = [4, 2], strides = [1, 1]} : vector<8x128xf32> to vector<4x2xf32>
    %cst_35 = arith.constant dense<0.000000e+00> : vector<50x2xf32>
    %102 = tpu.matmul %21, %101, %cst_35 {dimension_numbers = #tpu.dot_dimension_numbers<[1], [0], [0], [1], [0, 0, 1, 1], [], []>} : vector<50x4xf32>, vector<4x2xf32>, vector<50x2xf32> -> vector<50x2xf32>
    %103 = vector.extract_strided_slice %0 {offsets = [0, 4], sizes = [4, 2], strides = [1, 1]} : vector<8x128xf32> to vector<4x2xf32>
    %cst_36 = arith.constant dense<0.000000e+00> : vector<50x2xf32>
    %104 = tpu.matmul %21, %103, %cst_36 {dimension_numbers = #tpu.dot_dimension_numbers<[1], [0], [0], [1], [0, 0, 1, 1], [], []>} : vector<50x4xf32>, vector<4x2xf32>, vector<50x2xf32> -> vector<50x2xf32>
    %105 = vector.extract_strided_slice %0 {offsets = [0, 8], sizes = [4, 2], strides = [1, 1]} : vector<8x128xf32> to vector<4x2xf32>
    %cst_37 = arith.constant dense<0.000000e+00> : vector<50x2xf32>
    %106 = tpu.matmul %21, %105, %cst_37 {dimension_numbers = #tpu.dot_dimension_numbers<[1], [0], [0], [1], [0, 0, 1, 1], [], []>} : vector<50x4xf32>, vector<4x2xf32>, vector<50x2xf32> -> vector<50x2xf32>
    %cst_38 = arith.constant dense<0.000000e+00> : vector<50x50xf32>
    %107 = tpu.matmul %102, %104, %cst_38 {dimension_numbers = #tpu.dot_dimension_numbers<[1], [1], [0], [0], [0, 0, 1, 0], [], []>} : vector<50x2xf32>, vector<50x2xf32>, vector<50x50xf32> -> vector<50x50xf32>
    %108 = arith.mulf %107, %53 : vector<50x50xf32>
    %cst_39 = arith.constant dense<0xFF800000> : vector<50xf32>
    %109 = vector.multi_reduction <maximumf>, %108, %cst_39 [1] : vector<50x50xf32> to vector<50xf32>
    %110 = vector.shape_cast %109 : vector<50xf32> to vector<50x1xf32>
    %111 = vector.broadcast %110 : vector<50x1xf32> to vector<50x50xf32>
    %112 = arith.subf %108, %111 : vector<50x50xf32>
    %113 = math.exp %112 : vector<50x50xf32>
    %cst_40 = arith.constant dense<0.000000e+00> : vector<50xf32>
    %114 = vector.multi_reduction <add>, %113, %cst_40 [1] : vector<50x50xf32> to vector<50xf32>
    %115 = vector.shape_cast %114 : vector<50xf32> to vector<50x1xf32>
    %116 = tpu.reciprocal %115 {approx = true} : vector<50x1xf32> -> vector<50x1xf32>
    %117 = vector.broadcast %116 : vector<50x1xf32> to vector<50x50xf32>
    %118 = arith.mulf %113, %117 : vector<50x50xf32>
    %cst_41 = arith.constant dense<0.000000e+00> : vector<50x2xf32>
    %119 = tpu.matmul %118, %106, %cst_41 {dimension_numbers = #tpu.dot_dimension_numbers<[1], [0], [0], [1], [0, 0, 1, 1], [], []>} : vector<50x50xf32>, vector<50x2xf32>, vector<50x2xf32> -> vector<50x2xf32>
    %120 = vector.extract_strided_slice %0 {offsets = [0, 24], sizes = [2, 8], strides = [1, 1]} : vector<8x128xf32> to vector<2x8xf32>
    %cst_42 = arith.constant dense<0.000000e+00> : vector<50x8xf32>
    %121 = tpu.matmul %119, %120, %cst_42 {dimension_numbers = #tpu.dot_dimension_numbers<[1], [0], [0], [1], [0, 0, 1, 1], [], []>} : vector<50x2xf32>, vector<2x8xf32>, vector<50x8xf32> -> vector<50x8xf32>
    %122 = arith.addf %100, %121 : vector<50x8xf32>
    %123 = vector.extract_strided_slice %0 {offsets = [0, 2], sizes = [4, 2], strides = [1, 1]} : vector<8x128xf32> to vector<4x2xf32>
    %cst_43 = arith.constant dense<0.000000e+00> : vector<50x2xf32>
    %124 = tpu.matmul %21, %123, %cst_43 {dimension_numbers = #tpu.dot_dimension_numbers<[1], [0], [0], [1], [0, 0, 1, 1], [], []>} : vector<50x4xf32>, vector<4x2xf32>, vector<50x2xf32> -> vector<50x2xf32>
    %125 = vector.extract_strided_slice %0 {offsets = [0, 6], sizes = [4, 2], strides = [1, 1]} : vector<8x128xf32> to vector<4x2xf32>
    %cst_44 = arith.constant dense<0.000000e+00> : vector<50x2xf32>
    %126 = tpu.matmul %21, %125, %cst_44 {dimension_numbers = #tpu.dot_dimension_numbers<[1], [0], [0], [1], [0, 0, 1, 1], [], []>} : vector<50x4xf32>, vector<4x2xf32>, vector<50x2xf32> -> vector<50x2xf32>
    %127 = vector.extract_strided_slice %0 {offsets = [0, 10], sizes = [4, 2], strides = [1, 1]} : vector<8x128xf32> to vector<4x2xf32>
    %cst_45 = arith.constant dense<0.000000e+00> : vector<50x2xf32>
    %128 = tpu.matmul %21, %127, %cst_45 {dimension_numbers = #tpu.dot_dimension_numbers<[1], [0], [0], [1], [0, 0, 1, 1], [], []>} : vector<50x4xf32>, vector<4x2xf32>, vector<50x2xf32> -> vector<50x2xf32>
    %cst_46 = arith.constant dense<0.000000e+00> : vector<50x50xf32>
    %129 = tpu.matmul %124, %126, %cst_46 {dimension_numbers = #tpu.dot_dimension_numbers<[1], [1], [0], [0], [0, 0, 1, 0], [], []>} : vector<50x2xf32>, vector<50x2xf32>, vector<50x50xf32> -> vector<50x50xf32>
    %130 = arith.mulf %129, %54 : vector<50x50xf32>
    %cst_47 = arith.constant dense<0xFF800000> : vector<50xf32>
    %131 = vector.multi_reduction <maximumf>, %130, %cst_47 [1] : vector<50x50xf32> to vector<50xf32>
    %132 = vector.shape_cast %131 : vector<50xf32> to vector<50x1xf32>
    %133 = vector.broadcast %132 : vector<50x1xf32> to vector<50x50xf32>
    %134 = arith.subf %130, %133 : vector<50x50xf32>
    %135 = math.exp %134 : vector<50x50xf32>
    %cst_48 = arith.constant dense<0.000000e+00> : vector<50xf32>
    %136 = vector.multi_reduction <add>, %135, %cst_48 [1] : vector<50x50xf32> to vector<50xf32>
    %137 = vector.shape_cast %136 : vector<50xf32> to vector<50x1xf32>
    %138 = tpu.reciprocal %137 {approx = true} : vector<50x1xf32> -> vector<50x1xf32>
    %139 = vector.broadcast %138 : vector<50x1xf32> to vector<50x50xf32>
    %140 = arith.mulf %135, %139 : vector<50x50xf32>
    %cst_49 = arith.constant dense<0.000000e+00> : vector<50x2xf32>
    %141 = tpu.matmul %140, %128, %cst_49 {dimension_numbers = #tpu.dot_dimension_numbers<[1], [0], [0], [1], [0, 0, 1, 1], [], []>} : vector<50x50xf32>, vector<50x2xf32>, vector<50x2xf32> -> vector<50x2xf32>
    %142 = vector.extract_strided_slice %0 {offsets = [2, 24], sizes = [2, 8], strides = [1, 1]} : vector<8x128xf32> to vector<2x8xf32>
    %cst_50 = arith.constant dense<0.000000e+00> : vector<50x8xf32>
    %143 = tpu.matmul %141, %142, %cst_50 {dimension_numbers = #tpu.dot_dimension_numbers<[1], [0], [0], [1], [0, 0, 1, 1], [], []>} : vector<50x2xf32>, vector<2x8xf32>, vector<50x8xf32> -> vector<50x8xf32>
    %144 = arith.addf %122, %143 : vector<50x8xf32>
    %c0_51 = arith.constant 0 : index
    %c0_52 = arith.constant 0 : index
    %145 = vector.load %arg3[%c0_51, %c0_52] : memref<50x8xf32, #tpu.memory_space<vmem>>, vector<50x8xf32>
    tpu.vector_store %arg3[%c0_51, %c0_52], %144 {strides = array<i32>} : memref<50x8xf32, #tpu.memory_space<vmem>>, vector<50x8xf32>,
    return
  }
}

</mosaic_0001>

<bundles_post_ra>
// kernel: forward.1
= control target key start
LH: loop header
LB: loop body
LE: loop exit
PB: predicated region body
PF: predicated region fallthrough
CT: control target
= control target key end

     0   :  { %v5332_v1 = vmov 0.0   ;;  %s5333_s17 = smov 116   ;;  %vm5334_vm0 = vmmov 0   ;;  %s5335_s18 = smov 124   ;;  %v24_v2 = vlaneseq  ;;  %vm57_vm1 = vcmask 1043456   ;;  %s6802_s1 = inlined_call_operand.vmem [shape: f32[8,128], index: 1, kind: input, shape index: {}]   ;;  %s6803_s0 = inlined_call_operand.vmem [shape: f32[2,50,4], index: 0, kind: input, shape index: {}]   ;;  %s6804_s2 = inlined_call_operand.vmem [shape: f32[50,128], index: 2, kind: input, shape index: {}]   ;;  %s6805_s4 = inlined_call_operand.vmem [shape: f32[50,128], index: 4, kind: output, shape index: {1}]   ;;  %s6806_s3 = inlined_call_operand.vmem [shape: f32[50,8], index: 3, kind: output, shape index: {0}]  }
   0x1   :  { %v5374_v0 = vld [vmem:[%s6802_s1] sm:$0xff]  ;;  %4372 = vmatprep.subr.mxu0 %v5332_v1  ;;  %4395 = vmatprep.subr.mxu1 %v5332_v1  ;;  %vm35_vm2 = vcmask 31744   ;;  %v3885_v7 = vld [vmem:[%s6803_s0 + $0x38] sm:$0xff]  ;;  %v5408_v9 = vld [vmem:[%s6803_s0 + $0x8] sm:$0xff]  ;;  %v5336_v22 = vmov 0.0|0.0   ;;  %s5337_s21 = smov 120  }
   0x2   :  { %29 = vrot.lane.b32.xlu0 %v5374_v0, %s5333_s17  ;;  %4374 = vmatprep.mubr.msk.f32.mxu0 %vm5334_vm0, %v5332_v1  ;;  %v25_v3 = vshrl.u32 %v24_v2, 7  ;;  %v5392_v6 = vld [vmem:[%s6803_s0] sm:$0xff]  ;;  %v5432_v12 = vld [vmem:[%s6803_s0 + $0x10] sm:$0xff]  ;;  %v3887_v13 = vld [vmem:[%s6803_s0 + $0x48] sm:$0xff]  ;;  %v5338_v23 = vmov 0   ;;  %vm160_vm3 = vcmask 7168  }
   0x3   :  { %4397 = vmatprep.mubr.msk.f32.mxu1 %vm5334_vm0, %v5332_v1  ;;  %v3886_v10 = vld [vmem:[%s6803_s0 + $0x40] sm:$0xff]  ;;  %v5448_v14 = vld [vmem:[%s6803_s0 + $0x18] sm:$0xff]  ;;  %v3888_v15 = vld [vmem:[%s6803_s0 + $0x50] sm:$0xff]  ;;  %5165 = vset.pattern.permute.xlu1 %v5338_v23  ;;  %vm169_vm4 = vcmask 1024   ;;  %vm847_vm5 = vcmask 15360   ;;  %vm997_vm8 = vcmask 408576  }
   0x4   :  { %v26_v4 = vsub.s32 4, %v25_v3  ;;  %v5463_v16 = vld [vmem:[%s6803_s0 + $0x20] sm:$0xff]  ;;  %v3889_v17 = vld [vmem:[%s6803_s0 + $0x58] sm:$0xff]  ;;  %v5478_v18 = vld [vmem:[%s6803_s0 + $0x28] sm:$0xff]  ;;  %5164 = vset.pattern.permute.xlu0 %v5338_v23  ;;  %vm1016_vm9 = vcmask 402432   ;;  %vm1097_vm10 = vcmask 1041408  }
   0x5   :  { %v3890_v19 = vld [vmem:[%s6803_s0 + $0x60] sm:$0xff]  ;;  %v5493_v20 = vld [vmem:[%s6803_s0 + $0x30] sm:$0x3]  ;;  %v3891_v21 = vld [vmem:[%s6803_s0 + $0x68] sm:$0x3]  ;;  %s5339_s25 = smov 122  }
   0x6   :  { %639 = vrot.lane.b32.xlu0 %v5374_v0, %s5335_s18  ;;  %v5386_v5 = vrot.slane %v5374_v0, %v26_v4  ;;  %vm5667_vm6 = vmpackc.low %vm847_vm5, %vm847_vm5  ;;  %s5340_s26 = smov 112   ;;  %s5341_s27 = smov 126   ;;  %vm3860_vm11 = vcmask 64512   ;;  %vm3867_vm12 = vcmask 58368  }
   0x7   :  { %s5342_s28 = smov 118   ;;  %s5343_s29 = smov 78  }
   0x8   :  { %32 = vrot.lane.b32.xlu1 %v5386_v5, %s5333_s17  ;;  %s5344_s17 = smov 104  }
   0xc   :  { %743 = vrot.lane.b32.xlu1 %v5374_v0, %s5337_s21 }
  0x74   :  { %v30_v8 = vpop.permute.xlu0 %29 }
  0x75   :  { %4373 = vmatpush3.msk.msra.mxu0 %vm57_vm1, %v30_v8  ;;  %4396 = vmatpush3.msk.msra.mxu1 %vm57_vm1, %v30_v8 }
  0x76   :  { %4375 = vmatmul.mubr.msk.f32.vlgmr.msra.gmra.mrb[0].mxu0 %vm35_vm2, %v5392_v6  ;;  %4398 = vmatmul.mubr.msk.f32.vlgmr.msra.gmra.mrb[0].mxu1 %vm35_vm2, %v3885_v7 }
  0x77   :  { %4441 = vmatprep.subr.mxu1 %v5332_v1  ;;  %4377 = vmatprep.mubr.msk.f32.mxu0 %vm5334_vm0, %v5332_v1 }
  0x78   :  { %v5413_v11 = vpop.permute.xlu0 %639  ;;  %4400 = vmatprep.mubr.msk.f32.mxu1 %vm5334_vm0, %v5332_v1  ;;  %4418 = vmatprep.subr.mxu0 %v5332_v1 }
  0x79   :  { %4442 = vmatpush3.msk.msra.mxu1 %vm57_vm1, %v5413_v11  ;;  %4419 = vmatpush3.msk.msra.mxu0 %vm57_vm1, %v5374_v0 }
  0x7a   :  { %4378 = vmatmul.mubr.msk.f32.gmra.mrb[2].mxu0 %vm35_vm2, %v5408_v9  ;;  %4401 = vmatmul.mubr.msk.f32.gmra.mrb[2].mxu1 %vm35_vm2, %v3886_v10  ;;  %v5563_v32 = vpop.permute.xlu1 %32 }
  0x7b   :  { %4380 = vmatprep.mubr.msk.f32.mxu0 %vm5334_vm0, %v5332_v1  ;;  %4403 = vmatprep.mubr.msk.f32.mxu1 %vm5334_vm0, %v5332_v1 }
  0x7c   :  { %4464 = vmatprep.subr.mxu0 %v5332_v1  ;;  %5066 = vmatprep.subr.bf16.mxu1 %v5336_v22 }
  0x7e   :  { %4381 = vmatmul.mubr.msk.f32.gmra.mrb[4].mxu0 %vm35_vm2, %v5432_v12  ;;  %4404 = vmatmul.mubr.msk.f32.gmra.mrb[4].mxu1 %vm35_vm2, %v3887_v13 }
  0x7f   :  { %4383 = vmatprep.mubr.msk.f32.mxu0 %vm5334_vm0, %v5332_v1  ;;  %4406 = vmatprep.mubr.msk.f32.mxu1 %vm5334_vm0, %v5332_v1 }
  0x82   :  { %4384 = vmatmul.mubr.msk.f32.gmra.mrb[6].mxu0 %vm35_vm2, %v5448_v14  ;;  %4407 = vmatmul.mubr.msk.f32.gmra.mrb[6].mxu1 %vm35_vm2, %v3888_v15 }
  0x83   :  { %4386 = vmatprep.mubr.msk.f32.mxu0 %vm5334_vm0, %v5332_v1  ;;  %4409 = vmatprep.mubr.msk.f32.mxu1 %vm5334_vm0, %v5332_v1 }
  0x86   :  { %4387 = vmatmul.mubr.msk.f32.gmra.mrb[8].mxu0 %vm35_vm2, %v5463_v16  ;;  %4410 = vmatmul.mubr.msk.f32.gmra.mrb[8].mxu1 %vm35_vm2, %v3889_v17 }
  0x87   :  { %4389 = vmatprep.mubr.msk.f32.mxu0 %vm5334_vm0, %v5332_v1  ;;  %4412 = vmatprep.mubr.msk.f32.mxu1 %vm5334_vm0, %v5332_v1 }
  0x8a   :  { %4390 = vmatmul.mubr.msk.f32.gmra.mrb[10].mxu0 %vm35_vm2, %v5478_v18  ;;  %4413 = vmatmul.mubr.msk.f32.gmra.mrb[10].mxu1 %vm35_vm2, %v3890_v19 }
  0x8b   :  { %4392 = vmatprep.mubr.msk.f32.mxu0 %vm5334_vm0, %v5332_v1  ;;  %4415 = vmatprep.mubr.msk.f32.mxu1 %vm5334_vm0, %v5332_v1 }
  0x8e   :  { %4393 = vmatmul.mubr.msk.f32.gmra.mrb[12].mxu0 %vm35_vm2, %v5493_v20  ;;  %4416 = vmatmul.mubr.msk.f32.gmra.mrb[12].mxu1 %vm35_vm2, %v3891_v21 }
  0x8f   :  { %4443 = vmatprep.mubr.msk.f32.mxu1 %vm5334_vm0, %v5332_v1  ;;  %4420 = vmatprep.mubr.msk.f32.mxu0 %vm5334_vm0, %v5332_v1 }
  0x92   :  { %4444 = vmatmul.mubr.msk.f32.vlgmr.msra.gmra.mrb[14].mxu1 %vm35_vm2, %v5392_v6  ;;  %4421 = vmatmul.mubr.msk.f32.vlgmr.msra.gmra.mrb[14].mxu0 %vm35_vm2, %v5392_v6 }
  0x93   :  { %4446 = vmatprep.mubr.msk.f32.mxu1 %vm5334_vm0, %v5332_v1  ;;  %4423 = vmatprep.mubr.msk.f32.mxu0 %vm5334_vm0, %v5332_v1 }
  0x96   :  { %4447 = vmatmul.mubr.msk.f32.gmra.mrb[16].mxu1 %vm35_vm2, %v5408_v9  ;;  %4424 = vmatmul.mubr.msk.f32.gmra.mrb[16].mxu0 %vm35_vm2, %v5408_v9 }
  0x97   :  { %4449 = vmatprep.mubr.msk.f32.mxu1 %vm5334_vm0, %v5332_v1  ;;  %4426 = vmatprep.mubr.msk.f32.mxu0 %vm5334_vm0, %v5332_v1 }
  0x9a   :  { %4450 = vmatmul.mubr.msk.f32.gmra.mrb[18].mxu1 %vm35_vm2, %v5432_v12  ;;  %4427 = vmatmul.mubr.msk.f32.gmra.mrb[18].mxu0 %vm35_vm2, %v5432_v12 }
  0x9b   :  { %4452 = vmatprep.mubr.msk.f32.mxu1 %vm5334_vm0, %v5332_v1  ;;  %4429 = vmatprep.mubr.msk.f32.mxu0 %vm5334_vm0, %v5332_v1 }
  0x9e   :  { %4453 = vmatmul.mubr.msk.f32.gmra.mrb[20].mxu1 %vm35_vm2, %v5448_v14  ;;  %4430 = vmatmul.mubr.msk.f32.gmra.mrb[20].mxu0 %vm35_vm2, %v5448_v14 }
  0x9f   :  { %4455 = vmatprep.mubr.msk.f32.mxu1 %vm5334_vm0, %v5332_v1  ;;  %4432 = vmatprep.mubr.msk.f32.mxu0 %vm5334_vm0, %v5332_v1 }
  0xa2   :  { %4456 = vmatmul.mubr.msk.f32.gmra.mrb[22].mxu1 %vm35_vm2, %v5463_v16  ;;  %4433 = vmatmul.mubr.msk.f32.gmra.mrb[22].mxu0 %vm35_vm2, %v5463_v16 }
  0xa3   :  { %4458 = vmatprep.mubr.msk.f32.mxu1 %vm5334_vm0, %v5332_v1  ;;  %4435 = vmatprep.mubr.msk.f32.mxu0 %vm5334_vm0, %v5332_v1 }
  0xa6   :  { %4459 = vmatmul.mubr.msk.f32.gmra.mrb[24].mxu1 %vm35_vm2, %v5478_v18  ;;  %4436 = vmatmul.mubr.msk.f32.gmra.mrb[24].mxu0 %vm35_vm2, %v5478_v18 }
  0xa7   :  { %4461 = vmatprep.mubr.msk.f32.mxu1 %vm5334_vm0, %v5332_v1  ;;  %4438 = vmatprep.mubr.msk.f32.mxu0 %vm5334_vm0, %v5332_v1 }
  0xaa   :  { %4462 = vmatmul.mubr.msk.f32.gmra.mrb[26].mxu1 %vm35_vm2, %v5493_v20  ;;  %4439 = vmatmul.mubr.msk.f32.gmra.mrb[26].mxu0 %vm35_vm2, %v5493_v20 }
  0xab   :  { %4501 = vmatprep.mubr.msk.f32.mxu1 %vm5334_vm0, %v5332_v1  ;;  %4466 = vmatprep.mubr.msk.f32.mxu0 %vm5334_vm0, %v5332_v1 }
 0x149   :  { %v312_v24 = vpop.f32.mrb[0].mxu1  ;;  %v126_v25 = vpop.f32.mrb[0].mxu0 }
 0x14a   :  { %v4399_v26 = vpop.f32.mrb[1].mxu1  ;;  %v4376_v27 = vpop.f32.mrb[1].mxu0  ;;  %v5566_v37 = vadd.f32 %v312_v24, %v5563_v32  ;;  %v5569_v38 = vadd.f32 %v126_v25, %v5563_v32 }
 0x14c   :  { %v346_v45 = vsel %vm160_vm3, %v5566_v37, inf  ;;  %v365_v46 = vsel %vm160_vm3, %v5566_v37, -inf  ;;  %v161_v47 = vsel %vm160_vm3, %v5569_v38, inf  ;;  %v181_v48 = vsel %vm160_vm3, %v5569_v38, -inf }
 0x14d   :  { %v317_v28 = vpop.f32.mrb[2].mxu1  ;;  %v131_v29 = vpop.f32.mrb[2].mxu0 }
 0x14e   :  { %v4402_v30 = vpop.f32.mrb[3].mxu1  ;;  %v4379_v31 = vpop.f32.mrb[3].mxu0  ;;  %v5572_v41 = vadd.f32 %v317_v28, %v5563_v32  ;;  %v5575_v44 = vadd.f32 %v131_v29, %v5563_v32 }
 0x150   :  { %v347_v51 = vsel %vm160_vm3, %v5572_v41, inf  ;;  %v366_v57 = vsel %vm160_vm3, %v5572_v41, -inf  ;;  %v162_v58 = vsel %vm160_vm3, %v5575_v44, inf  ;;  %v182_v59 = vsel %vm160_vm3, %v5575_v44, -inf }
 0x151   :  { %v322_v33 = vpop.f32.mrb[4].mxu1  ;;  %v136_v34 = vpop.f32.mrb[4].mxu0 }
 0x152   :  { %v4405_v35 = vpop.f32.mrb[5].mxu1  ;;  %v4382_v36 = vpop.f32.mrb[5].mxu0  ;;  %v5588_v52 = vadd.f32 %v322_v33, %v5563_v32  ;;  %v5603_v60 = vadd.f32 %v136_v34, %v5563_v32 }
 0x154   :  { %v348_v15 = vsel %vm160_vm3, %v5588_v52, inf  ;;  %v367_v25 = vsel %vm160_vm3, %v5588_v52, -inf  ;;  %v163_v27 = vsel %vm160_vm3, %v5603_v60, inf  ;;  %v183_v28 = vsel %vm160_vm3, %v5603_v60, -inf }
 0x155   :  { %v327_v39 = vpop.f32.mrb[6].mxu1  ;;  %v141_v40 = vpop.f32.mrb[6].mxu0 }
 0x156   :  { %v4408_v42 = vpop.f32.mrb[7].mxu1  ;;  %v4385_v43 = vpop.f32.mrb[7].mxu0  ;;  %v5616_v17 = vadd.f32 %v141_v40, %v5563_v32  ;;  %v5627_v26 = vadd.f32 %v327_v39, %v5563_v32 }
 0x158   :  { %v164_v43 = vsel %vm160_vm3, %v5616_v17, inf }
 0x159   :  { %v332_v49 = vpop.f32.mrb[8].mxu1  ;;  %v146_v50 = vpop.f32.mrb[8].mxu0 }
 0x15a   :  { %v5591_v53 = vadd.f32 %v332_v49, %v5563_v32  ;;  %v4411_v54 = vpop.f32.mrb[9].mxu1  ;;  %v5594_v55 = vadd.f32 %v146_v50, %v5563_v32  ;;  %v4388_v56 = vpop.f32.mrb[9].mxu0 }
 0x15c   :  { %v350_v61 = vsel %vm160_vm3, %v5591_v53, inf  ;;  %v369_v62 = vsel %vm160_vm3, %v5591_v53, -inf  ;;  %v165_v63 = vsel %vm160_vm3, %v5594_v55, inf  ;;  %v185_v0 = vsel %vm160_vm3, %v5594_v55, -inf }
 0x15d   :  { %v351_v3 = vmin.f32 %v346_v45, %v350_v61  ;;  %v370_v4 = vmax.f32 %v365_v46, %v369_v62  ;;  %v166_v7 = vmin.f32 %v161_v47, %v165_v63  ;;  %v186_v8 = vmax.f32 %v181_v48, %v185_v0  ;;  %v337_v10 = vpop.f32.mrb[10].mxu1  ;;  %v151_v13 = vpop.f32.mrb[10].mxu0 }
 0x15e   :  { %v5619_v19 = vadd.f32 %v337_v10, %v5563_v32  ;;  %v4414_v21 = vpop.f32.mrb[11].mxu1  ;;  %v5622_v23 = vadd.f32 %v151_v13, %v5563_v32  ;;  %v4391_v24 = vpop.f32.mrb[11].mxu0  ;;  %v184_v45 = vsel %vm160_vm3, %v5616_v17, -inf }
 0x160   :  { %v352_v29 = vsel %vm160_vm3, %v5619_v19, inf  ;;  %v371_v30 = vsel %vm160_vm3, %v5619_v19, -inf  ;;  %v167_v31 = vsel %vm160_vm3, %v5622_v23, inf  ;;  %v187_v33 = vsel %vm160_vm3, %v5622_v23, -inf }
 0x161   :  { %v353_v34 = vmin.f32 %v347_v51, %v352_v29  ;;  %v372_v35 = vmax.f32 %v366_v57, %v371_v30  ;;  %v168_v36 = vmin.f32 %v162_v58, %v167_v31  ;;  %v188_v39 = vmax.f32 %v182_v59, %v187_v33  ;;  %v156_v40 = vpop.f32.mrb[12].mxu0  ;;  %v342_v42 = vpop.f32.mrb[12].mxu1 }
 0x162   :  { %v5646_v46 = vadd.f32 %v156_v40, %v5563_v32  ;;  %v5649_v47 = vadd.f32 %v342_v42, %v5563_v32  ;;  %v4417_v48 = vpop.f32.mrb[13].mxu1  ;;  %v4394_v49 = vpop.f32.mrb[13].mxu0 }
 0x163   :  { %v356_v50 = vmin.f32 %v351_v3, %v353_v34  ;;  %v375_v51 = vmax.f32 %v370_v4, %v372_v35  ;;  %v172_v54 = vmin.f32 %v166_v7, %v168_v36  ;;  %v191_v56 = vmax.f32 %v186_v8, %v188_v39 }
 0x164   :  { %v170_v57 = vsel %vm169_vm4, %v5646_v46, inf  ;;  %v189_v58 = vsel %vm169_vm4, %v5646_v46, -inf  ;;  %v354_v59 = vsel %vm169_vm4, %v5649_v47, inf  ;;  %v373_v61 = vsel %vm169_vm4, %v5649_v47, -inf }
 0x165   :  { %v171_v32 = vmin.f32 %v163_v27, %v170_v57  ;;  %v190_v62 = vmax.f32 %v183_v28, %v189_v58  ;;  %v355_v63 = vmin.f32 %v348_v15, %v354_v59  ;;  %v374_v0 = vmax.f32 %v367_v25, %v373_v61  ;;  %v709_v3 = vpop.f32.mrb[14].mxu1  ;;  %v5659_v4 = vpop.f32.mrb[14].mxu0 }
 0x166   :  { %v349_v7 = vsel %vm160_vm3, %v5627_v26, inf  ;;  %v368_v8 = vsel %vm160_vm3, %v5627_v26, -inf  ;;  %v4445_v10 = vpop.f32.mrb[15].mxu1  ;;  %v4422_v13 = vpop.f32.mrb[15].mxu0 }
 0x167   :  { %v173_v21 = vmin.f32 %v171_v32, %v164_v43  ;;  %v192_v24 = vmax.f32 %v190_v62, %v184_v45  ;;  %v357_v29 = vmin.f32 %v355_v63, %v349_v7  ;;  %v376_v30 = vmax.f32 %v374_v0, %v368_v8 }
 0x169   :  { %v174_v27 = vmin.f32 %v172_v54, %v173_v21  ;;  %v193_v28 = vmax.f32 %v191_v56, %v192_v24  ;;  %v358_v15 = vmin.f32 %v356_v50, %v357_v29  ;;  %v377_v25 = vmax.f32 %v375_v51, %v376_v30  ;;  %v714_v31 = vpop.f32.mrb[16].mxu1  ;;  %v5671_v34 = vpop.f32.mrb[16].mxu0 }
 0x16a   :  { %v5067_v35 = vpack.c.bf16 %v714_v31, %v709_v3  ;;  %v4448_v36 = vpop.f32.mrb[17].mxu1  ;;  %v4425_v39 = vpop.f32.mrb[17].mxu0 }
 0x16b   :  { %v175_v40 = vrot.slane %v174_v27, 4  ;;  %v194_v42 = vrot.slane %v193_v28, 4  ;;  %v359_v43 = vrot.slane %v358_v15, 4  ;;  %v378_v45 = vrot.slane %v377_v25, 4 }
 0x16c   :  { %5069 = vmatpush3.bf16.xpose.msk.msra.mxu1 %vm5667_vm6, %v5067_v35 }
 0x16d   :  { %v176_v48 = vmin.f32 %v174_v27, %v175_v40  ;;  %v195_v49 = vmax.f32 %v193_v28, %v194_v42  ;;  %v360_v50 = vmin.f32 %v358_v15, %v359_v43  ;;  %v379_v51 = vmax.f32 %v377_v25, %v378_v45  ;;  %v719_v54 = vpop.f32.mrb[18].mxu1  ;;  %5070 = vmatprep.subr.bf16.mxu1 %v5336_v22  ;;  %v5676_v56 = vpop.f32.mrb[18].mxu0 }
 0x16e   :  { %v4451_v57 = vpop.f32.mrb[19].mxu1  ;;  %v4428_v58 = vpop.f32.mrb[19].mxu0 }
 0x16f   :  { %v177_v59 = vrot.slane %v176_v48, 2  ;;  %v196_v61 = vrot.slane %v195_v49, 2  ;;  %v361_v32 = vrot.slane %v360_v50, 2  ;;  %v380_v62 = vrot.slane %v379_v51, 2 }
 0x171   :  { %v178_v63 = vmin.f32 %v176_v48, %v177_v59  ;;  %v197_v0 = vmax.f32 %v195_v49, %v196_v61  ;;  %v362_v3 = vmin.f32 %v360_v50, %v361_v32  ;;  %v381_v7 = vmax.f32 %v379_v51, %v380_v62  ;;  %v724_v8 = vpop.f32.mrb[20].mxu1  ;;  %v5678_v10 = vpop.f32.mrb[20].mxu0 }
 0x172   :  { %v5071_v13 = vpack.c.bf16 %v724_v8, %v719_v54  ;;  %v4454_v21 = vpop.f32.mrb[21].mxu1  ;;  %v4431_v24 = vpop.f32.mrb[21].mxu0 }
 0x173   :  { %v179_v29 = vrot.slane %v178_v63, 1  ;;  %v198_v30 = vrot.slane %v197_v0, 1  ;;  %v363_v27 = vrot.slane %v362_v3, 1  ;;  %v382_v28 = vrot.slane %v381_v7, 1  ;;  %v5695_v50 = vpop.permute.xlu1 %743 }
 0x174   :  { %5073 = vmatpush3.bf16.xpose.msk.msra.mxu1 %vm5667_vm6, %v5071_v13  ;;  %4465 = vmatpush3.msk.msra.mxu0 %vm57_vm1, %v5695_v50 }
 0x175   :  { %v5682_v15 = vmin.f32 %v178_v63, %v179_v29  ;;  %v199_v25 = vmax.f32 %v197_v0, %v198_v30  ;;  %v5684_v31 = vmin.f32 %v362_v3, %v363_v27  ;;  %v383_v35 = vmax.f32 %v381_v7, %v382_v28  ;;  %v729_v36 = vpop.f32.mrb[22].mxu1  ;;  %5074 = vmatprep.subr.bf16.mxu1 %v5336_v22  ;;  %v5687_v39 = vpop.f32.mrb[22].mxu0 }
 0x176   :  { %v4457_v40 = vpop.f32.mrb[23].mxu1  ;;  %v4434_v42 = vpop.f32.mrb[23].mxu0  ;;  %4467 = vmatmul.mubr.msk.f32.vlgmr.msra.gmra.mrb[28].mxu0 %vm35_vm2, %v5392_v6  ;;  %5078 = vmatprep.subr.bf16.mxu0 %v5336_v22 }
 0x177   :  { %v206_v43 = vsub.f32 %v5646_v46, %v5682_v15  ;;  %v207_v45 = vsub.f32 %v199_v25, %v5682_v15  ;;  %v390_v48 = vsub.f32 %v5649_v47, %v5684_v31  ;;  %v391_v49 = vsub.f32 %v383_v35, %v5684_v31  ;;  %4469 = vmatprep.mubr.msk.f32.mxu0 %vm5334_vm0, %v5332_v1  ;;  %v483_v40 = vld [vmem:[%s6804_s2 + $0x10] sm:$0xff] }
 0x178   :  { %v384_v51 = vsub.f32 %v5566_v37, %v5684_v31  ;;  %v200_v54 = vsub.f32 %v5569_v38, %v5682_v15  ;;  %v201_v57 = vsub.f32 %v5575_v44, %v5682_v15  ;;  %v385_v46 = vsub.f32 %v5572_v41, %v5684_v31 }
 0x179   :  { %5166 = vrcp.f32 %v207_v45  ;;  %v734_v47 = vpop.f32.mrb[24].mxu1  ;;  %v202_v58 = vsub.f32 %v5603_v60, %v5682_v15  ;;  %v386_v37 = vsub.f32 %v5588_v52, %v5684_v31  ;;  %v203_v38 = vsub.f32 %v5616_v17, %v5682_v15  ;;  %v5713_v59 = vpop.f32.mrb[24].mxu0 }
 0x17a   :  { %5168 = vrcp.f32 %v391_v49  ;;  %v5075_v41 = vpack.c.bf16 %v734_v47, %v729_v36  ;;  %v4460_v44 = vpop.f32.mrb[25].mxu1  ;;  %v387_v61 = vsub.f32 %v5627_v26, %v5684_v31  ;;  %v204_v60 = vsub.f32 %v5594_v55, %v5682_v15  ;;  %v4437_v52 = vpop.f32.mrb[25].mxu0  ;;  %4470 = vmatmul.mubr.msk.f32.gmra.mrb[30].mxu0 %vm35_vm2, %v5408_v9 }
 0x17b   :  { %v388_v17 = vsub.f32 %v5591_v53, %v5684_v31  ;;  %v205_v6 = vsub.f32 %v5622_v23, %v5682_v15  ;;  %v389_v32 = vsub.f32 %v5619_v19, %v5684_v31  ;;  %4472 = vmatprep.mubr.msk.f32.mxu0 %vm5334_vm0, %v5332_v1 }
 0x17c   :  { %5077 = vmatpush3.bf16.xpose.msk.msra.mxu1 %vm5667_vm6, %v5075_v41 }
 0x17d   :  { %v739_v26 = vpop.f32.mrb[26].mxu1  ;;  %4499 = vmatprep.subr.mxu1 %v5332_v1  ;;  %v635_v55 = vpop.f32.mrb[26].mxu0 }
 0x17e   :  { %v4463_v62 = vpop.f32.mrb[27].mxu1  ;;  %v4440_v63 = vpop.f32.mrb[27].mxu0  ;;  %4473 = vmatmul.mubr.msk.f32.gmra.mrb[32].mxu0 %vm35_vm2, %v5432_v12 }
 0x17f   :  { %4475 = vmatprep.mubr.msk.f32.mxu0 %vm5334_vm0, %v5332_v1 }
 0x182   :  { %4476 = vmatmul.mubr.msk.f32.gmra.mrb[34].mxu0 %vm35_vm2, %v5448_v14 }
 0x183   :  { %v5167_v53 = vpop.eup %5166  ;;  %4478 = vmatprep.mubr.msk.f32.mxu0 %vm5334_vm0, %v5332_v1 }
 0x184   :  { %v5169_v19 = vpop.eup %5168  ;;  %v209_v23 = vmul.f32 100.0, %v5167_v53  ;;  %4500 = vmatpush3.xpose.msk.msra.mxu1 %vm847_vm5, %v739_v26  ;;  %v486_v26 = vld [vmem:[%s6804_s2 + $0x28] sm:$0xff] }
 0x185   :  { %v393_v0 = vmul.f32 100.0, %v5169_v19  ;;  %4557 = vmatprep.subr.mxu1 %v5332_v1 }
 0x186   :  { %v210_v9 = vmul.f32 %v209_v23, %v200_v54  ;;  %v211_v3 = vmul.f32 %v209_v23, %v201_v57  ;;  %v212_v7 = vmul.f32 %v209_v23, %v202_v58  ;;  %v213_v8 = vmul.f32 %v209_v23, %v203_v38  ;;  %4479 = vmatmul.mubr.msk.f32.gmra.mrb[36].mxu0 %vm35_vm2, %v5463_v16  ;;  %v484_v54 = vld [vmem:[%s6804_s2 + $0x18] sm:$0xff] }
 0x187   :  { %4502 = vmatmul.mubr.msk.f32.vlgmr.msra.gmra.mrb[28].mxu1 %vm847_vm5, %v5659_v4  ;;  %v394_v12 = vmul.f32 %v393_v0, %v384_v51  ;;  %v395_v13 = vmul.f32 %v393_v0, %v385_v46  ;;  %v396_v21 = vmul.f32 %v393_v0, %v386_v37  ;;  %v397_v24 = vmul.f32 %v393_v0, %v387_v61 }
 0x188   :  { %406 = vperm.xlu0 %5164, %v210_v9   ;;  %4504 = vmatprep.mubr.msk.f32.mxu1 %vm5334_vm0, %v5332_v1  ;;  %v214_v14 = vmul.f32 %v209_v23, %v204_v60  ;;  %v398_v29 = vmul.f32 %v393_v0, %v388_v17  ;;  %v215_v30 = vmul.f32 %v209_v23, %v205_v6  ;;  %v402_v16 = vand.u32 127, %v24_v2 }
 0x189   :  { %441 = vperm.xlu1 %5165, %v394_v12   ;;  %v399_v27 = vmul.f32 %v393_v0, %v389_v32  ;;  %v216_v28 = vmul.f32 %v209_v23, %v206_v43  ;;  %v400_v15 = vmul.f32 %v393_v0, %v390_v48  ;;  %4481 = vmatprep.mubr.msk.f32.mxu0 %vm5334_vm0, %v5332_v1 }
 0x18a   :  { %4482 = vmatmul.mubr.msk.f32.gmra.mrb[38].mxu0 %vm35_vm2, %v5478_v18  ;;  %vm403_vm7 = vcmp.lt.s32.totalorder %v402_v16, 50  ;;  %v481_v18 = vld [vmem:[%s6804_s2] sm:$0xff] }
 0x18b   :  { %4505 = vmatmul.mubr.msk.f32.gmra.mrb[30].mxu1 %vm847_vm5, %v5671_v34  ;;  %4484 = vmatprep.mubr.msk.f32.mxu0 %vm5334_vm0, %v5332_v1 }
 0x18c   :  { %446 = vperm.xlu0 %5164, %v395_v13   ;;  %4507 = vmatprep.mubr.msk.f32.mxu1 %vm5334_vm0, %v5332_v1 }
 0x18d   :  { %411 = vperm.xlu1 %5165, %v211_v3   ;;  %v487_v3 = vld [vmem:[%s6804_s2 + $0x30] sm:$0x3] }
 0x18e   :  { %4485 = vmatmul.mubr.msk.f32.gmra.mrb[40].mxu0 %vm35_vm2, %v5493_v20 }
 0x18f   :  { %4508 = vmatmul.mubr.msk.f32.gmra.mrb[32].mxu1 %vm847_vm5, %v5676_v56  ;;  %4536 = vmatprep.mubr.msk.f32.mxu0 %vm5334_vm0, %v5332_v1 }
 0x190   :  { %451 = vperm.xlu0 %5164, %v396_v21   ;;  %4510 = vmatprep.mubr.msk.f32.mxu1 %vm5334_vm0, %v5332_v1 }
 0x191   :  { %416 = vperm.xlu1 %5165, %v212_v7  }
 0x193   :  { %4511 = vmatmul.mubr.msk.f32.gmra.mrb[34].mxu1 %vm847_vm5, %v5678_v10  ;;  %v482_v10 = vld [vmem:[%s6804_s2 + $0x8] sm:$0xff] }
 0x194   :  { %456 = vperm.xlu0 %5164, %v397_v24   ;;  %4513 = vmatprep.mubr.msk.f32.mxu1 %vm5334_vm0, %v5332_v1 }
 0x195   :  { %421 = vperm.xlu1 %5165, %v213_v8  }
 0x197   :  { %4514 = vmatmul.mubr.msk.f32.gmra.mrb[36].mxu1 %vm847_vm5, %v5687_v39 }
 0x198   :  { %461 = vperm.xlu0 %5164, %v398_v29   ;;  %4516 = vmatprep.mubr.msk.f32.mxu1 %vm5334_vm0, %v5332_v1 }
 0x199   :  { %426 = vperm.xlu1 %5165, %v214_v14  }
 0x19b   :  { %4517 = vmatmul.mubr.msk.f32.gmra.mrb[38].mxu1 %vm847_vm5, %v5713_v59  ;;  %v485_v59 = vld [vmem:[%s6804_s2 + $0x20] sm:$0xff] }
 0x19c   :  { %466 = vperm.xlu0 %5164, %v399_v27   ;;  %4519 = vmatprep.mubr.msk.f32.mxu1 %vm5334_vm0, %v5332_v1 }
 0x19d   :  { %431 = vperm.xlu1 %5165, %v215_v30  }
 0x19f   :  { %4520 = vmatmul.mubr.msk.f32.gmra.mrb[40].mxu1 %vm847_vm5, %v635_v55 }
 0x1a0   :  { %471 = vperm.xlu0 %5164, %v400_v15   ;;  %4559 = vmatprep.mubr.msk.f32.mxu1 %vm5334_vm0, %v5332_v1 }
 0x1a1   :  { %436 = vperm.xlu1 %5165, %v216_v28  }
 0x207   :  { %v407_v20 = vpop.permute.xlu0 %406 }
 0x208   :  { %v442_v4 = vpop.permute.xlu1 %441 }
 0x209   :  { %v474_v34 = vsel %vm403_vm7, %v407_v20, %v442_v4 }
 0x20a   :  { %v488_v56 = vsub.f32 %v481_v18, %v474_v34 }
 0x20b   :  { %v447_v25 = vpop.permute.xlu0 %446 }
 0x20c   :  { %v495_v31 = vmin.f32 %v488_v56, 80.0  ;;  %v412_v35 = vpop.permute.xlu1 %411 }
 0x20d   :  { %v475_v36 = vsel %vm403_vm7, %v412_v35, %v447_v25 }
 0x20e   :  { %v502_v2 = vmul.f32 1.442695, %v495_v31  ;;  %v489_v39 = vsub.f32 %v482_v10, %v475_v36 }
 0x20f   :  { %v452_v42 = vpop.permute.xlu0 %451 }
 0x210   :  { %5170 = vpow2.f32 %v502_v2  ;;  %v496_v43 = vmin.f32 %v489_v39, 80.0  ;;  %v417_v45 = vpop.permute.xlu1 %416 }
 0x211   :  { %v476_v48 = vsel %vm403_vm7, %v417_v45, %v452_v42 }
 0x212   :  { %v504_v49 = vmul.f32 1.442695, %v496_v43  ;;  %v490_v51 = vsub.f32 %v483_v40, %v476_v48 }
 0x213   :  { %v457_v57 = vpop.permute.xlu0 %456 }
 0x214   :  { %5172 = vpow2.f32 %v504_v49  ;;  %v497_v46 = vmin.f32 %v490_v51, 80.0  ;;  %v422_v47 = vpop.permute.xlu1 %421 }
 0x215   :  { %v477_v58 = vsel %vm403_vm7, %v422_v47, %v457_v57 }
 0x216   :  { %v506_v37 = vmul.f32 1.442695, %v497_v46  ;;  %v491_v38 = vsub.f32 %v484_v54, %v477_v58 }
 0x217   :  { %v462_v41 = vpop.permute.xlu0 %461 }
 0x218   :  { %5174 = vpow2.f32 %v506_v37  ;;  %v498_v44 = vmin.f32 %v491_v38, 80.0  ;;  %v427_v61 = vpop.permute.xlu1 %426 }
 0x219   :  { %v478_v60 = vsel %vm403_vm7, %v427_v61, %v462_v41 }
 0x21a   :  { %v5171_v52 = vpop.eup %5170  ;;  %v508_v17 = vmul.f32 1.442695, %v498_v44  ;;  %v492_v6 = vsub.f32 %v485_v59, %v478_v60 }
 0x21b   :  { %v516_v32 = vadd.f32 1.0, %v5171_v52  ;;  %v467_v55 = vpop.permute.xlu0 %466 }
 0x21c   :  { %5176 = vpow2.f32 %v508_v17  ;;  %v499_v62 = vmin.f32 %v492_v6, 80.0  ;;  %v432_v63 = vpop.permute.xlu1 %431 }
 0x21d   :  { %5178 = vrcp.f32 %v516_v32  ;;  %v479_v53 = vsel %vm403_vm7, %v432_v63, %v467_v55 }
 0x21e   :  { %v5173_v19 = vpop.eup %5172  ;;  %v510_v23 = vmul.f32 1.442695, %v499_v62  ;;  %v493_v0 = vsub.f32 %v486_v26, %v479_v53 }
 0x21f   :  { %v517_v9 = vadd.f32 1.0, %v5173_v19  ;;  %v472_v7 = vpop.permute.xlu0 %471 }
 0x220   :  { %5180 = vpow2.f32 %v510_v23  ;;  %v500_v8 = vmin.f32 %v493_v0, 80.0  ;;  %v437_v12 = vpop.permute.xlu1 %436 }
 0x221   :  { %5182 = vrcp.f32 %v517_v9  ;;  %v480_v13 = vsel %vm403_vm7, %v437_v12, %v472_v7 }
 0x222   :  { %v5175_v21 = vpop.eup %5174  ;;  %v512_v24 = vmul.f32 1.442695, %v500_v8  ;;  %v494_v14 = vsub.f32 %v487_v3, %v480_v13 }
 0x223   :  { %v518_v29 = vadd.f32 1.0, %v5175_v21 }
 0x224   :  { %5184 = vpow2.f32 %v512_v24  ;;  %v501_v30 = vmin.f32 %v494_v14, 80.0 }
 0x225   :  { %5186 = vrcp.f32 %v518_v29 }
 0x226   :  { %v5177_v27 = vpop.eup %5176  ;;  %v514_v28 = vmul.f32 1.442695, %v501_v30 }
 0x227   :  { %v5815_v15 = vpop.eup %5178  ;;  %v519_v18 = vadd.f32 1.0, %v5177_v27 }
 0x228   :  { %530 = vst [vmem:[%s6805_s4] sm:$0xff] %v5815_v15  ;;  %5188 = vpow2.f32 %v514_v28 }
 0x229   :  { %5190 = vrcp.f32 %v519_v18 }
 0x22a   :  { %v5181_v16 = vpop.eup %5180 }
 0x22b   :  { %v5821_v20 = vpop.eup %5182  ;;  %v520_v4 = vadd.f32 1.0, %v5181_v16 }
 0x22c   :  { %531 = vst [vmem:[%s6805_s4 + $0x8] sm:$0xff] %v5821_v20 }
 0x22d   :  { %5192 = vrcp.f32 %v520_v4 }
 0x22e   :  { %v5185_v34 = vpop.eup %5184 }
 0x22f   :  { %v5827_v56 = vpop.eup %5186  ;;  %v521_v10 = vadd.f32 1.0, %v5185_v34 }
 0x230   :  { %532 = vst [vmem:[%s6805_s4 + $0x10] sm:$0xff] %v5827_v56 }
 0x231   :  { %5194 = vrcp.f32 %v521_v10 }
 0x232   :  { %v5189_v25 = vpop.eup %5188 }
 0x233   :  { %v5833_v31 = vpop.eup %5190  ;;  %v522_v35 = vadd.f32 1.0, %v5189_v25 }
 0x234   :  { %533 = vst [vmem:[%s6805_s4 + $0x18] sm:$0xff] %v5833_v31 }
 0x235   :  { %5196 = vrcp.f32 %v522_v35 }
 0x237   :  { %v5839_v36 = vpop.eup %5192 }
 0x238   :  { %534 = vst [vmem:[%s6805_s4 + $0x20] sm:$0xff] %v5839_v36 }
 0x23b   :  { %v5845_v2 = vpop.eup %5194 }
 0x23c   :  { %535 = vst [vmem:[%s6805_s4 + $0x28] sm:$0xff] %v5845_v2 }
 0x23f   :  { %v5851_v39 = vpop.eup %5196 }
 0x240   :  { %536 = vst [vmem:[%s6805_s4 + $0x30] sm:$0x3] %v5851_v39 }
 0x249   :  { %v813_v19 = vpop.f32.mrb[28].mxu0 }
 0x24a   :  { %v4468_v23 = vpop.f32.mrb[29].mxu0 }
 0x24b   :  { %v5907_v23 = vld [vmem:[%s6802_s1] sm:$0xff] }
 0x24d   :  { %v818_v0 = vpop.f32.mrb[30].mxu0 }
 0x24e   :  { %v5079_v9 = vpack.c.bf16 %v818_v0, %v813_v19  ;;  %v4471_v3 = vpop.f32.mrb[31].mxu0 }
 0x250   :  { %5080 = vmatpush3.bf16.msra.mxu0 %v5079_v9 }
 0x251   :  { %v823_v7 = vpop.f32.mrb[32].mxu0  ;;  %5081 = vmatprep.subr.bf16.mxu0 %v5336_v22 }
 0x252   :  { %v4474_v8 = vpop.f32.mrb[33].mxu0 }
 0x255   :  { %v828_v12 = vpop.f32.mrb[34].mxu0 }
 0x256   :  { %v5082_v13 = vpack.c.bf16 %v828_v12, %v823_v7  ;;  %v4477_v21 = vpop.f32.mrb[35].mxu0 }
 0x258   :  { %5083 = vmatpush3.bf16.msra.mxu0 %v5082_v13 }
 0x259   :  { %v833_v24 = vpop.f32.mrb[36].mxu0  ;;  %5084 = vmatprep.subr.bf16.mxu0 %v5336_v22 }
 0x25a   :  { %v956_v40 = vpop.f32.mrb[28].mxu1  ;;  %v4480_v14 = vpop.f32.mrb[37].mxu0 }
 0x25b   :  { %v990_v42 = vmul.f32 %v5815_v15, %v956_v40  ;;  %v4503_v43 = vpop.f32.mrb[29].mxu1 }
 0x25d   :  { %v998_v45 = vsel %vm997_vm8, %v990_v42, -inf  ;;  %v838_v29 = vpop.f32.mrb[38].mxu0 }
 0x25e   :  { %999 = vmax.xlane.f32.xlu1 %v998_v45  ;;  %v961_v48 = vpop.f32.mrb[30].mxu1  ;;  %v5085_v30 = vpack.c.bf16 %v838_v29, %v833_v24  ;;  %v4483_v27 = vpop.f32.mrb[39].mxu0 }
 0x25f   :  { %v991_v49 = vmul.f32 %v5821_v20, %v961_v48  ;;  %v4506_v51 = vpop.f32.mrb[31].mxu1 }
 0x260   :  { %5086 = vmatpush3.bf16.msra.mxu0 %v5085_v30 }
 0x261   :  { %v1001_v54 = vsel %vm997_vm8, %v991_v49, -inf  ;;  %4534 = vmatprep.subr.mxu0 %v5332_v1 }
 0x262   :  { %1002 = vmax.xlane.f32.xlu0 %v1001_v54  ;;  %v966_v57 = vpop.f32.mrb[32].mxu1 }
 0x263   :  { %v992_v46 = vmul.f32 %v5827_v56, %v966_v57  ;;  %v4509_v47 = vpop.f32.mrb[33].mxu1 }
 0x265   :  { %v1004_v58 = vsel %vm997_vm8, %v992_v46, -inf }
 0x266   :  { %1005 = vmax.xlane.f32.xlu0 %v1004_v58  ;;  %v971_v37 = vpop.f32.mrb[34].mxu1 }
 0x267   :  { %v993_v38 = vmul.f32 %v5833_v31, %v971_v37  ;;  %v4512_v59 = vpop.f32.mrb[35].mxu1 }
 0x269   :  { %v1007_v41 = vsel %vm997_vm8, %v993_v38, -inf }
 0x26a   :  { %1008 = vmax.xlane.f32.xlu1 %v1007_v41  ;;  %v976_v44 = vpop.f32.mrb[36].mxu1 }
 0x26b   :  { %v994_v61 = vmul.f32 %v5839_v36, %v976_v44  ;;  %v4515_v60 = vpop.f32.mrb[37].mxu1 }
 0x26d   :  { %v1010_v52 = vsel %vm997_vm8, %v994_v61, -inf }
 0x26e   :  { %1011 = vmax.xlane.f32.xlu0 %v1010_v52  ;;  %v981_v17 = vpop.f32.mrb[38].mxu1 }
 0x26f   :  { %v995_v6 = vmul.f32 %v5845_v2, %v981_v17  ;;  %v4518_v32 = vpop.f32.mrb[39].mxu1 }
 0x271   :  { %v1013_v26 = vsel %vm997_vm8, %v995_v6, -inf }
 0x272   :  { %1014 = vmax.xlane.f32.xlu1 %v1013_v26  ;;  %v986_v55 = vpop.f32.mrb[40].mxu1 }
 0x273   :  { %v996_v62 = vmul.f32 %v5851_v39, %v986_v55  ;;  %v4521_v63 = vpop.f32.mrb[41].mxu1 }
 0x275   :  { %v1017_v53 = vsel %vm1016_vm9, %v996_v62, -inf }
 0x276   :  { %1018 = vmax.xlane.f32.xlu0 %v1017_v53  ;;  %v843_v53 = vpop.f32.mrb[40].mxu0 }
 0x277   :  { %v4486_v19 = vpop.f32.mrb[41].mxu0  ;;  %4535 = vmatpush3.msk.msra.mxu0 %vm1097_vm10, %v843_v53 }
 0x278   :  { %4580 = vmatprep.subr.mxu0 %v5332_v1 }
 0x2eb   :  { %v1000_v28 = vpop.xlane.xlu1 %999 }
 0x2ec   :  { %v1020_v18 = vsub.f32 %v990_v42, %v1000_v28 }
 0x2ee   :  { %v1027_v16 = vmul.f32 1.442695, %v1020_v18 }
 0x2ef   :  { %v1003_v4 = vpop.xlane.xlu0 %1002 }
 0x2f0   :  { %5198 = vpow2.f32 %v1027_v16  ;;  %v1021_v34 = vsub.f32 %v991_v49, %v1003_v4 }
 0x2f2   :  { %v1029_v10 = vmul.f32 1.442695, %v1021_v34 }
 0x2f3   :  { %v1006_v25 = vpop.xlane.xlu0 %1005 }
 0x2f4   :  { %5200 = vpow2.f32 %v1029_v10  ;;  %v1022_v35 = vsub.f32 %v992_v46, %v1006_v25  ;;  %v5963_v25 = vld [vmem:[%s6803_s0] sm:$0xff] }
 0x2f6   :  { %v1031_v40 = vmul.f32 1.442695, %v1022_v35  ;;  %v5975_v35 = vld [vmem:[%s6803_s0 + $0x8] sm:$0xff] }
 0x2f7   :  { %v1009_v43 = vpop.xlane.xlu1 %1008 }
 0x2f8   :  { %5202 = vpow2.f32 %v1031_v40  ;;  %v1023_v45 = vsub.f32 %v993_v38, %v1009_v43  ;;  %v5984_v40 = vld [vmem:[%s6803_s0 + $0x10] sm:$0xff]  ;;  %v5314_v43 = vld [vmem:[%s6803_s0 + $0x18] sm:$0xff] }
 0x2fa   :  { %v5874_v48 = vpop.eup %5198  ;;  %v1033_v51 = vmul.f32 1.442695, %v1023_v45  ;;  %v5315_v45 = vld [vmem:[%s6803_s0 + $0x20] sm:$0xff] }
 0x2fb   :  { %v1012_v54 = vpop.xlane.xlu0 %1011  ;;  %v1041_v57 = vsel %vm997_vm8, %v5874_v48, 0.0 }
 0x2fc   :  { %5204 = vpow2.f32 %v1033_v51  ;;  %v1024_v42 = vsub.f32 %v994_v61, %v1012_v54  ;;  %1042 = vadd.xlane.f32.xlu1 %v1041_v57  ;;  %v5317_v51 = vld [vmem:[%s6803_s0 + $0x30] sm:$0x3] }
 0x2fe   :  { %v5878_v47 = vpop.eup %5200  ;;  %v1035_v49 = vmul.f32 1.442695, %v1024_v42 }
 0x2ff   :  { %v1015_v58 = vpop.xlane.xlu1 %1014  ;;  %v1044_v46 = vsel %vm997_vm8, %v5878_v47, 0.0 }
 0x300   :  { %5206 = vpow2.f32 %v1035_v49  ;;  %v1025_v37 = vsub.f32 %v995_v6, %v1015_v58  ;;  %1045 = vadd.xlane.f32.xlu0 %v1044_v46 }
 0x302   :  { %v5882_v38 = vpop.eup %5202  ;;  %v1037_v59 = vmul.f32 1.442695, %v1025_v37 }
 0x303   :  { %v1019_v41 = vpop.xlane.xlu0 %1018  ;;  %v1047_v44 = vsel %vm997_vm8, %v5882_v38, 0.0 }
 0x304   :  { %5208 = vpow2.f32 %v1037_v59  ;;  %v1026_v61 = vsub.f32 %v996_v62, %v1019_v41  ;;  %1048 = vadd.xlane.f32.xlu1 %v1047_v44 }
 0x306   :  { %v5886_v60 = vpop.eup %5204  ;;  %v1039_v52 = vmul.f32 1.442695, %v1026_v61 }
 0x307   :  { %v1050_v17 = vsel %vm997_vm8, %v5886_v60, 0.0 }
 0x308   :  { %5210 = vpow2.f32 %v1039_v52  ;;  %1051 = vadd.xlane.f32.xlu0 %v1050_v17 }
 0x30a   :  { %v5890_v6 = vpop.eup %5206 }
 0x30b   :  { %v1053_v32 = vsel %vm997_vm8, %v5890_v6, 0.0 }
 0x30c   :  { %1054 = vadd.xlane.f32.xlu1 %v1053_v32 }
 0x30e   :  { %v5894_v26 = vpop.eup %5208 }
 0x30f   :  { %v1056_v55 = vsel %vm997_vm8, %v5894_v26, 0.0 }
 0x310   :  { %1057 = vadd.xlane.f32.xlu0 %v1056_v55 }
 0x312   :  { %v5898_v62 = vpop.eup %5210 }
 0x313   :  { %v1059_v63 = vsel %vm1016_vm9, %v5898_v62, 0.0 }
 0x314   :  { %1060 = vadd.xlane.f32.xlu1 %v1059_v63 }
 0x325   :  { %1465 = vrot.lane.b32.xlu1 %v5907_v23, %s5339_s25 }
 0x326   :  { %1201 = vrot.lane.b32.xlu0 %v5907_v23, %s5340_s26 }
 0x329   :  { %1361 = vrot.lane.b32.xlu1 %v5907_v23, %s5341_s27 }
 0x32a   :  { %1569 = vrot.lane.b32.xlu0 %v5907_v23, %s5342_s28 }
 0x32d   :  { %1822 = vrot.lane.b32.xlu1 %v5815_v15, %s5343_s29 }
 0x32e   :  { %1824 = vrot.lane.b32.xlu0 %v5821_v20, %s5343_s29 }
 0x331   :  { %1826 = vrot.lane.b32.xlu1 %v5827_v56, %s5343_s29 }
 0x332   :  { %1828 = vrot.lane.b32.xlu0 %v5833_v31, %s5343_s29 }
 0x335   :  { %1830 = vrot.lane.b32.xlu1 %v5839_v36, %s5343_s29 }
 0x336   :  { %1832 = vrot.lane.b32.xlu0 %v5845_v2, %s5343_s29 }
 0x339   :  { %1834 = vrot.lane.b32.xlu1 %v5851_v39, %s5343_s29 }
 0x389   :  { %v1043_v0 = vpop.xlane.xlu1 %1042 }
 0x38a   :  { %5212 = vrcp.f32 %v1043_v0 }
 0x38d   :  { %v1046_v9 = vpop.xlane.xlu0 %1045 }
 0x38e   :  { %5214 = vrcp.f32 %v1046_v9 }
 0x391   :  { %v1049_v3 = vpop.xlane.xlu1 %1048 }
 0x392   :  { %5216 = vrcp.f32 %v1049_v3 }
 0x394   :  { %v5213_v7 = vpop.eup %5212 }
 0x395   :  { %v1069_v15 = vmul.f32 %v5213_v7, %v5874_v48  ;;  %v1052_v20 = vpop.xlane.xlu0 %1051  ;;  %v5316_v48 = vld [vmem:[%s6803_s0 + $0x28] sm:$0xff] }
 0x396   :  { %5218 = vrcp.f32 %v1052_v20 }
 0x397   :  { %4537 = vmatmul.mubr.msk.f32.vlgmr.msra.gmra.mrb[42].mxu0 %vm997_vm8, %v1069_v15 }
 0x398   :  { %v5215_v56 = vpop.eup %5214  ;;  %4539 = vmatprep.mubr.msk.f32.mxu0 %vm5334_vm0, %v5332_v1 }
 0x399   :  { %v1055_v31 = vpop.xlane.xlu1 %1054  ;;  %v1070_v36 = vmul.f32 %v5215_v56, %v5878_v47 }
 0x39a   :  { %5220 = vrcp.f32 %v1055_v31 }
 0x39b   :  { %4540 = vmatmul.mubr.msk.f32.gmra.mrb[44].mxu0 %vm997_vm8, %v1070_v36 }
 0x39c   :  { %v5217_v2 = vpop.eup %5216  ;;  %4542 = vmatprep.mubr.msk.f32.mxu0 %vm5334_vm0, %v5332_v1 }
 0x39d   :  { %v1058_v8 = vpop.xlane.xlu0 %1057  ;;  %v1071_v12 = vmul.f32 %v5217_v2, %v5882_v38 }
 0x39e   :  { %5222 = vrcp.f32 %v1058_v8 }
 0x39f   :  { %4543 = vmatmul.mubr.msk.f32.gmra.mrb[46].mxu0 %vm997_vm8, %v1071_v12 }
 0x3a0   :  { %v5219_v13 = vpop.eup %5218  ;;  %4545 = vmatprep.mubr.msk.f32.mxu0 %vm5334_vm0, %v5332_v1 }
 0x3a1   :  { %v1061_v21 = vpop.xlane.xlu1 %1060  ;;  %v1202_v24 = vpop.permute.xlu0 %1201  ;;  %v1072_v14 = vmul.f32 %v5219_v13, %v5886_v60 }
 0x3a2   :  { %5224 = vrcp.f32 %v1061_v21  ;;  %4558 = vmatpush3.msk.msra.mxu1 %vm1097_vm10, %v1202_v24 }
 0x3a3   :  { %4546 = vmatmul.mubr.msk.f32.gmra.mrb[48].mxu0 %vm997_vm8, %v1072_v14  ;;  %4603 = vmatprep.subr.mxu1 %v5332_v1 }
 0x3a4   :  { %v5221_v29 = vpop.eup %5220  ;;  %4548 = vmatprep.mubr.msk.f32.mxu0 %vm5334_vm0, %v5332_v1 }
 0x3a5   :  { %v5939_v30 = vpop.permute.xlu1 %1465  ;;  %v1073_v27 = vmul.f32 %v5221_v29, %v5890_v6  ;;  %v5958_v10 = vpop.permute.xlu0 %1569 }
 0x3a7   :  { %4549 = vmatmul.mubr.msk.f32.gmra.mrb[50].mxu0 %vm997_vm8, %v1073_v27 }
 0x3a8   :  { %v5223_v28 = vpop.eup %5222  ;;  %4551 = vmatprep.mubr.msk.f32.mxu0 %vm5334_vm0, %v5332_v1 }
 0x3a9   :  { %v5945_v18 = vpop.permute.xlu1 %1361  ;;  %v1074_v16 = vmul.f32 %v5223_v28, %v5894_v26 }
 0x3aa   :  { %4581 = vmatpush3.msk.msra.mxu0 %vm57_vm1, %v5945_v18 }
 0x3ab   :  { %4552 = vmatmul.mubr.msk.f32.gmra.mrb[52].mxu0 %vm997_vm8, %v1074_v16  ;;  %4626 = vmatprep.subr.mxu0 %v5332_v1 }
 0x3ac   :  { %v5225_v4 = vpop.eup %5224  ;;  %4554 = vmatprep.mubr.msk.f32.mxu0 %vm5334_vm0, %v5332_v1 }
 0x3ad   :  { %v1075_v34 = vmul.f32 %v5225_v4, %v5898_v62 }
 0x3af   :  { %4555 = vmatmul.mubr.msk.f32.gmra.mrb[54].mxu0 %vm997_vm8, %v1075_v34 }
 0x3b0   :  { %4582 = vmatprep.mubr.msk.f32.mxu0 %vm5334_vm0, %v5332_v1 }
 0x3b3   :  { %4583 = vmatmul.mubr.msk.f32.vlgmr.msra.gmra.mrb[56].mxu0 %vm35_vm2, %v5963_v25 }
 0x3b4   :  { %4585 = vmatprep.mubr.msk.f32.mxu0 %vm5334_vm0, %v5332_v1  ;;  %4627 = vmatpush3.msk.msra.mxu0 %vm57_vm1, %v5958_v10 }
 0x3b5   :  { %5099 = vmatprep.subr.bf16.mxu0 %v5336_v22 }
 0x3b7   :  { %4586 = vmatmul.mubr.msk.f32.gmra.mrb[58].mxu0 %vm35_vm2, %v5975_v35 }
 0x3b8   :  { %4588 = vmatprep.mubr.msk.f32.mxu0 %vm5334_vm0, %v5332_v1 }
 0x3bb   :  { %4589 = vmatmul.mubr.msk.f32.gmra.mrb[60].mxu0 %vm35_vm2, %v5984_v40 }
 0x3bc   :  { %4591 = vmatprep.mubr.msk.f32.mxu0 %vm5334_vm0, %v5332_v1 }
 0x3bf   :  { %4592 = vmatmul.mubr.msk.f32.gmra.mrb[62].mxu0 %vm35_vm2, %v5314_v43 }
 0x3c0   :  { %4594 = vmatprep.mubr.msk.f32.mxu0 %vm5334_vm0, %v5332_v1 }
 0x3c3   :  { %4595 = vmatmul.mubr.msk.f32.gmra.mrb[64].mxu0 %vm35_vm2, %v5315_v45 }
 0x3c4   :  { %4597 = vmatprep.mubr.msk.f32.mxu0 %vm5334_vm0, %v5332_v1 }
 0x3c7   :  { %4598 = vmatmul.mubr.msk.f32.gmra.mrb[66].mxu0 %vm35_vm2, %v5316_v48 }
 0x3c8   :  { %4600 = vmatprep.mubr.msk.f32.mxu0 %vm5334_vm0, %v5332_v1 }
 0x3cb   :  { %4601 = vmatmul.mubr.msk.f32.gmra.mrb[68].mxu0 %vm35_vm2, %v5317_v51 }
 0x3cc   :  { %4628 = vmatprep.mubr.msk.f32.mxu0 %vm5334_vm0, %v5332_v1 }
 0x3cf   :  { %4629 = vmatmul.mubr.msk.f32.vlgmr.msra.gmra.mrb[70].mxu0 %vm35_vm2, %v5963_v25 }
 0x3d0   :  { %4631 = vmatprep.mubr.msk.f32.mxu0 %vm5334_vm0, %v5332_v1 }
 0x3d3   :  { %4632 = vmatmul.mubr.msk.f32.gmra.mrb[72].mxu0 %vm35_vm2, %v5975_v35 }
 0x3d4   :  { %4634 = vmatprep.mubr.msk.f32.mxu0 %vm5334_vm0, %v5332_v1 }
 0x3d7   :  { %4635 = vmatmul.mubr.msk.f32.gmra.mrb[74].mxu0 %vm35_vm2, %v5984_v40 }
 0x3d8   :  { %4637 = vmatprep.mubr.msk.f32.mxu0 %vm5334_vm0, %v5332_v1 }
 0x3db   :  { %4638 = vmatmul.mubr.msk.f32.gmra.mrb[76].mxu0 %vm35_vm2, %v5314_v43 }
 0x3dc   :  { %4640 = vmatprep.mubr.msk.f32.mxu0 %vm5334_vm0, %v5332_v1 }
 0x3df   :  { %4641 = vmatmul.mubr.msk.f32.gmra.mrb[78].mxu0 %vm35_vm2, %v5315_v45 }
 0x3e0   :  { %4643 = vmatprep.mubr.msk.f32.mxu0 %vm5334_vm0, %v5332_v1 }
 0x3e3   :  { %4644 = vmatmul.mubr.msk.f32.gmra.mrb[80].mxu0 %vm35_vm2, %v5316_v48 }
 0x3e4   :  { %4646 = vmatprep.mubr.msk.f32.mxu0 %vm5334_vm0, %v5332_v1 }
 0x3e7   :  { %4647 = vmatmul.mubr.msk.f32.gmra.mrb[82].mxu0 %vm35_vm2, %v5317_v51 }
 0x3e8   :  { %4698 = vmatprep.mubr.msk.f32.mxu0 %vm5334_vm0, %v5332_v1 }
 0x46a   :  { %v1167_v54 = vpop.f32.mrb[42].mxu0 }
 0x46b   :  { %v4538_v57 = vpop.f32.mrb[43].mxu0  ;;  %4560 = vmatmul.mubr.msk.f32.vlgmr.msra.gmra.mrb[42].mxu1 %vm847_vm5, %v1167_v54 }
 0x46c   :  { %4562 = vmatprep.mubr.msk.f32.mxu1 %vm5334_vm0, %v5332_v1  ;;  %4604 = vmatpush3.msk.msra.mxu1 %vm57_vm1, %v5939_v30 }
 0x46d   :  { %5087 = vmatprep.subr.bf16.mxu1 %v5336_v22 }
 0x46e   :  { %v1172_v42 = vpop.f32.mrb[44].mxu0 }
 0x46f   :  { %v4541_v47 = vpop.f32.mrb[45].mxu0  ;;  %4563 = vmatmul.mubr.msk.f32.gmra.mrb[44].mxu1 %vm847_vm5, %v1172_v42 }
 0x470   :  { %4565 = vmatprep.mubr.msk.f32.mxu1 %vm5334_vm0, %v5332_v1 }
 0x472   :  { %v1177_v49 = vpop.f32.mrb[46].mxu0 }
 0x473   :  { %v4544_v58 = vpop.f32.mrb[47].mxu0  ;;  %4566 = vmatmul.mubr.msk.f32.gmra.mrb[46].mxu1 %vm847_vm5, %v1177_v49 }
 0x474   :  { %4568 = vmatprep.mubr.msk.f32.mxu1 %vm5334_vm0, %v5332_v1 }
 0x476   :  { %v1182_v46 = vpop.f32.mrb[48].mxu0 }
 0x477   :  { %v4547_v37 = vpop.f32.mrb[49].mxu0  ;;  %4569 = vmatmul.mubr.msk.f32.gmra.mrb[48].mxu1 %vm847_vm5, %v1182_v46  ;;  %v6132_v46 = vpop.permute.xlu1 %1822 }
 0x478   :  { %4571 = vmatprep.mubr.msk.f32.mxu1 %vm5334_vm0, %v5332_v1 }
 0x47a   :  { %v1187_v38 = vpop.f32.mrb[50].mxu0 }
 0x47b   :  { %v4550_v59 = vpop.f32.mrb[51].mxu0  ;;  %4572 = vmatmul.mubr.msk.f32.gmra.mrb[50].mxu1 %vm847_vm5, %v1187_v38 }
 0x47c   :  { %4574 = vmatprep.mubr.msk.f32.mxu1 %vm5334_vm0, %v5332_v1 }
 0x47e   :  { %v1192_v41 = vpop.f32.mrb[52].mxu0 }
 0x47f   :  { %v4553_v44 = vpop.f32.mrb[53].mxu0  ;;  %4575 = vmatmul.mubr.msk.f32.gmra.mrb[52].mxu1 %vm847_vm5, %v1192_v41 }
 0x480   :  { %4577 = vmatprep.mubr.msk.f32.mxu1 %vm5334_vm0, %v5332_v1  ;;  %v6139_v44 = vpop.permute.xlu0 %1824 }
 0x482   :  { %v1197_v61 = vpop.f32.mrb[54].mxu0 }
 0x483   :  { %v4556_v60 = vpop.f32.mrb[55].mxu0  ;;  %4578 = vmatmul.mubr.msk.f32.gmra.mrb[54].mxu1 %vm847_vm5, %v1197_v61 }
 0x484   :  { %4605 = vmatprep.mubr.msk.f32.mxu1 %vm5334_vm0, %v5332_v1 }
 0x486   :  { %v1431_v52 = vpop.f32.mrb[56].mxu0 }
 0x487   :  { %4606 = vmatmul.mubr.msk.f32.vlgmr.msra.gmra.mrb[56].mxu1 %vm35_vm2, %v5963_v25  ;;  %v4584_v17 = vpop.f32.mrb[57].mxu0 }
 0x488   :  { %4608 = vmatprep.mubr.msk.f32.mxu1 %vm5334_vm0, %v5332_v1 }
 0x48a   :  { %v1436_v6 = vpop.f32.mrb[58].mxu0 }
 0x48b   :  { %4609 = vmatmul.mubr.msk.f32.gmra.mrb[58].mxu1 %vm35_vm2, %v5975_v35  ;;  %v4587_v32 = vpop.f32.mrb[59].mxu0 }
 0x48c   :  { %4611 = vmatprep.mubr.msk.f32.mxu1 %vm5334_vm0, %v5332_v1 }
 0x48e   :  { %v1441_v26 = vpop.f32.mrb[60].mxu0 }
 0x48f   :  { %4612 = vmatmul.mubr.msk.f32.gmra.mrb[60].mxu1 %vm35_vm2, %v5984_v40  ;;  %v4590_v55 = vpop.f32.mrb[61].mxu0 }
 0x490   :  { %4614 = vmatprep.mubr.msk.f32.mxu1 %vm5334_vm0, %v5332_v1 }
 0x492   :  { %v1446_v62 = vpop.f32.mrb[62].mxu0 }
 0x493   :  { %4615 = vmatmul.mubr.msk.f32.gmra.mrb[62].mxu1 %vm35_vm2, %v5314_v43  ;;  %v4593_v63 = vpop.f32.mrb[63].mxu0 }
 0x494   :  { %4617 = vmatprep.mubr.msk.f32.mxu1 %vm5334_vm0, %v5332_v1  ;;  %v6147_v63 = vpop.permute.xlu0 %1828 }
 0x496   :  { %v1451_v53 = vpop.f32.mrb[64].mxu0 }
 0x497   :  { %4618 = vmatmul.mubr.msk.f32.gmra.mrb[64].mxu1 %vm35_vm2, %v5315_v45  ;;  %v4596_v19 = vpop.f32.mrb[65].mxu0 }
 0x498   :  { %4620 = vmatprep.mubr.msk.f32.mxu1 %vm5334_vm0, %v5332_v1 }
 0x49a   :  { %v1456_v0 = vpop.f32.mrb[66].mxu0 }
 0x49b   :  { %4621 = vmatmul.mubr.msk.f32.gmra.mrb[66].mxu1 %vm35_vm2, %v5316_v48  ;;  %v4599_v9 = vpop.f32.mrb[67].mxu0 }
 0x49c   :  { %4623 = vmatprep.mubr.msk.f32.mxu1 %vm5334_vm0, %v5332_v1 }
 0x49e   :  { %v1461_v3 = vpop.f32.mrb[68].mxu0 }
 0x49f   :  { %4624 = vmatmul.mubr.msk.f32.gmra.mrb[68].mxu1 %vm35_vm2, %v5317_v51  ;;  %v4602_v7 = vpop.f32.mrb[69].mxu0 }
 0x4a0   :  { %4663 = vmatprep.mubr.msk.f32.mxu1 %vm5334_vm0, %v5332_v1 }
 0x53e   :  { %v6086_v15 = vpop.f32.mrb[42].mxu1 }
 0x53f   :  { %v4561_v20 = vpop.f32.mrb[43].mxu1 }
 0x542   :  { %v6088_v56 = vpop.f32.mrb[44].mxu1 }
 0x543   :  { %v4564_v31 = vpop.f32.mrb[45].mxu1 }
 0x546   :  { %v6090_v36 = vpop.f32.mrb[46].mxu1 }
 0x547   :  { %v4567_v2 = vpop.f32.mrb[47].mxu1 }
 0x54a   :  { %v6092_v8 = vpop.f32.mrb[48].mxu1 }
 0x54b   :  { %v4570_v12 = vpop.f32.mrb[49].mxu1 }
 0x54c   :  { %v6155_v12 = vpop.permute.xlu0 %1832 }
 0x54e   :  { %v6094_v13 = vpop.f32.mrb[50].mxu1 }
 0x54f   :  { %v4573_v21 = vpop.f32.mrb[51].mxu1 }
 0x552   :  { %v6096_v24 = vpop.f32.mrb[52].mxu1 }
 0x553   :  { %v4576_v14 = vpop.f32.mrb[53].mxu1 }
 0x556   :  { %v6098_v29 = vpop.f32.mrb[54].mxu1 }
 0x557   :  { %v4579_v27 = vpop.f32.mrb[55].mxu1 }
 0x55a   :  { %v1535_v28 = vpop.f32.mrb[56].mxu1 }
 0x55b   :  { %v4607_v16 = vpop.f32.mrb[57].mxu1 }
 0x55e   :  { %v1540_v4 = vpop.f32.mrb[58].mxu1 }
 0x55f   :  { %v5088_v34 = vpack.c.bf16 %v1540_v4, %v1535_v28  ;;  %v4610_v25 = vpop.f32.mrb[59].mxu1 }
 0x561   :  { %5090 = vmatpush3.bf16.xpose.msk.msra.mxu1 %vm5667_vm6, %v5088_v34 }
 0x562   :  { %v1545_v35 = vpop.f32.mrb[60].mxu1  ;;  %5091 = vmatprep.subr.bf16.mxu1 %v5336_v22 }
 0x563   :  { %v4613_v40 = vpop.f32.mrb[61].mxu1 }
 0x564   :  { %v1639_v40 = vpop.f32.mrb[70].mxu0 }
 0x566   :  { %v1550_v43 = vpop.f32.mrb[62].mxu1 }
 0x567   :  { %v5092_v45 = vpack.c.bf16 %v1550_v43, %v1545_v35  ;;  %v4616_v48 = vpop.f32.mrb[63].mxu1  ;;  %v4630_v43 = vpop.f32.mrb[71].mxu0 }
 0x569   :  { %5094 = vmatpush3.bf16.xpose.msk.msra.mxu1 %vm5667_vm6, %v5092_v45  ;;  %v1644_v45 = vpop.f32.mrb[72].mxu0 }
 0x56a   :  { %v1555_v51 = vpop.f32.mrb[64].mxu1  ;;  %5095 = vmatprep.subr.bf16.mxu1 %v5336_v22  ;;  %v5100_v48 = vpack.c.bf16 %v1644_v45, %v1639_v40 }
 0x56b   :  { %v4619_v54 = vpop.f32.mrb[65].mxu1 }
 0x56c   :  { %5101 = vmatpush3.bf16.msra.mxu0 %v5100_v48 }
 0x56d   :  { %5102 = vmatprep.subr.bf16.mxu0 %v5336_v22 }
 0x56e   :  { %v1560_v57 = vpop.f32.mrb[66].mxu1 }
 0x56f   :  { %v5096_v42 = vpack.c.bf16 %v1560_v57, %v1555_v51  ;;  %v4622_v47 = vpop.f32.mrb[67].mxu1  ;;  %v4633_v51 = vpop.f32.mrb[73].mxu0 }
 0x570   :  { %v1649_v54 = vpop.f32.mrb[74].mxu0 }
 0x571   :  { %5098 = vmatpush3.bf16.xpose.msk.msra.mxu1 %vm5667_vm6, %v5096_v42  ;;  %v4636_v57 = vpop.f32.mrb[75].mxu0 }
 0x572   :  { %v1565_v49 = vpop.f32.mrb[68].mxu1  ;;  %4661 = vmatprep.subr.mxu1 %v5332_v1  ;;  %v1654_v42 = vpop.f32.mrb[76].mxu0 }
 0x573   :  { %v4625_v58 = vpop.f32.mrb[69].mxu1  ;;  %v5103_v47 = vpack.c.bf16 %v1654_v42, %v1649_v54 }
 0x575   :  { %5104 = vmatpush3.bf16.msra.mxu0 %v5103_v47 }
 0x576   :  { %5105 = vmatprep.subr.bf16.mxu0 %v5336_v22 }
 0x579   :  { %4662 = vmatpush3.xpose.msk.msra.mxu1 %vm847_vm5, %v1565_v49  ;;  %v4639_v49 = vpop.f32.mrb[77].mxu0 }
 0x57a   :  { %4719 = vmatprep.subr.mxu1 %v5332_v1  ;;  %v1659_v58 = vpop.f32.mrb[78].mxu0 }
 0x57c   :  { %4664 = vmatmul.mubr.msk.f32.vlgmr.msra.gmra.mrb[70].mxu1 %vm847_vm5, %v1431_v52 }
 0x57d   :  { %4666 = vmatprep.mubr.msk.f32.mxu1 %vm5334_vm0, %v5332_v1 }
 0x580   :  { %4667 = vmatmul.mubr.msk.f32.gmra.mrb[72].mxu1 %vm847_vm5, %v1436_v6  ;;  %v6143_v6 = vpop.permute.xlu1 %1826 }
 0x581   :  { %4669 = vmatprep.mubr.msk.f32.mxu1 %vm5334_vm0, %v5332_v1 }
 0x584   :  { %4670 = vmatmul.mubr.msk.f32.gmra.mrb[74].mxu1 %vm847_vm5, %v1441_v26 }
 0x585   :  { %4672 = vmatprep.mubr.msk.f32.mxu1 %vm5334_vm0, %v5332_v1 }
 0x588   :  { %4673 = vmatmul.mubr.msk.f32.gmra.mrb[76].mxu1 %vm847_vm5, %v1446_v62 }
 0x589   :  { %4675 = vmatprep.mubr.msk.f32.mxu1 %vm5334_vm0, %v5332_v1 }
 0x58c   :  { %4676 = vmatmul.mubr.msk.f32.gmra.mrb[78].mxu1 %vm847_vm5, %v1451_v53 }
 0x58d   :  { %4678 = vmatprep.mubr.msk.f32.mxu1 %vm5334_vm0, %v5332_v1 }
 0x590   :  { %4679 = vmatmul.mubr.msk.f32.gmra.mrb[80].mxu1 %vm847_vm5, %v1456_v0 }
 0x591   :  { %4681 = vmatprep.mubr.msk.f32.mxu1 %vm5334_vm0, %v5332_v1 }
 0x594   :  { %4682 = vmatmul.mubr.msk.f32.gmra.mrb[82].mxu1 %vm847_vm5, %v1461_v3  ;;  %v6151_v3 = vpop.permute.xlu1 %1830 }
 0x595   :  { %4721 = vmatprep.mubr.msk.f32.mxu1 %vm5334_vm0, %v5332_v1 }
 0x598   :  { %v6159_v16 = vpop.permute.xlu1 %1834 }
 0x64f   :  { %v1781_v37 = vpop.f32.mrb[70].mxu1 }
 0x650   :  { %v6135_v38 = vmul.f32 %v6132_v46, %v1781_v37  ;;  %v4665_v59 = vpop.f32.mrb[71].mxu1  ;;  %v4642_v37 = vpop.f32.mrb[79].mxu0 }
 0x651   :  { %v1664_v59 = vpop.f32.mrb[80].mxu0 }
 0x652   :  { %v1850_v41 = vsel %vm997_vm8, %v6135_v38, -inf }
 0x653   :  { %1851 = vmax.xlane.f32.xlu0 %v1850_v41  ;;  %v1786_v61 = vpop.f32.mrb[72].mxu1  ;;  %v5106_v41 = vpack.c.bf16 %v1664_v59, %v1659_v58 }
 0x654   :  { %v1844_v60 = vmul.f32 %v6139_v44, %v1786_v61  ;;  %v4668_v52 = vpop.f32.mrb[73].mxu1  ;;  %v4645_v61 = vpop.f32.mrb[81].mxu0 }
 0x655   :  { %5107 = vmatpush3.bf16.msra.mxu0 %v5106_v41  ;;  %v2051_v41 = vrot.slane %v5907_v23, 2 }
 0x656   :  { %v1853_v17 = vsel %vm997_vm8, %v1844_v60, -inf  ;;  %4696 = vmatprep.subr.mxu0 %v5332_v1 }
 0x657   :  { %1854 = vmax.xlane.f32.xlu1 %v1853_v17  ;;  %v1791_v32 = vpop.f32.mrb[74].mxu1 }
 0x658   :  { %v1845_v26 = vmul.f32 %v6143_v6, %v1791_v32  ;;  %v4671_v55 = vpop.f32.mrb[75].mxu1 }
 0x65a   :  { %v1856_v62 = vsel %vm997_vm8, %v1845_v26, -inf }
 0x65b   :  { %1857 = vmax.xlane.f32.xlu0 %v1856_v62  ;;  %v1796_v53 = vpop.f32.mrb[76].mxu1 }
 0x65c   :  { %v1846_v19 = vmul.f32 %v6147_v63, %v1796_v53  ;;  %v4674_v0 = vpop.f32.mrb[77].mxu1 }
 0x65e   :  { %v1859_v9 = vsel %vm997_vm8, %v1846_v19, -inf }
 0x65f   :  { %1860 = vmax.xlane.f32.xlu0 %v1859_v9  ;;  %v1801_v7 = vpop.f32.mrb[78].mxu1 }
 0x660   :  { %v1847_v20 = vmul.f32 %v6151_v3, %v1801_v7  ;;  %v4677_v31 = vpop.f32.mrb[79].mxu1 }
 0x662   :  { %v1862_v2 = vsel %vm997_vm8, %v1847_v20, -inf }
 0x663   :  { %1863 = vmax.xlane.f32.xlu1 %v1862_v2  ;;  %v1806_v21 = vpop.f32.mrb[80].mxu1 }
 0x664   :  { %v1848_v14 = vmul.f32 %v6155_v12, %v1806_v21  ;;  %v4680_v27 = vpop.f32.mrb[81].mxu1 }
 0x666   :  { %v1865_v28 = vsel %vm997_vm8, %v1848_v14, -inf }
 0x667   :  { %1866 = vmax.xlane.f32.xlu0 %v1865_v28  ;;  %v1811_v4 = vpop.f32.mrb[82].mxu1 }
 0x668   :  { %v1849_v34 = vmul.f32 %v6159_v16, %v1811_v4  ;;  %v4683_v25 = vpop.f32.mrb[83].mxu1 }
 0x66a   :  { %v1868_v35 = vsel %vm1016_vm9, %v1849_v34, -inf }
 0x66b   :  { %1869 = vmax.xlane.f32.xlu1 %v1868_v35 }
 0x6e0   :  { %v1852_v52 = vpop.xlane.xlu0 %1851 }
 0x6e1   :  { %v1871_v17 = vsub.f32 %v6135_v38, %v1852_v52 }
 0x6e3   :  { %v1878_v32 = vmul.f32 1.442695, %v1871_v17 }
 0x6e4   :  { %v1855_v55 = vpop.xlane.xlu1 %1854 }
 0x6e5   :  { %5226 = vpow2.f32 %v1878_v32  ;;  %v1872_v62 = vsub.f32 %v1844_v60, %v1855_v55 }
 0x6e7   :  { %v1880_v53 = vmul.f32 1.442695, %v1872_v62 }
 0x6e8   :  { %v1858_v0 = vpop.xlane.xlu0 %1857 }
 0x6e9   :  { %5228 = vpow2.f32 %v1880_v53  ;;  %v1873_v9 = vsub.f32 %v1845_v26, %v1858_v0 }
 0x6eb   :  { %v1882_v7 = vmul.f32 1.442695, %v1873_v9 }
 0x6ec   :  { %v1861_v31 = vpop.xlane.xlu0 %1860 }
 0x6ed   :  { %5230 = vpow2.f32 %v1882_v7  ;;  %v1874_v2 = vsub.f32 %v1846_v19, %v1861_v31 }
 0x6ef   :  { %v5227_v21 = vpop.eup %5226  ;;  %v1884_v27 = vmul.f32 1.442695, %v1874_v2 }
 0x6f0   :  { %v1864_v28 = vpop.xlane.xlu1 %1863  ;;  %v1892_v4 = vsel %vm997_vm8, %v5227_v21, 0.0 }
 0x6f1   :  { %5232 = vpow2.f32 %v1884_v27  ;;  %v1875_v25 = vsub.f32 %v1847_v20, %v1864_v28  ;;  %1893 = vadd.xlane.f32.xlu0 %v1892_v4 }
 0x6f3   :  { %v5229_v38 = vpop.eup %5228  ;;  %v1886_v35 = vmul.f32 1.442695, %v1875_v25 }
 0x6f4   :  { %v1867_v40 = vpop.xlane.xlu0 %1866  ;;  %v1895_v60 = vsel %vm997_vm8, %v5229_v38, 0.0 }
 0x6f5   :  { %5234 = vpow2.f32 %v1886_v35  ;;  %v1876_v43 = vsub.f32 %v1848_v14, %v1867_v40  ;;  %1896 = vadd.xlane.f32.xlu1 %v1895_v60 }
 0x6f7   :  { %v5231_v26 = vpop.eup %5230  ;;  %v1888_v45 = vmul.f32 1.442695, %v1876_v43 }
 0x6f8   :  { %v1870_v48 = vpop.xlane.xlu1 %1869  ;;  %v1898_v19 = vsel %vm997_vm8, %v5231_v26, 0.0 }
 0x6f9   :  { %5236 = vpow2.f32 %v1888_v45  ;;  %v1877_v51 = vsub.f32 %v1849_v34, %v1870_v48  ;;  %1899 = vadd.xlane.f32.xlu0 %v1898_v19  ;;  %v1669_v34 = vpop.f32.mrb[82].mxu0  ;;  %v6221_v45 = vld [vmem:[%s6803_s0 + $0x40] sm:$0xff]  ;;  %v6239_v48 = vld [vmem:[%s6803_s0 + $0x50] sm:$0xff]  ;;  %v6248_v19 = vld [vmem:[%s6803_s0 + $0x58] sm:$0xff] }
 0x6fa   :  { %v4648_v59 = vpop.f32.mrb[83].mxu0  ;;  %4697 = vmatpush3.msk.msra.mxu0 %vm1097_vm10, %v1669_v34 }
 0x6fb   :  { %v5233_v54 = vpop.eup %5232  ;;  %v1890_v57 = vmul.f32 1.442695, %v1877_v51  ;;  %4742 = vmatprep.subr.mxu0 %v5332_v1  ;;  %v6257_v51 = vld [vmem:[%s6803_s0 + $0x60] sm:$0xff] }
 0x6fc   :  { %v1901_v20 = vsel %vm997_vm8, %v5233_v54, 0.0 }
 0x6fd   :  { %5238 = vpow2.f32 %v1890_v57  ;;  %1902 = vadd.xlane.f32.xlu1 %v1901_v20 }
 0x6ff   :  { %v5235_v42 = vpop.eup %5234 }
 0x700   :  { %v1904_v47 = vsel %vm997_vm8, %v5235_v42, 0.0 }
 0x701   :  { %1905 = vadd.xlane.f32.xlu0 %v1904_v47 }
 0x703   :  { %v5237_v14 = vpop.eup %5236 }
 0x704   :  { %v1907_v49 = vsel %vm997_vm8, %v5237_v14, 0.0 }
 0x705   :  { %1908 = vadd.xlane.f32.xlu1 %v1907_v49 }
 0x707   :  { %v5239_v58 = vpop.eup %5238 }
 0x708   :  { %v1910_v37 = vsel %vm1016_vm9, %v5239_v58, 0.0 }
 0x709   :  { %1911 = vadd.xlane.f32.xlu0 %v1910_v37 }
 0x716   :  { %2052 = vrot.lane.b32.xlu1 %v2051_v41, %s5340_s26 }
 0x77e   :  { %v1894_v61 = vpop.xlane.xlu0 %1893 }
 0x77f   :  { %5240 = vrcp.f32 %v1894_v61 }
 0x782   :  { %v1897_v52 = vpop.xlane.xlu1 %1896 }
 0x783   :  { %5242 = vrcp.f32 %v1897_v52 }
 0x786   :  { %v1900_v17 = vpop.xlane.xlu0 %1899 }
 0x787   :  { %5244 = vrcp.f32 %v1900_v17 }
 0x789   :  { %v5241_v32 = vpop.eup %5240 }
 0x78a   :  { %v1920_v55 = vmul.f32 %v5241_v32, %v5227_v21  ;;  %v1903_v62 = vpop.xlane.xlu1 %1902 }
 0x78b   :  { %5246 = vrcp.f32 %v1903_v62 }
 0x78c   :  { %4699 = vmatmul.mubr.msk.f32.vlgmr.msra.gmra.mrb[84].mxu0 %vm997_vm8, %v1920_v55 }
 0x78d   :  { %v5243_v53 = vpop.eup %5242  ;;  %4701 = vmatprep.mubr.msk.f32.mxu0 %vm5334_vm0, %v5332_v1  ;;  %4743 = vmatpush3.msk.msra.mxu0 %vm57_vm1, %v5907_v23 }
 0x78e   :  { %v1906_v0 = vpop.xlane.xlu0 %1905  ;;  %v1921_v9 = vmul.f32 %v5243_v53, %v5229_v38  ;;  %4788 = vmatprep.subr.mxu0 %v5332_v1 }
 0x78f   :  { %5248 = vrcp.f32 %v1906_v0 }
 0x790   :  { %4702 = vmatmul.mubr.msk.f32.gmra.mrb[86].mxu0 %vm997_vm8, %v1921_v9 }
 0x791   :  { %v5245_v7 = vpop.eup %5244  ;;  %4704 = vmatprep.mubr.msk.f32.mxu0 %vm5334_vm0, %v5332_v1 }
 0x792   :  { %v1909_v31 = vpop.xlane.xlu1 %1908  ;;  %v1922_v2 = vmul.f32 %v5245_v7, %v5231_v26  ;;  %v6209_v26 = vld [vmem:[%s6803_s0 + $0x38] sm:$0xff] }
 0x793   :  { %5250 = vrcp.f32 %v1909_v31 }
 0x794   :  { %4705 = vmatmul.mubr.msk.f32.gmra.mrb[88].mxu0 %vm997_vm8, %v1922_v2 }
 0x795   :  { %v5247_v21 = vpop.eup %5246  ;;  %4707 = vmatprep.mubr.msk.f32.mxu0 %vm5334_vm0, %v5332_v1 }
 0x796   :  { %v1912_v27 = vpop.xlane.xlu0 %1911  ;;  %v1923_v28 = vmul.f32 %v5247_v21, %v5233_v54  ;;  %v2053_v35 = vpop.permute.xlu1 %2052  ;;  %v6266_v54 = vld [vmem:[%s6803_s0 + $0x68] sm:$0x3] }
 0x797   :  { %5252 = vrcp.f32 %v1912_v27  ;;  %4720 = vmatpush3.msk.msra.mxu1 %vm1097_vm10, %v2053_v35 }
 0x798   :  { %4708 = vmatmul.mubr.msk.f32.gmra.mrb[90].mxu0 %vm997_vm8, %v1923_v28  ;;  %4765 = vmatprep.subr.mxu1 %v5332_v1 }
 0x799   :  { %v5249_v4 = vpop.eup %5248  ;;  %4710 = vmatprep.mubr.msk.f32.mxu0 %vm5334_vm0, %v5332_v1 }
 0x79a   :  { %v1924_v25 = vmul.f32 %v5249_v4, %v5235_v42 }
 0x79c   :  { %4711 = vmatmul.mubr.msk.f32.gmra.mrb[92].mxu0 %vm997_vm8, %v1924_v25 }
 0x79d   :  { %v5251_v38 = vpop.eup %5250  ;;  %4713 = vmatprep.mubr.msk.f32.mxu0 %vm5334_vm0, %v5332_v1 }
 0x79e   :  { %v1925_v40 = vmul.f32 %v5251_v38, %v5237_v14 }
 0x7a0   :  { %4714 = vmatmul.mubr.msk.f32.gmra.mrb[94].mxu0 %vm997_vm8, %v1925_v40 }
 0x7a1   :  { %v5253_v60 = vpop.eup %5252  ;;  %4716 = vmatprep.mubr.msk.f32.mxu0 %vm5334_vm0, %v5332_v1 }
 0x7a2   :  { %v1926_v43 = vmul.f32 %v5253_v60, %v5239_v58 }
 0x7a4   :  { %4717 = vmatmul.mubr.msk.f32.gmra.mrb[96].mxu0 %vm997_vm8, %v1926_v43 }
 0x7a5   :  { %4744 = vmatprep.mubr.msk.f32.mxu0 %vm5334_vm0, %v5332_v1 }
 0x7a8   :  { %4745 = vmatmul.mubr.msk.f32.vlgmr.msra.gmra.mrb[98].mxu0 %vm35_vm2, %v6209_v26 }
 0x7a9   :  { %4789 = vmatpush3.msk.msra.mxu0 %vm57_vm1, %v5695_v50  ;;  %4747 = vmatprep.mubr.msk.f32.mxu0 %vm5334_vm0, %v5332_v1  ;;  %v6230_v50 = vld [vmem:[%s6803_s0 + $0x48] sm:$0xff] }
 0x7aa   :  { %5120 = vmatprep.subr.bf16.mxu0 %v5336_v22 }
 0x7ac   :  { %4748 = vmatmul.mubr.msk.f32.gmra.mrb[100].mxu0 %vm35_vm2, %v6221_v45 }
 0x7ad   :  { %4750 = vmatprep.mubr.msk.f32.mxu0 %vm5334_vm0, %v5332_v1 }
 0x7b0   :  { %4751 = vmatmul.mubr.msk.f32.gmra.mrb[102].mxu0 %vm35_vm2, %v6230_v50 }
 0x7b1   :  { %4753 = vmatprep.mubr.msk.f32.mxu0 %vm5334_vm0, %v5332_v1 }
 0x7b4   :  { %4754 = vmatmul.mubr.msk.f32.gmra.mrb[104].mxu0 %vm35_vm2, %v6239_v48 }
 0x7b5   :  { %4756 = vmatprep.mubr.msk.f32.mxu0 %vm5334_vm0, %v5332_v1 }
 0x7b8   :  { %4757 = vmatmul.mubr.msk.f32.gmra.mrb[106].mxu0 %vm35_vm2, %v6248_v19 }
 0x7b9   :  { %4759 = vmatprep.mubr.msk.f32.mxu0 %vm5334_vm0, %v5332_v1 }
 0x7bc   :  { %4760 = vmatmul.mubr.msk.f32.gmra.mrb[108].mxu0 %vm35_vm2, %v6257_v51 }
 0x7bd   :  { %4762 = vmatprep.mubr.msk.f32.mxu0 %vm5334_vm0, %v5332_v1 }
 0x7c0   :  { %4763 = vmatmul.mubr.msk.f32.gmra.mrb[110].mxu0 %vm35_vm2, %v6266_v54 }
 0x7c1   :  { %4790 = vmatprep.mubr.msk.f32.mxu0 %vm5334_vm0, %v5332_v1 }
 0x7c4   :  { %4791 = vmatmul.mubr.msk.f32.vlgmr.msra.gmra.mrb[112].mxu0 %vm35_vm2, %v6209_v26 }
 0x7c5   :  { %4793 = vmatprep.mubr.msk.f32.mxu0 %vm5334_vm0, %v5332_v1 }
 0x7c8   :  { %4794 = vmatmul.mubr.msk.f32.gmra.mrb[114].mxu0 %vm35_vm2, %v6221_v45 }
 0x7c9   :  { %4796 = vmatprep.mubr.msk.f32.mxu0 %vm5334_vm0, %v5332_v1 }
 0x7cc   :  { %4797 = vmatmul.mubr.msk.f32.gmra.mrb[116].mxu0 %vm35_vm2, %v6230_v50 }
 0x7cd   :  { %4799 = vmatprep.mubr.msk.f32.mxu0 %vm5334_vm0, %v5332_v1 }
 0x7d0   :  { %4800 = vmatmul.mubr.msk.f32.gmra.mrb[118].mxu0 %vm35_vm2, %v6239_v48 }
 0x7d1   :  { %4802 = vmatprep.mubr.msk.f32.mxu0 %vm5334_vm0, %v5332_v1 }
 0x7d4   :  { %4803 = vmatmul.mubr.msk.f32.gmra.mrb[120].mxu0 %vm35_vm2, %v6248_v19 }
 0x7d5   :  { %4805 = vmatprep.mubr.msk.f32.mxu0 %vm5334_vm0, %v5332_v1 }
 0x7d8   :  { %4806 = vmatmul.mubr.msk.f32.gmra.mrb[122].mxu0 %vm35_vm2, %v6257_v51 }
 0x7d9   :  { %4808 = vmatprep.mubr.msk.f32.mxu0 %vm5334_vm0, %v5332_v1 }
 0x7dc   :  { %4809 = vmatmul.mubr.msk.f32.gmra.mrb[124].mxu0 %vm35_vm2, %v6266_v54 }
 0x7dd   :  { %4860 = vmatprep.mubr.msk.f32.mxu0 %vm5334_vm0, %v5332_v1 }
 0x85f   :  { %v2017_v57 = vpop.f32.mrb[84].mxu0 }
 0x860   :  { %v4700_v20 = vpop.f32.mrb[85].mxu0  ;;  %4722 = vmatmul.mubr.msk.f32.vlgmr.msra.gmra.mrb[84].mxu1 %vm847_vm5, %v2017_v57 }
 0x861   :  { %4766 = vmatpush3.msk.msra.mxu1 %vm57_vm1, %v5413_v11  ;;  %4724 = vmatprep.mubr.msk.f32.mxu1 %vm5334_vm0, %v5332_v1 }
 0x862   :  { %5108 = vmatprep.subr.bf16.mxu1 %v5336_v22 }
 0x863   :  { %v2022_v42 = vpop.f32.mrb[86].mxu0 }
 0x864   :  { %v4703_v47 = vpop.f32.mrb[87].mxu0  ;;  %4725 = vmatmul.mubr.msk.f32.gmra.mrb[86].mxu1 %vm847_vm5, %v2022_v42 }
 0x865   :  { %4727 = vmatprep.mubr.msk.f32.mxu1 %vm5334_vm0, %v5332_v1 }
 0x867   :  { %v2027_v14 = vpop.f32.mrb[88].mxu0 }
 0x868   :  { %v4706_v49 = vpop.f32.mrb[89].mxu0  ;;  %4728 = vmatmul.mubr.msk.f32.gmra.mrb[88].mxu1 %vm847_vm5, %v2027_v14 }
 0x869   :  { %4730 = vmatprep.mubr.msk.f32.mxu1 %vm5334_vm0, %v5332_v1 }
 0x86b   :  { %v2032_v11 = vpop.f32.mrb[90].mxu0 }
 0x86c   :  { %v4709_v58 = vpop.f32.mrb[91].mxu0  ;;  %4731 = vmatmul.mubr.msk.f32.gmra.mrb[90].mxu1 %vm847_vm5, %v2032_v11 }
 0x86d   :  { %4733 = vmatprep.mubr.msk.f32.mxu1 %vm5334_vm0, %v5332_v1 }
 0x86f   :  { %v2037_v37 = vpop.f32.mrb[92].mxu0 }
 0x870   :  { %v4712_v34 = vpop.f32.mrb[93].mxu0  ;;  %4734 = vmatmul.mubr.msk.f32.gmra.mrb[92].mxu1 %vm847_vm5, %v2037_v37 }
 0x871   :  { %4736 = vmatprep.mubr.msk.f32.mxu1 %vm5334_vm0, %v5332_v1 }
 0x873   :  { %v2042_v59 = vpop.f32.mrb[94].mxu0 }
 0x874   :  { %v4715_v61 = vpop.f32.mrb[95].mxu0  ;;  %4737 = vmatmul.mubr.msk.f32.gmra.mrb[94].mxu1 %vm847_vm5, %v2042_v59 }
 0x875   :  { %4739 = vmatprep.mubr.msk.f32.mxu1 %vm5334_vm0, %v5332_v1 }
 0x877   :  { %v2047_v52 = vpop.f32.mrb[96].mxu0 }
 0x878   :  { %v4718_v17 = vpop.f32.mrb[97].mxu0  ;;  %4740 = vmatmul.mubr.msk.f32.gmra.mrb[96].mxu1 %vm847_vm5, %v2047_v52 }
 0x879   :  { %4767 = vmatprep.mubr.msk.f32.mxu1 %vm5334_vm0, %v5332_v1 }
 0x87b   :  { %v2278_v32 = vpop.f32.mrb[98].mxu0 }
 0x87c   :  { %4768 = vmatmul.mubr.msk.f32.vlgmr.msra.gmra.mrb[98].mxu1 %vm35_vm2, %v6209_v26  ;;  %v4746_v55 = vpop.f32.mrb[99].mxu0 }
 0x87d   :  { %4770 = vmatprep.mubr.msk.f32.mxu1 %vm5334_vm0, %v5332_v1 }
 0x87f   :  { %v2283_v62 = vpop.f32.mrb[100].mxu0 }
 0x880   :  { %4771 = vmatmul.mubr.msk.f32.gmra.mrb[100].mxu1 %vm35_vm2, %v6221_v45  ;;  %v4749_v53 = vpop.f32.mrb[101].mxu0 }
 0x881   :  { %4773 = vmatprep.mubr.msk.f32.mxu1 %vm5334_vm0, %v5332_v1 }
 0x883   :  { %v2288_v0 = vpop.f32.mrb[102].mxu0 }
 0x884   :  { %4774 = vmatmul.mubr.msk.f32.gmra.mrb[102].mxu1 %vm35_vm2, %v6230_v50  ;;  %v4752_v9 = vpop.f32.mrb[103].mxu0 }
 0x885   :  { %4776 = vmatprep.mubr.msk.f32.mxu1 %vm5334_vm0, %v5332_v1 }
 0x887   :  { %v2293_v7 = vpop.f32.mrb[104].mxu0 }
 0x888   :  { %4777 = vmatmul.mubr.msk.f32.gmra.mrb[104].mxu1 %vm35_vm2, %v6239_v48  ;;  %v4755_v31 = vpop.f32.mrb[105].mxu0 }
 0x889   :  { %4779 = vmatprep.mubr.msk.f32.mxu1 %vm5334_vm0, %v5332_v1 }
 0x88b   :  { %v2298_v2 = vpop.f32.mrb[106].mxu0 }
 0x88c   :  { %4780 = vmatmul.mubr.msk.f32.gmra.mrb[106].mxu1 %vm35_vm2, %v6248_v19  ;;  %v4758_v21 = vpop.f32.mrb[107].mxu0 }
 0x88d   :  { %4782 = vmatprep.mubr.msk.f32.mxu1 %vm5334_vm0, %v5332_v1 }
 0x88f   :  { %v2303_v27 = vpop.f32.mrb[108].mxu0 }
 0x890   :  { %4783 = vmatmul.mubr.msk.f32.gmra.mrb[108].mxu1 %vm35_vm2, %v6257_v51  ;;  %v4761_v28 = vpop.f32.mrb[109].mxu0 }
 0x891   :  { %4785 = vmatprep.mubr.msk.f32.mxu1 %vm5334_vm0, %v5332_v1 }
 0x893   :  { %v2308_v4 = vpop.f32.mrb[110].mxu0 }
 0x894   :  { %4786 = vmatmul.mubr.msk.f32.gmra.mrb[110].mxu1 %vm35_vm2, %v6266_v54  ;;  %v4764_v25 = vpop.f32.mrb[111].mxu0 }
 0x895   :  { %4825 = vmatprep.mubr.msk.f32.mxu1 %vm5334_vm0, %v5332_v1 }
 0x933   :  { %v6352_v38 = vpop.f32.mrb[84].mxu1 }
 0x934   :  { %v4723_v35 = vpop.f32.mrb[85].mxu1 }
 0x937   :  { %v6354_v40 = vpop.f32.mrb[86].mxu1 }
 0x938   :  { %v4726_v60 = vpop.f32.mrb[87].mxu1 }
 0x93b   :  { %v6356_v43 = vpop.f32.mrb[88].mxu1 }
 0x93c   :  { %v4729_v57 = vpop.f32.mrb[89].mxu1 }
 0x93f   :  { %v6358_v20 = vpop.f32.mrb[90].mxu1 }
 0x940   :  { %v4732_v42 = vpop.f32.mrb[91].mxu1 }
 0x943   :  { %v6360_v47 = vpop.f32.mrb[92].mxu1 }
 0x944   :  { %v4735_v14 = vpop.f32.mrb[93].mxu1 }
 0x947   :  { %v6362_v49 = vpop.f32.mrb[94].mxu1 }
 0x948   :  { %v4738_v11 = vpop.f32.mrb[95].mxu1 }
 0x94b   :  { %v6364_v58 = vpop.f32.mrb[96].mxu1 }
 0x94c   :  { %v4741_v37 = vpop.f32.mrb[97].mxu1 }
 0x94f   :  { %v2378_v34 = vpop.f32.mrb[98].mxu1 }
 0x950   :  { %v4769_v59 = vpop.f32.mrb[99].mxu1 }
 0x953   :  { %v2383_v61 = vpop.f32.mrb[100].mxu1 }
 0x954   :  { %v5109_v52 = vpack.c.bf16 %v2383_v61, %v2378_v34  ;;  %v4772_v17 = vpop.f32.mrb[101].mxu1  ;;  %v5327_v61 = vld [vmem:[%s6805_s4 + $0x10] sm:$0xff] }
 0x956   :  { %5111 = vmatpush3.bf16.xpose.msk.msra.mxu1 %vm5667_vm6, %v5109_v52 }
 0x957   :  { %v2388_v55 = vpop.f32.mrb[102].mxu1  ;;  %5112 = vmatprep.subr.bf16.mxu1 %v5336_v22 }
 0x958   :  { %v4775_v53 = vpop.f32.mrb[103].mxu1 }
 0x95b   :  { %v2393_v9 = vpop.f32.mrb[104].mxu1 }
 0x95c   :  { %v5113_v31 = vpack.c.bf16 %v2393_v9, %v2388_v55  ;;  %v4778_v21 = vpop.f32.mrb[105].mxu1  ;;  %v5328_v9 = vld [vmem:[%s6805_s4 + $0x18] sm:$0xff] }
 0x95e   :  { %5115 = vmatpush3.bf16.xpose.msk.msra.mxu1 %vm5667_vm6, %v5113_v31 }
 0x95f   :  { %v2398_v28 = vpop.f32.mrb[106].mxu1  ;;  %5116 = vmatprep.subr.bf16.mxu1 %v5336_v22 }
 0x960   :  { %v4781_v25 = vpop.f32.mrb[107].mxu1 }
 0x963   :  { %v2403_v35 = vpop.f32.mrb[108].mxu1 }
 0x964   :  { %v5117_v60 = vpack.c.bf16 %v2403_v35, %v2398_v28  ;;  %v4784_v57 = vpop.f32.mrb[109].mxu1  ;;  %v5329_v35 = vld [vmem:[%s6805_s4 + $0x20] sm:$0xff] }
 0x966   :  { %5119 = vmatpush3.bf16.xpose.msk.msra.mxu1 %vm5667_vm6, %v5117_v60 }
 0x967   :  { %v2408_v42 = vpop.f32.mrb[110].mxu1  ;;  %4823 = vmatprep.subr.mxu1 %v5332_v1 }
 0x968   :  { %v4787_v14 = vpop.f32.mrb[111].mxu1 }
 0x96e   :  { %4824 = vmatpush3.xpose.msk.msra.mxu1 %vm847_vm5, %v2408_v42 }
 0x96f   :  { %4881 = vmatprep.subr.mxu1 %v5332_v1 }
 0x971   :  { %4826 = vmatmul.mubr.msk.f32.vlgmr.msra.gmra.mrb[112].mxu1 %vm847_vm5, %v2278_v32 }
 0x972   :  { %4828 = vmatprep.mubr.msk.f32.mxu1 %vm5334_vm0, %v5332_v1 }
 0x975   :  { %4829 = vmatmul.mubr.msk.f32.gmra.mrb[114].mxu1 %vm847_vm5, %v2283_v62  ;;  %v5325_v62 = vld [vmem:[%s6805_s4] sm:$0xff] }
 0x976   :  { %4831 = vmatprep.mubr.msk.f32.mxu1 %vm5334_vm0, %v5332_v1 }
 0x979   :  { %4832 = vmatmul.mubr.msk.f32.gmra.mrb[116].mxu1 %vm847_vm5, %v2288_v0 }
 0x97a   :  { %4834 = vmatprep.mubr.msk.f32.mxu1 %vm5334_vm0, %v5332_v1 }
 0x97d   :  { %4835 = vmatmul.mubr.msk.f32.gmra.mrb[118].mxu1 %vm847_vm5, %v2293_v7 }
 0x97e   :  { %4837 = vmatprep.mubr.msk.f32.mxu1 %vm5334_vm0, %v5332_v1 }
 0x981   :  { %4838 = vmatmul.mubr.msk.f32.gmra.mrb[120].mxu1 %vm847_vm5, %v2298_v2 }
 0x982   :  { %4840 = vmatprep.mubr.msk.f32.mxu1 %vm5334_vm0, %v5332_v1 }
 0x985   :  { %4841 = vmatmul.mubr.msk.f32.gmra.mrb[122].mxu1 %vm847_vm5, %v2303_v27  ;;  %v5326_v27 = vld [vmem:[%s6805_s4 + $0x8] sm:$0xff] }
 0x986   :  { %4843 = vmatprep.mubr.msk.f32.mxu1 %vm5334_vm0, %v5332_v1 }
 0x989   :  { %4844 = vmatmul.mubr.msk.f32.gmra.mrb[124].mxu1 %vm847_vm5, %v2308_v4 }
 0x98a   :  { %4883 = vmatprep.mubr.msk.f32.mxu1 %vm5334_vm0, %v5332_v1 }
 0xa44   :  { %v2620_v32 = vpop.f32.mrb[112].mxu1 }
 0xa45   :  { %v2654_v0 = vmul.f32 %v5325_v62, %v2620_v32  ;;  %v4827_v7 = vpop.f32.mrb[113].mxu1  ;;  %v5330_v32 = vld [vmem:[%s6805_s4 + $0x28] sm:$0xff] }
 0xa47   :  { %v2661_v2 = vsel %vm997_vm8, %v2654_v0, -inf }
 0xa48   :  { %2662 = vmax.xlane.f32.xlu0 %v2661_v2  ;;  %v2625_v11 = vpop.f32.mrb[114].mxu1 }
 0xa49   :  { %v2655_v37 = vmul.f32 %v5326_v27, %v2625_v11  ;;  %v4830_v4 = vpop.f32.mrb[115].mxu1 }
 0xa4b   :  { %v2664_v34 = vsel %vm997_vm8, %v2655_v37, -inf }
 0xa4c   :  { %2665 = vmax.xlane.f32.xlu0 %v2664_v34  ;;  %v2630_v59 = vpop.f32.mrb[116].mxu1 }
 0xa4d   :  { %v2656_v52 = vmul.f32 %v5327_v61, %v2630_v59  ;;  %v4833_v17 = vpop.f32.mrb[117].mxu1  ;;  %v2478_v59 = vpop.f32.mrb[112].mxu0 }
 0xa4e   :  { %v4792_v61 = vpop.f32.mrb[113].mxu0 }
 0xa4f   :  { %v2667_v55 = vsel %vm997_vm8, %v2656_v52, -inf  ;;  %v2483_v17 = vpop.f32.mrb[114].mxu0 }
 0xa50   :  { %2668 = vmax.xlane.f32.xlu0 %v2667_v55  ;;  %v2635_v53 = vpop.f32.mrb[118].mxu1  ;;  %v5121_v55 = vpack.c.bf16 %v2483_v17, %v2478_v59 }
 0xa51   :  { %v2657_v31 = vmul.f32 %v5328_v9, %v2635_v53  ;;  %v4836_v21 = vpop.f32.mrb[119].mxu1  ;;  %v4795_v53 = vpop.f32.mrb[115].mxu0 }
 0xa52   :  { %v2488_v9 = vpop.f32.mrb[116].mxu0  ;;  %5122 = vmatpush3.bf16.msra.mxu0 %v5121_v55 }
 0xa53   :  { %v2670_v28 = vsel %vm997_vm8, %v2657_v31, -inf  ;;  %v4798_v21 = vpop.f32.mrb[117].mxu0  ;;  %5123 = vmatprep.subr.bf16.mxu0 %v5336_v22 }
 0xa54   :  { %2671 = vmax.xlane.f32.xlu0 %v2670_v28  ;;  %v2640_v25 = vpop.f32.mrb[120].mxu1  ;;  %v2493_v28 = vpop.f32.mrb[118].mxu0 }
 0xa55   :  { %v2658_v60 = vmul.f32 %v5329_v35, %v2640_v25  ;;  %v4839_v57 = vpop.f32.mrb[121].mxu1  ;;  %v5124_v25 = vpack.c.bf16 %v2493_v28, %v2488_v9  ;;  %v4801_v35 = vpop.f32.mrb[119].mxu0 }
 0xa56   :  { %v2498_v57 = vpop.f32.mrb[120].mxu0 }
 0xa57   :  { %v2673_v42 = vsel %vm997_vm8, %v2658_v60, -inf  ;;  %5125 = vmatpush3.bf16.msra.mxu0 %v5124_v25 }
 0xa58   :  { %2674 = vmax.xlane.f32.xlu1 %v2673_v42  ;;  %v2645_v14 = vpop.f32.mrb[122].mxu1  ;;  %5126 = vmatprep.subr.bf16.mxu0 %v5336_v22 }
 0xa59   :  { %v2659_v62 = vmul.f32 %v5330_v32, %v2645_v14  ;;  %v4842_v7 = vpop.f32.mrb[123].mxu1 }
 0xa5b   :  { %v2676_v2 = vsel %vm997_vm8, %v2659_v62, -inf }
 0xa5c   :  { %2677 = vmax.xlane.f32.xlu0 %v2676_v2  ;;  %v2650_v11 = vpop.f32.mrb[124].mxu1 }
 0xa5d   :  { %v2660_v27 = vmul.f32 %v5851_v39, %v2650_v11  ;;  %v4845_v4 = vpop.f32.mrb[125].mxu1  ;;  %v4804_v39 = vpop.f32.mrb[121].mxu0 }
 0xa5e   :  { %v2503_v42 = vpop.f32.mrb[122].mxu0 }
 0xa5f   :  { %v2679_v34 = vsel %vm1016_vm9, %v2660_v27, -inf  ;;  %v5127_v14 = vpack.c.bf16 %v2503_v42, %v2498_v57  ;;  %v4807_v32 = vpop.f32.mrb[123].mxu0 }
 0xa60   :  { %2680 = vmax.xlane.f32.xlu0 %v2679_v34 }
 0xa61   :  { %5128 = vmatpush3.bf16.msra.mxu0 %v5127_v14 }
 0xa62   :  { %4858 = vmatprep.subr.mxu0 %v5332_v1 }
 0xad5   :  { %v2663_v7 = vpop.xlane.xlu0 %2662 }
 0xad6   :  { %v2682_v2 = vsub.f32 %v2654_v0, %v2663_v7 }
 0xad8   :  { %v2689_v11 = vmul.f32 1.442695, %v2682_v2 }
 0xad9   :  { %v2666_v4 = vpop.xlane.xlu0 %2665 }
 0xada   :  { %5254 = vpow2.f32 %v2689_v11  ;;  %v2683_v34 = vsub.f32 %v2655_v37, %v2666_v4 }
 0xadc   :  { %v2691_v59 = vmul.f32 1.442695, %v2683_v34 }
 0xadd   :  { %v2669_v61 = vpop.xlane.xlu0 %2668 }
 0xade   :  { %5256 = vpow2.f32 %v2691_v59  ;;  %v2684_v17 = vsub.f32 %v2656_v52, %v2669_v61 }
 0xae0   :  { %v2693_v55 = vmul.f32 1.442695, %v2684_v17 }
 0xae1   :  { %v2672_v53 = vpop.xlane.xlu0 %2671 }
 0xae2   :  { %5258 = vpow2.f32 %v2693_v55  ;;  %v2685_v9 = vsub.f32 %v2657_v31, %v2672_v53 }
 0xae4   :  { %v5255_v21 = vpop.eup %5254  ;;  %v2695_v28 = vmul.f32 1.442695, %v2685_v9  ;;  %v5331_v9 = vld [vmem:[%s6802_s1] sm:$0xff]  ;;  %s5345_s1 = smov 16  }
 0xae5   :  { %v2675_v25 = vpop.xlane.xlu1 %2674  ;;  %v2703_v35 = vsel %vm997_vm8, %v5255_v21, 0.0  ;;  %2862 = vrot.lane.b32.xlu1 %v5331_v9, %s5344_s17 }
 0xae6   :  { %5260 = vpow2.f32 %v2695_v28  ;;  %v2686_v57 = vsub.f32 %v2658_v60, %v2675_v25  ;;  %2704 = vadd.xlane.f32.xlu0 %v2703_v35 }
 0xae8   :  { %v5257_v0 = vpop.eup %5256  ;;  %v2697_v39 = vmul.f32 1.442695, %v2686_v57 }
 0xae9   :  { %v2678_v42 = vpop.xlane.xlu0 %2677  ;;  %v2706_v37 = vsel %vm997_vm8, %v5257_v0, 0.0 }
 0xaea   :  { %5262 = vpow2.f32 %v2697_v39  ;;  %v2687_v14 = vsub.f32 %v2659_v62, %v2678_v42  ;;  %2707 = vadd.xlane.f32.xlu0 %v2706_v37 }
 0xaec   :  { %v5259_v52 = vpop.eup %5258  ;;  %v2699_v32 = vmul.f32 1.442695, %v2687_v14 }
 0xaed   :  { %v2681_v7 = vpop.xlane.xlu0 %2680  ;;  %v2709_v31 = vsel %vm997_vm8, %v5259_v52, 0.0 }
 0xaee   :  { %5264 = vpow2.f32 %v2699_v32  ;;  %v2688_v2 = vsub.f32 %v2660_v27, %v2681_v7  ;;  %2710 = vadd.xlane.f32.xlu0 %v2709_v31  ;;  %v2508_v27 = vpop.f32.mrb[124].mxu0 }
 0xaef   :  { %v4810_v53 = vpop.f32.mrb[125].mxu0  ;;  %4859 = vmatpush3.msk.msra.mxu0 %vm1097_vm10, %v2508_v27 }
 0xaf0   :  { %v5261_v11 = vpop.eup %5260  ;;  %v2701_v4 = vmul.f32 1.442695, %v2688_v2  ;;  %4904 = vmatprep.subr.mxu0 %v5332_v1 }
 0xaf1   :  { %v2712_v60 = vsel %vm997_vm8, %v5261_v11, 0.0 }
 0xaf2   :  { %5266 = vpow2.f32 %v2701_v4  ;;  %2713 = vadd.xlane.f32.xlu0 %v2712_v60 }
 0xaf4   :  { %v5263_v34 = vpop.eup %5262 }
 0xaf5   :  { %v2715_v59 = vsel %vm997_vm8, %v5263_v34, 0.0 }
 0xaf6   :  { %2716 = vadd.xlane.f32.xlu0 %v2715_v59 }
 0xaf8   :  { %v5265_v62 = vpop.eup %5264 }
 0xaf9   :  { %v2718_v61 = vsel %vm997_vm8, %v5265_v62, 0.0 }
 0xafa   :  { %2719 = vadd.xlane.f32.xlu0 %v2718_v61 }
 0xafc   :  { %v5267_v17 = vpop.eup %5266 }
 0xafd   :  { %v2721_v55 = vsel %vm1016_vm9, %v5267_v17, 0.0 }
 0xafe   :  { %2722 = vadd.xlane.f32.xlu0 %v2721_v55 }
 0xb73   :  { %v2705_v28 = vpop.xlane.xlu0 %2704 }
 0xb74   :  { %5268 = vrcp.f32 %v2705_v28 }
 0xb77   :  { %v2708_v25 = vpop.xlane.xlu0 %2707 }
 0xb78   :  { %5270 = vrcp.f32 %v2708_v25 }
 0xb7b   :  { %v2711_v35 = vpop.xlane.xlu0 %2710 }
 0xb7c   :  { %5272 = vrcp.f32 %v2711_v35 }
 0xb7e   :  { %v5269_v57 = vpop.eup %5268 }
 0xb7f   :  { %v2731_v39 = vmul.f32 %v5269_v57, %v5255_v21  ;;  %v2714_v42 = vpop.xlane.xlu0 %2713 }
 0xb80   :  { %5274 = vrcp.f32 %v2714_v42 }
 0xb81   :  { %4861 = vmatmul.mubr.msk.f32.vlgmr.msra.gmra.mrb[126].mxu0 %vm997_vm8, %v2731_v39 }
 0xb82   :  { %v5271_v37 = vpop.eup %5270  ;;  %4905 = vmatpush3.msk.msra.mxu0 %vm57_vm1, %v5945_v18  ;;  %4863 = vmatprep.mubr.msk.f32.mxu0 %vm5334_vm0, %v5332_v1 }
 0xb83   :  { %v2717_v14 = vpop.xlane.xlu0 %2716  ;;  %v2732_v32 = vmul.f32 %v5271_v37, %v5257_v0  ;;  %4950 = vmatprep.subr.mxu0 %v5332_v1 }
 0xb84   :  { %5276 = vrcp.f32 %v2717_v14 }
 0xb85   :  { %4864 = vmatmul.mubr.msk.f32.gmra.mrb[128].mxu0 %vm997_vm8, %v2732_v32 }
 0xb86   :  { %v5273_v7 = vpop.eup %5272  ;;  %4866 = vmatprep.mubr.msk.f32.mxu0 %vm5334_vm0, %v5332_v1 }
 0xb87   :  { %v2720_v21 = vpop.xlane.xlu0 %2719  ;;  %v2733_v31 = vmul.f32 %v5273_v7, %v5259_v52  ;;  %v2863_v52 = vpop.permute.xlu1 %2862 }
 0xb88   :  { %5278 = vrcp.f32 %v2720_v21  ;;  %4882 = vmatpush3.msk.msra.mxu1 %vm1097_vm10, %v2863_v52 }
 0xb89   :  { %4867 = vmatmul.mubr.msk.f32.gmra.mrb[130].mxu0 %vm997_vm8, %v2733_v31  ;;  %4927 = vmatprep.subr.mxu1 %v5332_v1 }
 0xb8a   :  { %v5275_v18 = vpop.eup %5274  ;;  %4869 = vmatprep.mubr.msk.f32.mxu0 %vm5334_vm0, %v5332_v1 }
 0xb8b   :  { %v2723_v2 = vpop.xlane.xlu0 %2722  ;;  %v2734_v0 = vmul.f32 %v5275_v18, %v5261_v11 }
 0xb8c   :  { %5280 = vrcp.f32 %v2723_v2 }
 0xb8d   :  { %4870 = vmatmul.mubr.msk.f32.gmra.mrb[132].mxu0 %vm997_vm8, %v2734_v0 }
 0xb8e   :  { %v5277_v4 = vpop.eup %5276  ;;  %4872 = vmatprep.mubr.msk.f32.mxu0 %vm5334_vm0, %v5332_v1 }
 0xb8f   :  { %v2735_v60 = vmul.f32 %v5277_v4, %v5263_v34 }
 0xb91   :  { %4873 = vmatmul.mubr.msk.f32.gmra.mrb[134].mxu0 %vm997_vm8, %v2735_v60 }
 0xb92   :  { %v5279_v59 = vpop.eup %5278  ;;  %4875 = vmatprep.mubr.msk.f32.mxu0 %vm5334_vm0, %v5332_v1 }
 0xb93   :  { %v2736_v61 = vmul.f32 %v5279_v59, %v5265_v62 }
 0xb95   :  { %4876 = vmatmul.mubr.msk.f32.gmra.mrb[136].mxu0 %vm997_vm8, %v2736_v61 }
 0xb96   :  { %v5281_v11 = vpop.eup %5280  ;;  %4878 = vmatprep.mubr.msk.f32.mxu0 %vm5334_vm0, %v5332_v1 }
 0xb97   :  { %v2737_v55 = vmul.f32 %v5281_v11, %v5267_v17 }
 0xb99   :  { %4879 = vmatmul.mubr.msk.f32.gmra.mrb[138].mxu0 %vm997_vm8, %v2737_v55 }
 0xb9a   :  { %4906 = vmatprep.mubr.msk.f32.mxu0 %vm5334_vm0, %v5332_v1 }
 0xb9d   :  { %4907 = vmatmul.mubr.msk.f32.vlgmr.msra.gmra.mrb[140].mxu0 %vm35_vm2, %v6209_v26 }
 0xb9e   :  { %4951 = vmatpush3.msk.msra.mxu0 %vm57_vm1, %v5958_v10  ;;  %4909 = vmatprep.mubr.msk.f32.mxu0 %vm5334_vm0, %v5332_v1 }
 0xb9f   :  { %5141 = vmatprep.subr.bf16.mxu0 %v5336_v22 }
 0xba1   :  { %4910 = vmatmul.mubr.msk.f32.gmra.mrb[142].mxu0 %vm35_vm2, %v6221_v45 }
 0xba2   :  { %4912 = vmatprep.mubr.msk.f32.mxu0 %vm5334_vm0, %v5332_v1 }
 0xba5   :  { %4913 = vmatmul.mubr.msk.f32.gmra.mrb[144].mxu0 %vm35_vm2, %v6230_v50 }
 0xba6   :  { %4915 = vmatprep.mubr.msk.f32.mxu0 %vm5334_vm0, %v5332_v1 }
 0xba9   :  { %4916 = vmatmul.mubr.msk.f32.gmra.mrb[146].mxu0 %vm35_vm2, %v6239_v48 }
 0xbaa   :  { %4918 = vmatprep.mubr.msk.f32.mxu0 %vm5334_vm0, %v5332_v1 }
 0xbad   :  { %4919 = vmatmul.mubr.msk.f32.gmra.mrb[148].mxu0 %vm35_vm2, %v6248_v19 }
 0xbae   :  { %4921 = vmatprep.mubr.msk.f32.mxu0 %vm5334_vm0, %v5332_v1 }
 0xbb1   :  { %4922 = vmatmul.mubr.msk.f32.gmra.mrb[150].mxu0 %vm35_vm2, %v6257_v51 }
 0xbb2   :  { %4924 = vmatprep.mubr.msk.f32.mxu0 %vm5334_vm0, %v5332_v1 }
 0xbb5   :  { %4925 = vmatmul.mubr.msk.f32.gmra.mrb[152].mxu0 %vm35_vm2, %v6266_v54 }
 0xbb6   :  { %4952 = vmatprep.mubr.msk.f32.mxu0 %vm5334_vm0, %v5332_v1 }
 0xbb9   :  { %4953 = vmatmul.mubr.msk.f32.vlgmr.msra.gmra.mrb[154].mxu0 %vm35_vm2, %v6209_v26 }
 0xbba   :  { %4955 = vmatprep.mubr.msk.f32.mxu0 %vm5334_vm0, %v5332_v1 }
 0xbbd   :  { %4956 = vmatmul.mubr.msk.f32.gmra.mrb[156].mxu0 %vm35_vm2, %v6221_v45 }
 0xbbe   :  { %4958 = vmatprep.mubr.msk.f32.mxu0 %vm5334_vm0, %v5332_v1 }
 0xbc1   :  { %4959 = vmatmul.mubr.msk.f32.gmra.mrb[158].mxu0 %vm35_vm2, %v6230_v50 }
 0xbc2   :  { %4961 = vmatprep.mubr.msk.f32.mxu0 %vm5334_vm0, %v5332_v1 }
 0xbc5   :  { %4962 = vmatmul.mubr.msk.f32.gmra.mrb[160].mxu0 %vm35_vm2, %v6239_v48 }
 0xbc6   :  { %4964 = vmatprep.mubr.msk.f32.mxu0 %vm5334_vm0, %v5332_v1 }
 0xbc9   :  { %4965 = vmatmul.mubr.msk.f32.gmra.mrb[162].mxu0 %vm35_vm2, %v6248_v19 }
 0xbca   :  { %4967 = vmatprep.mubr.msk.f32.mxu0 %vm5334_vm0, %v5332_v1 }
 0xbcd   :  { %4968 = vmatmul.mubr.msk.f32.gmra.mrb[164].mxu0 %vm35_vm2, %v6257_v51 }
 0xbce   :  { %4970 = vmatprep.mubr.msk.f32.mxu0 %vm5334_vm0, %v5332_v1 }
 0xbd1   :  { %4971 = vmatmul.mubr.msk.f32.gmra.mrb[166].mxu0 %vm35_vm2, %v6266_v54 }
 0xbd2   :  { %5022 = vmatprep.mubr.msk.f32.mxu0 %vm5334_vm0, %v5332_v1 }
 0xc54   :  { %v2828_v10 = vpop.f32.mrb[126].mxu0 }
 0xc55   :  { %v4862_v34 = vpop.f32.mrb[127].mxu0  ;;  %4884 = vmatmul.mubr.msk.f32.vlgmr.msra.gmra.mrb[126].mxu1 %vm847_vm5, %v2828_v10 }
 0xc56   :  { %4928 = vmatpush3.msk.msra.mxu1 %vm57_vm1, %v5939_v30  ;;  %4886 = vmatprep.mubr.msk.f32.mxu1 %vm5334_vm0, %v5332_v1 }
 0xc57   :  { %5129 = vmatprep.subr.bf16.mxu1 %v5336_v22 }
 0xc58   :  { %v2833_v62 = vpop.f32.mrb[128].mxu0 }
 0xc59   :  { %v4865_v17 = vpop.f32.mrb[129].mxu0  ;;  %4887 = vmatmul.mubr.msk.f32.gmra.mrb[128].mxu1 %vm847_vm5, %v2833_v62 }
 0xc5a   :  { %4889 = vmatprep.mubr.msk.f32.mxu1 %vm5334_vm0, %v5332_v1 }
 0xc5c   :  { %v2838_v27 = vpop.f32.mrb[130].mxu0 }
 0xc5d   :  { %v4868_v53 = vpop.f32.mrb[131].mxu0  ;;  %4890 = vmatmul.mubr.msk.f32.gmra.mrb[130].mxu1 %vm847_vm5, %v2838_v27 }
 0xc5e   :  { %4892 = vmatprep.mubr.msk.f32.mxu1 %vm5334_vm0, %v5332_v1 }
 0xc60   :  { %v2843_v30 = vpop.f32.mrb[132].mxu0 }
 0xc61   :  { %v4871_v9 = vpop.f32.mrb[133].mxu0  ;;  %4893 = vmatmul.mubr.msk.f32.gmra.mrb[132].mxu1 %vm847_vm5, %v2843_v30 }
 0xc62   :  { %4895 = vmatprep.mubr.msk.f32.mxu1 %vm5334_vm0, %v5332_v1 }
 0xc64   :  { %v2848_v28 = vpop.f32.mrb[134].mxu0 }
 0xc65   :  { %v4874_v25 = vpop.f32.mrb[135].mxu0  ;;  %4896 = vmatmul.mubr.msk.f32.gmra.mrb[134].mxu1 %vm847_vm5, %v2848_v28 }
 0xc66   :  { %4898 = vmatprep.mubr.msk.f32.mxu1 %vm5334_vm0, %v5332_v1 }
 0xc68   :  { %v2853_v35 = vpop.f32.mrb[136].mxu0 }
 0xc69   :  { %v4877_v57 = vpop.f32.mrb[137].mxu0  ;;  %4899 = vmatmul.mubr.msk.f32.gmra.mrb[136].mxu1 %vm847_vm5, %v2853_v35 }
 0xc6a   :  { %4901 = vmatprep.mubr.msk.f32.mxu1 %vm5334_vm0, %v5332_v1 }
 0xc6c   :  { %v2858_v39 = vpop.f32.mrb[138].mxu0 }
 0xc6d   :  { %v4880_v42 = vpop.f32.mrb[139].mxu0  ;;  %4902 = vmatmul.mubr.msk.f32.gmra.mrb[138].mxu1 %vm847_vm5, %v2858_v39 }
 0xc6e   :  { %4929 = vmatprep.mubr.msk.f32.mxu1 %vm5334_vm0, %v5332_v1 }
 0xc71   :  { %4930 = vmatmul.mubr.msk.f32.vlgmr.msra.gmra.mrb[140].mxu1 %vm35_vm2, %v6209_v26  ;;  %v3088_v26 = vpop.f32.mrb[140].mxu0 }
 0xc72   :  { %4932 = vmatprep.mubr.msk.f32.mxu1 %vm5334_vm0, %v5332_v1 }
 0xc75   :  { %4933 = vmatmul.mubr.msk.f32.gmra.mrb[142].mxu1 %vm35_vm2, %v6221_v45  ;;  %v4908_v45 = vpop.f32.mrb[141].mxu0 }
 0xc76   :  { %4935 = vmatprep.mubr.msk.f32.mxu1 %vm5334_vm0, %v5332_v1 }
 0xc79   :  { %4936 = vmatmul.mubr.msk.f32.gmra.mrb[144].mxu1 %vm35_vm2, %v6230_v50  ;;  %v3093_v50 = vpop.f32.mrb[142].mxu0 }
 0xc7a   :  { %4938 = vmatprep.mubr.msk.f32.mxu1 %vm5334_vm0, %v5332_v1 }
 0xc7d   :  { %4939 = vmatmul.mubr.msk.f32.gmra.mrb[146].mxu1 %vm35_vm2, %v6239_v48  ;;  %v4911_v48 = vpop.f32.mrb[143].mxu0 }
 0xc7e   :  { %4941 = vmatprep.mubr.msk.f32.mxu1 %vm5334_vm0, %v5332_v1 }
 0xc81   :  { %4942 = vmatmul.mubr.msk.f32.gmra.mrb[148].mxu1 %vm35_vm2, %v6248_v19  ;;  %v3098_v19 = vpop.f32.mrb[144].mxu0 }
 0xc82   :  { %4944 = vmatprep.mubr.msk.f32.mxu1 %vm5334_vm0, %v5332_v1  ;;  %v4914_v37 = vpop.f32.mrb[145].mxu0 }
 0xc83   :  { %v3103_v14 = vpop.f32.mrb[146].mxu0 }
 0xc84   :  { %v4917_v32 = vpop.f32.mrb[147].mxu0 }
 0xc85   :  { %4945 = vmatmul.mubr.msk.f32.gmra.mrb[150].mxu1 %vm35_vm2, %v6257_v51  ;;  %v3108_v7 = vpop.f32.mrb[148].mxu0 }
 0xc86   :  { %4947 = vmatprep.mubr.msk.f32.mxu1 %vm5334_vm0, %v5332_v1  ;;  %v4920_v21 = vpop.f32.mrb[149].mxu0 }
 0xc87   :  { %v3113_v51 = vpop.f32.mrb[150].mxu0 }
 0xc88   :  { %v4923_v31 = vpop.f32.mrb[151].mxu0 }
 0xc89   :  { %4948 = vmatmul.mubr.msk.f32.gmra.mrb[152].mxu1 %vm35_vm2, %v6266_v54  ;;  %v3118_v18 = vpop.f32.mrb[152].mxu0 }
 0xc8a   :  { %4987 = vmatprep.mubr.msk.f32.mxu1 %vm5334_vm0, %v5332_v1  ;;  %v4926_v2 = vpop.f32.mrb[153].mxu0 }
 0xc8c   :  { %v3288_v23 = vpop.f32.mrb[154].mxu0 }
 0xd28   :  { %v6577_v0 = vpop.f32.mrb[126].mxu1 }
 0xd29   :  { %v4885_v54 = vpop.f32.mrb[127].mxu1 }
 0xd2c   :  { %v6579_v4 = vpop.f32.mrb[128].mxu1 }
 0xd2d   :  { %v4888_v60 = vpop.f32.mrb[129].mxu1 }
 0xd30   :  { %v6581_v52 = vpop.f32.mrb[130].mxu1 }
 0xd31   :  { %v4891_v59 = vpop.f32.mrb[131].mxu1 }
 0xd34   :  { %v6583_v61 = vpop.f32.mrb[132].mxu1 }
 0xd35   :  { %v4894_v11 = vpop.f32.mrb[133].mxu1 }
 0xd38   :  { %v6585_v55 = vpop.f32.mrb[134].mxu1 }
 0xd39   :  { %v4897_v10 = vpop.f32.mrb[135].mxu1 }
 0xd3c   :  { %v6587_v34 = vpop.f32.mrb[136].mxu1 }
 0xd3d   :  { %v4900_v62 = vpop.f32.mrb[137].mxu1 }
 0xd40   :  { %v6589_v17 = vpop.f32.mrb[138].mxu1 }
 0xd41   :  { %v4903_v27 = vpop.f32.mrb[139].mxu1 }
 0xd44   :  { %v3188_v53 = vpop.f32.mrb[140].mxu1 }
 0xd45   :  { %v4931_v30 = vpop.f32.mrb[141].mxu1 }
 0xd48   :  { %v3193_v9 = vpop.f32.mrb[142].mxu1 }
 0xd49   :  { %v5130_v28 = vpack.c.bf16 %v3193_v9, %v3188_v53  ;;  %v4934_v25 = vpop.f32.mrb[143].mxu1 }
 0xd4b   :  { %5132 = vmatpush3.bf16.xpose.msk.msra.mxu1 %vm5667_vm6, %v5130_v28 }
 0xd4c   :  { %v3198_v35 = vpop.f32.mrb[144].mxu1  ;;  %5133 = vmatprep.subr.bf16.mxu1 %v5336_v22 }
 0xd4d   :  { %v4937_v57 = vpop.f32.mrb[145].mxu1 }
 0xd50   :  { %v3203_v39 = vpop.f32.mrb[146].mxu1 }
 0xd51   :  { %v5134_v42 = vpack.c.bf16 %v3203_v39, %v3198_v35  ;;  %v4940_v45 = vpop.f32.mrb[147].mxu1 }
 0xd53   :  { %5136 = vmatpush3.bf16.xpose.msk.msra.mxu1 %vm5667_vm6, %v5134_v42 }
 0xd54   :  { %v3208_v48 = vpop.f32.mrb[148].mxu1  ;;  %5137 = vmatprep.subr.bf16.mxu1 %v5336_v22 }
 0xd55   :  { %v4943_v37 = vpop.f32.mrb[149].mxu1 }
 0xd58   :  { %v3213_v32 = vpop.f32.mrb[150].mxu1 }
 0xd59   :  { %v5138_v21 = vpack.c.bf16 %v3213_v32, %v3208_v48  ;;  %v4946_v31 = vpop.f32.mrb[151].mxu1 }
 0xd5b   :  { %5140 = vmatpush3.bf16.xpose.msk.msra.mxu1 %vm5667_vm6, %v5138_v21 }
 0xd5c   :  { %v3218_v2 = vpop.f32.mrb[152].mxu1  ;;  %4985 = vmatprep.subr.mxu1 %v5332_v1 }
 0xd5d   :  { %v4949_v54 = vpop.f32.mrb[153].mxu1 }
 0xd63   :  { %4986 = vmatpush3.xpose.msk.msra.mxu1 %vm847_vm5, %v3218_v2 }
 0xd64   :  { %5043 = vmatprep.subr.mxu1 %v5332_v1 }
 0xd66   :  { %4988 = vmatmul.mubr.msk.f32.vlgmr.msra.gmra.mrb[154].mxu1 %vm847_vm5, %v3088_v26 }
 0xd67   :  { %4990 = vmatprep.mubr.msk.f32.mxu1 %vm5334_vm0, %v5332_v1 }
 0xd6a   :  { %4991 = vmatmul.mubr.msk.f32.gmra.mrb[156].mxu1 %vm847_vm5, %v3093_v50 }
 0xd6b   :  { %4993 = vmatprep.mubr.msk.f32.mxu1 %vm5334_vm0, %v5332_v1 }
 0xd6e   :  { %4994 = vmatmul.mubr.msk.f32.gmra.mrb[158].mxu1 %vm847_vm5, %v3098_v19 }
 0xd6f   :  { %4996 = vmatprep.mubr.msk.f32.mxu1 %vm5334_vm0, %v5332_v1 }
 0xd72   :  { %4997 = vmatmul.mubr.msk.f32.gmra.mrb[160].mxu1 %vm847_vm5, %v3103_v14 }
 0xd73   :  { %4999 = vmatprep.mubr.msk.f32.mxu1 %vm5334_vm0, %v5332_v1 }
 0xd76   :  { %5000 = vmatmul.mubr.msk.f32.gmra.mrb[162].mxu1 %vm847_vm5, %v3108_v7 }
 0xd77   :  { %5002 = vmatprep.mubr.msk.f32.mxu1 %vm5334_vm0, %v5332_v1 }
 0xd7a   :  { %5003 = vmatmul.mubr.msk.f32.gmra.mrb[164].mxu1 %vm847_vm5, %v3113_v51 }
 0xd7b   :  { %5005 = vmatprep.mubr.msk.f32.mxu1 %vm5334_vm0, %v5332_v1 }
 0xd7e   :  { %5006 = vmatmul.mubr.msk.f32.gmra.mrb[166].mxu1 %vm847_vm5, %v3118_v18 }
 0xd7f   :  { %5045 = vmatprep.mubr.msk.f32.mxu1 %vm5334_vm0, %v5332_v1 }
 0xe39   :  { %v3430_v33 = vpop.f32.mrb[154].mxu1 }
 0xe3a   :  { %v6624_v26 = vmul.f32 %v3430_v33, %v6132_v46  ;;  %v4989_v50 = vpop.f32.mrb[155].mxu1 }
 0xe3c   :  { %v3471_v19 = vsel %vm997_vm8, %v6624_v26, -inf }
 0xe3d   :  { %3472 = vmax.xlane.f32.xlu0 %v3471_v19  ;;  %v3435_v14 = vpop.f32.mrb[156].mxu1 }
 0xe3e   :  { %v6629_v7 = vmul.f32 %v3435_v14, %v6139_v44  ;;  %v4992_v51 = vpop.f32.mrb[157].mxu1 }
 0xe40   :  { %v3474_v18 = vsel %vm997_vm8, %v6629_v7, -inf }
 0xe41   :  { %3475 = vmax.xlane.f32.xlu0 %v3474_v18  ;;  %v3440_v60 = vpop.f32.mrb[158].mxu1 }
 0xe42   :  { %v6634_v59 = vmul.f32 %v3440_v60, %v6143_v6  ;;  %v4995_v46 = vpop.f32.mrb[159].mxu1 }
 0xe44   :  { %v3477_v11 = vsel %vm997_vm8, %v6634_v59, -inf }
 0xe45   :  { %3478 = vmax.xlane.f32.xlu0 %v3477_v11  ;;  %v3445_v10 = vpop.f32.mrb[160].mxu1 }
 0xe46   :  { %v6639_v62 = vmul.f32 %v3445_v10, %v6147_v63  ;;  %v4998_v44 = vpop.f32.mrb[161].mxu1 }
 0xe48   :  { %v3480_v27 = vsel %vm997_vm8, %v6639_v62, -inf }
 0xe49   :  { %3481 = vmax.xlane.f32.xlu0 %v3480_v27  ;;  %v3450_v53 = vpop.f32.mrb[162].mxu1 }
 0xe4a   :  { %v6644_v30 = vmul.f32 %v3450_v53, %v6151_v3  ;;  %v5001_v6 = vpop.f32.mrb[163].mxu1 }
 0xe4c   :  { %v3483_v9 = vsel %vm997_vm8, %v6644_v30, -inf }
 0xe4d   :  { %3484 = vmax.xlane.f32.xlu1 %v3483_v9  ;;  %v3455_v28 = vpop.f32.mrb[164].mxu1 }
 0xe4e   :  { %v6649_v25 = vmul.f32 %v3455_v28, %v6155_v12  ;;  %v5004_v63 = vpop.f32.mrb[165].mxu1 }
 0xe50   :  { %v3486_v35 = vsel %vm997_vm8, %v6649_v25, -inf }
 0xe51   :  { %3487 = vmax.xlane.f32.xlu0 %v3486_v35  ;;  %v3460_v57 = vpop.f32.mrb[166].mxu1 }
 0xe52   :  { %v6654_v39 = vmul.f32 %v3460_v57, %v6159_v16  ;;  %v5007_v3 = vpop.f32.mrb[167].mxu1 }
 0xe54   :  { %v3489_v42 = vsel %vm1016_vm9, %v6654_v39, -inf }
 0xe55   :  { %3490 = vmax.xlane.f32.xlu0 %v3489_v42 }
 0xe5e   :  { %3672 = vrot.lane.b32.xlu1 %v2051_v41, %s5344_s17 }
 0xe62   :  { %1335 = vrot.lane.b32.xlu1 %v6088_v56, %s5345_s1  ;;  %v4954_v56 = vpop.f32.mrb[155].mxu0 }
 0xe66   :  { %1337 = vrot.lane.b32.xlu1 %v6090_v36, %s5345_s1  ;;  %v3293_v36 = vpop.f32.mrb[156].mxu0 }
 0xe6a   :  { %1341 = vrot.lane.b32.xlu1 %v6094_v13, %s5345_s1  ;;  %v5142_v13 = vpack.c.bf16 %v3293_v36, %v3288_v23 }
 0xe6c   :  { %5143 = vmatpush3.bf16.msra.mxu0 %v5142_v13 }
 0xe6d   :  { %5144 = vmatprep.subr.bf16.mxu0 %v5336_v22 }
 0xe6e   :  { %1345 = vrot.lane.b32.xlu1 %v6098_v29, %s5345_s1  ;;  %v4957_v29 = vpop.f32.mrb[157].mxu0 }
 0xe6f   :  { %v3298_v12 = vpop.f32.mrb[158].mxu0 }
 0xe70   :  { %v4960_v16 = vpop.f32.mrb[159].mxu0 }
 0xe71   :  { %v3303_v41 = vpop.f32.mrb[160].mxu0 }
 0xe72   :  { %2186 = vrot.lane.b32.xlu1 %v6354_v40, %s5345_s1  ;;  %v5145_v40 = vpack.c.bf16 %v3303_v41, %v3298_v12 }
 0xe74   :  { %5146 = vmatpush3.bf16.msra.mxu0 %v5145_v40 }
 0xe75   :  { %5147 = vmatprep.subr.bf16.mxu0 %v5336_v22 }
 0xe76   :  { %2190 = vrot.lane.b32.xlu1 %v6358_v20, %s5345_s1  ;;  %v4963_v20 = vpop.f32.mrb[161].mxu0 }
 0xe7a   :  { %2194 = vrot.lane.b32.xlu1 %v6362_v49, %s5345_s1  ;;  %v3308_v49 = vpop.f32.mrb[162].mxu0 }
 0xe7e   :  { %2994 = vrot.lane.b32.xlu1 %v6577_v0, %s5345_s1  ;;  %v4966_v0 = vpop.f32.mrb[163].mxu0 }
 0xe82   :  { %2998 = vrot.lane.b32.xlu1 %v6581_v52, %s5345_s1  ;;  %v3313_v52 = vpop.f32.mrb[164].mxu0 }
 0xe86   :  { %3002 = vrot.lane.b32.xlu1 %v6585_v55, %s5345_s1  ;;  %v5148_v55 = vpack.c.bf16 %v3313_v52, %v3308_v49 }
 0xe88   :  { %5149 = vmatpush3.bf16.msra.mxu0 %v5148_v55 }
 0xe89   :  { %5020 = vmatprep.subr.mxu0 %v5332_v1 }
 0xe8a   :  { %3006 = vrot.lane.b32.xlu1 %v6589_v17, %s5345_s1  ;;  %v4969_v17 = vpop.f32.mrb[165].mxu0 }
 0xeca   :  { %v3473_v45 = vpop.xlane.xlu0 %3472 }
 0xecb   :  { %v3492_v48 = vsub.f32 %v6624_v26, %v3473_v45 }
 0xecd   :  { %v3499_v37 = vmul.f32 1.442695, %v3492_v48 }
 0xece   :  { %v3476_v32 = vpop.xlane.xlu0 %3475 }
 0xecf   :  { %5282 = vpow2.f32 %v3499_v37  ;;  %v3493_v21 = vsub.f32 %v6629_v7, %v3476_v32 }
 0xed1   :  { %v3501_v31 = vmul.f32 1.442695, %v3493_v21 }
 0xed2   :  { %v3479_v2 = vpop.xlane.xlu0 %3478 }
 0xed3   :  { %5284 = vpow2.f32 %v3501_v31  ;;  %v3494_v54 = vsub.f32 %v6634_v59, %v3479_v2 }
 0xed5   :  { %v3503_v33 = vmul.f32 1.442695, %v3494_v54 }
 0xed6   :  { %v3482_v22 = vpop.xlane.xlu0 %3481 }
 0xed7   :  { %5286 = vpow2.f32 %v3503_v33  ;;  %v3495_v50 = vsub.f32 %v6639_v62, %v3482_v22 }
 0xed9   :  { %v5283_v19 = vpop.eup %5282  ;;  %v3505_v14 = vmul.f32 1.442695, %v3495_v50 }
 0xeda   :  { %v3485_v51 = vpop.xlane.xlu1 %3484  ;;  %v3513_v26 = vsel %vm997_vm8, %v5283_v19, 0.0 }
 0xedb   :  { %5288 = vpow2.f32 %v3505_v14  ;;  %v3496_v18 = vsub.f32 %v6644_v30, %v3485_v51  ;;  %3514 = vadd.xlane.f32.xlu0 %v3513_v26 }
 0xedd   :  { %v5285_v7 = vpop.eup %5284  ;;  %v3507_v60 = vmul.f32 1.442695, %v3496_v18 }
 0xede   :  { %v3673_v46 = vpop.permute.xlu1 %3672  ;;  %v3488_v11 = vpop.xlane.xlu0 %3487  ;;  %v3516_v59 = vsel %vm997_vm8, %v5285_v7, 0.0 }
 0xedf   :  { %5290 = vpow2.f32 %v3507_v60  ;;  %v3497_v10 = vsub.f32 %v6649_v25, %v3488_v11  ;;  %3517 = vadd.xlane.f32.xlu0 %v3516_v59  ;;  %5044 = vmatpush3.msk.msra.mxu1 %vm1097_vm10, %v3673_v46 }
 0xee1   :  { %v5287_v62 = vpop.eup %5286  ;;  %v3509_v44 = vmul.f32 1.442695, %v3497_v10 }
 0xee2   :  { %v3491_v27 = vpop.xlane.xlu0 %3490  ;;  %v3519_v53 = vsel %vm997_vm8, %v5287_v62, 0.0 }
 0xee3   :  { %5292 = vpow2.f32 %v3509_v44  ;;  %v3498_v30 = vsub.f32 %v6654_v39, %v3491_v27  ;;  %3520 = vadd.xlane.f32.xlu0 %v3519_v53  ;;  %v3318_v39 = vpop.f32.mrb[166].mxu0  ;;  %v1336_v27 = vpop.permute.xlu1 %1335 }
 0xee4   :  { %v4972_v23 = vpop.f32.mrb[167].mxu0  ;;  %5021 = vmatpush3.msk.msra.mxu0 %vm1097_vm10, %v3318_v39 }
 0xee5   :  { %v5289_v6 = vpop.eup %5288  ;;  %v3511_v9 = vmul.f32 1.442695, %v3498_v30 }
 0xee6   :  { %v3522_v28 = vsel %vm997_vm8, %v5289_v6, 0.0 }
 0xee7   :  { %5294 = vpow2.f32 %v3511_v9  ;;  %3523 = vadd.xlane.f32.xlu0 %v3522_v28  ;;  %v1338_v30 = vpop.permute.xlu1 %1337 }
 0xee9   :  { %v5291_v63 = vpop.eup %5290 }
 0xeea   :  { %v3525_v25 = vsel %vm997_vm8, %v5291_v63, 0.0 }
 0xeeb   :  { %3526 = vadd.xlane.f32.xlu0 %v3525_v25  ;;  %v1342_v9 = vpop.permute.xlu1 %1341 }
 0xeed   :  { %v5293_v35 = vpop.eup %5292 }
 0xeee   :  { %v3528_v57 = vsel %vm997_vm8, %v5293_v35, 0.0 }
 0xeef   :  { %3529 = vadd.xlane.f32.xlu0 %v3528_v57 }
 0xef1   :  { %v5295_v3 = vpop.eup %5294 }
 0xef2   :  { %v3531_v42 = vsel %vm1016_vm9, %v5295_v3, 0.0 }
 0xef3   :  { %3532 = vadd.xlane.f32.xlu0 %v3531_v42 }
 0xf09   :  { %1333 = vrot.lane.b32.xlu0 %v6086_v15, %s5345_s1 }
 0xf0d   :  { %1339 = vrot.lane.b32.xlu0 %v6092_v8, %s5345_s1 }
 0xf11   :  { %1343 = vrot.lane.b32.xlu0 %v6096_v24, %s5345_s1 }
 0xf15   :  { %2184 = vrot.lane.b32.xlu0 %v6352_v38, %s5345_s1 }
 0xf19   :  { %2188 = vrot.lane.b32.xlu0 %v6356_v43, %s5345_s1 }
 0xf1d   :  { %2192 = vrot.lane.b32.xlu0 %v6360_v47, %s5345_s1 }
 0xf21   :  { %2196 = vrot.lane.b32.xlu0 %v6364_v58, %s5345_s1 }
 0xf25   :  { %2996 = vrot.lane.b32.xlu0 %v6579_v4, %s5345_s1 }
 0xf29   :  { %3000 = vrot.lane.b32.xlu0 %v6583_v61, %s5345_s1 }
 0xf2d   :  { %3004 = vrot.lane.b32.xlu0 %v6587_v34, %s5345_s1 }
 0xf68   :  { %v3515_v15 = vpop.xlane.xlu0 %3514 }
 0xf69   :  { %5296 = vrcp.f32 %v3515_v15 }
 0xf6c   :  { %v3518_v8 = vpop.xlane.xlu0 %3517 }
 0xf6d   :  { %5298 = vrcp.f32 %v3518_v8 }
 0xf70   :  { %v3521_v24 = vpop.xlane.xlu0 %3520 }
 0xf71   :  { %5300 = vrcp.f32 %v3521_v24 }
 0xf73   :  { %v5297_v38 = vpop.eup %5296 }
 0xf74   :  { %v3541_v43 = vmul.f32 %v5297_v38, %v5283_v19  ;;  %v3524_v47 = vpop.xlane.xlu0 %3523 }
 0xf75   :  { %5302 = vrcp.f32 %v3524_v47 }
 0xf76   :  { %5023 = vmatmul.mubr.msk.f32.vlgmr.msra.gmra.mrb[168].mxu0 %vm997_vm8, %v3541_v43 }
 0xf77   :  { %v5299_v58 = vpop.eup %5298  ;;  %5025 = vmatprep.mubr.msk.f32.mxu0 %vm5334_vm0, %v5332_v1 }
 0xf78   :  { %v3527_v4 = vpop.xlane.xlu0 %3526  ;;  %v3542_v61 = vmul.f32 %v5299_v58, %v5285_v7 }
 0xf79   :  { %5304 = vrcp.f32 %v3527_v4 }
 0xf7a   :  { %5026 = vmatmul.mubr.msk.f32.gmra.mrb[170].mxu0 %vm997_vm8, %v3542_v61  ;;  %v1355_v61 = vadd.f32 %v1336_v27, %v5386_v5 }
 0xf7b   :  { %v5301_v34 = vpop.eup %5300  ;;  %5028 = vmatprep.mubr.msk.f32.mxu0 %vm5334_vm0, %v5332_v1 }
 0xf7c   :  { %v3530_v56 = vpop.xlane.xlu0 %3529  ;;  %v3543_v36 = vmul.f32 %v5301_v34, %v5287_v62 }
 0xf7d   :  { %5306 = vrcp.f32 %v3530_v56 }
 0xf7e   :  { %5029 = vmatmul.mubr.msk.f32.gmra.mrb[172].mxu0 %vm997_vm8, %v3543_v36 }
 0xf7f   :  { %v5303_v13 = vpop.eup %5302  ;;  %5031 = vmatprep.mubr.msk.f32.mxu0 %vm5334_vm0, %v5332_v1 }
 0xf80   :  { %v3533_v29 = vpop.xlane.xlu0 %3532  ;;  %v3544_v12 = vmul.f32 %v5303_v13, %v5289_v6  ;;  %v1356_v13 = vadd.f32 %v1338_v30, %v5386_v5 }
 0xf81   :  { %5308 = vrcp.f32 %v3533_v29 }
 0xf82   :  { %5032 = vmatmul.mubr.msk.f32.gmra.mrb[174].mxu0 %vm997_vm8, %v3544_v12 }
 0xf83   :  { %v5305_v16 = vpop.eup %5304  ;;  %5034 = vmatprep.mubr.msk.f32.mxu0 %vm5334_vm0, %v5332_v1 }
 0xf84   :  { %v3545_v41 = vmul.f32 %v5305_v16, %v5291_v63  ;;  %v1334_v53 = vpop.permute.xlu0 %1333  ;;  %v1346_v63 = vpop.permute.xlu1 %1345 }
 0xf85   :  { %v1354_v43 = vadd.f32 %v1334_v53, %v5386_v5 }
 0xf86   :  { %5035 = vmatmul.mubr.msk.f32.gmra.mrb[176].mxu0 %vm997_vm8, %v3545_v41 }
 0xf87   :  { %v5307_v40 = vpop.eup %5306  ;;  %5037 = vmatprep.mubr.msk.f32.mxu0 %vm5334_vm0, %v5332_v1 }
 0xf88   :  { %v3546_v20 = vmul.f32 %v5307_v40, %v5293_v35  ;;  %v1340_v6 = vpop.permute.xlu0 %1339  ;;  %v2187_v35 = vpop.permute.xlu1 %2186 }
 0xf89   :  { %v2206_v29 = vadd.f32 %v2187_v35, %v1355_v61 }
 0xf8a   :  { %5038 = vmatmul.mubr.msk.f32.gmra.mrb[178].mxu0 %vm997_vm8, %v3546_v20  ;;  %v1357_v20 = vadd.f32 %v1340_v6, %v5386_v5 }
 0xf8b   :  { %v5309_v49 = vpop.eup %5308  ;;  %5040 = vmatprep.mubr.msk.f32.mxu0 %vm5334_vm0, %v5332_v1 }
 0xf8c   :  { %v3547_v0 = vmul.f32 %v5309_v49, %v5295_v3  ;;  %v1344_v28 = vpop.permute.xlu0 %1343  ;;  %v2191_v3 = vpop.permute.xlu1 %2190 }
 0xf8e   :  { %5041 = vmatmul.mubr.msk.f32.gmra.mrb[180].mxu0 %vm997_vm8, %v3547_v0 }
 0xf90   :  { %v2185_v25 = vpop.permute.xlu0 %2184  ;;  %v2195_v39 = vpop.permute.xlu1 %2194 }
 0xf91   :  { %v2205_v58 = vadd.f32 %v2185_v25, %v1354_v43 }
 0xf94   :  { %v2189_v57 = vpop.permute.xlu0 %2188  ;;  %v2995_v15 = vpop.permute.xlu1 %2994 }
 0xf95   :  { %v3015_v34 = vadd.f32 %v2995_v15, %v2205_v58  ;;  %v2207_v16 = vadd.f32 %v2189_v57, %v1356_v13 }
 0xf98   :  { %v2193_v42 = vpop.permute.xlu0 %2192  ;;  %v2999_v24 = vpop.permute.xlu1 %2998 }
 0xf99   :  { %v3017_v0 = vadd.f32 %v2999_v24, %v2207_v16 }
 0xf9c   :  { %v2197_v23 = vpop.permute.xlu0 %2196  ;;  %v3003_v47 = vpop.permute.xlu1 %3002 }
 0xfa0   :  { %v2997_v8 = vpop.permute.xlu0 %2996  ;;  %v3007_v56 = vpop.permute.xlu1 %3006 }
 0xfa1   :  { %v3016_v41 = vadd.f32 %v2997_v8, %v2206_v29 }
 0xfa4   :  { %v3001_v38 = vpop.permute.xlu0 %3000 }
 0xfa8   :  { %v3005_v4 = vpop.permute.xlu0 %3004 }
0x1049   :  { %v3638_v52 = vpop.f32.mrb[168].mxu0 }
0x104a   :  { %v5024_v55 = vpop.f32.mrb[169].mxu0  ;;  %5046 = vmatmul.mubr.msk.f32.vlgmr.msra.gmra.mrb[168].mxu1 %vm847_vm5, %v3638_v52 }
0x104b   :  { %5048 = vmatprep.mubr.msk.f32.mxu1 %vm5334_vm0, %v5332_v1  ;;  %v1358_v55 = vadd.f32 %v1342_v9, %v5386_v5 }
0x104d   :  { %v3643_v17 = vpop.f32.mrb[170].mxu0 }
0x104e   :  { %v5027_v45 = vpop.f32.mrb[171].mxu0  ;;  %5049 = vmatmul.mubr.msk.f32.gmra.mrb[170].mxu1 %vm847_vm5, %v3643_v17  ;;  %v2208_v17 = vadd.f32 %v2191_v3, %v1357_v20 }
0x104f   :  { %5051 = vmatprep.mubr.msk.f32.mxu1 %vm5334_vm0, %v5332_v1 }
0x1051   :  { %v3648_v48 = vpop.f32.mrb[172].mxu0 }
0x1052   :  { %v5030_v37 = vpop.f32.mrb[173].mxu0  ;;  %5052 = vmatmul.mubr.msk.f32.gmra.mrb[172].mxu1 %vm847_vm5, %v3648_v48  ;;  %v2209_v48 = vadd.f32 %v2193_v42, %v1358_v55 }
0x1053   :  { %5054 = vmatprep.mubr.msk.f32.mxu1 %vm5334_vm0, %v5332_v1  ;;  %v3018_v37 = vadd.f32 %v3001_v38, %v2208_v17 }
0x1055   :  { %v3653_v32 = vpop.f32.mrb[174].mxu0 }
0x1056   :  { %v5033_v21 = vpop.f32.mrb[175].mxu0  ;;  %5055 = vmatmul.mubr.msk.f32.gmra.mrb[174].mxu1 %vm847_vm5, %v3653_v32 }
0x1057   :  { %5057 = vmatprep.mubr.msk.f32.mxu1 %vm5334_vm0, %v5332_v1  ;;  %v1359_v21 = vadd.f32 %v1344_v28, %v5386_v5 }
0x1059   :  { %v3658_v31 = vpop.f32.mrb[176].mxu0 }
0x105a   :  { %v5036_v2 = vpop.f32.mrb[177].mxu0  ;;  %5058 = vmatmul.mubr.msk.f32.gmra.mrb[176].mxu1 %vm847_vm5, %v3658_v31 }
0x105b   :  { %5060 = vmatprep.mubr.msk.f32.mxu1 %vm5334_vm0, %v5332_v1  ;;  %v3019_v2 = vadd.f32 %v3003_v47, %v2209_v48 }
0x105d   :  { %v3663_v54 = vpop.f32.mrb[178].mxu0 }
0x105e   :  { %v5039_v33 = vpop.f32.mrb[179].mxu0  ;;  %5061 = vmatmul.mubr.msk.f32.gmra.mrb[178].mxu1 %vm847_vm5, %v3663_v54 }
0x105f   :  { %5063 = vmatprep.mubr.msk.f32.mxu1 %vm5334_vm0, %v5332_v1  ;;  %v1360_v33 = vadd.f32 %v1346_v63, %v5386_v5 }
0x1061   :  { %v3668_v22 = vpop.f32.mrb[180].mxu0 }
0x1062   :  { %v5042_v50 = vpop.f32.mrb[181].mxu0  ;;  %5064 = vmatmul.mubr.msk.f32.gmra.mrb[180].mxu1 %vm847_vm5, %v3668_v22  ;;  %v2210_v22 = vadd.f32 %v2195_v39, %v1359_v21 }
0x111d   :  { %v3763_v19 = vpop.f32.mrb[168].mxu1 }
0x111e   :  { %3804 = vrot.lane.b32.xlu0 %v3763_v19, %s5345_s1  ;;  %v5047_v14 = vpop.f32.mrb[169].mxu1  ;;  %v2211_v19 = vadd.f32 %v2197_v23, %v1360_v33 }
0x111f   :  { %v3020_v14 = vadd.f32 %v3005_v4, %v2210_v22 }
0x1121   :  { %v3768_v51 = vpop.f32.mrb[170].mxu1 }
0x1122   :  { %3806 = vrot.lane.b32.xlu1 %v3768_v51, %s5345_s1  ;;  %v5050_v26 = vpop.f32.mrb[171].mxu1 }
0x1125   :  { %v3773_v18 = vpop.f32.mrb[172].mxu1 }
0x1126   :  { %3808 = vrot.lane.b32.xlu0 %v3773_v18, %s5345_s1  ;;  %v5053_v7 = vpop.f32.mrb[173].mxu1  ;;  %v3021_v18 = vadd.f32 %v3007_v56, %v2211_v19 }
0x1129   :  { %v3778_v60 = vpop.f32.mrb[174].mxu1 }
0x112a   :  { %3810 = vrot.lane.b32.xlu1 %v3778_v60, %s5345_s1  ;;  %v5056_v1 = vpop.f32.mrb[175].mxu1 }
0x112d   :  { %v3783_v46 = vpop.f32.mrb[176].mxu1 }
0x112e   :  { %3812 = vrot.lane.b32.xlu0 %v3783_v46, %s5345_s1  ;;  %v5059_v11 = vpop.f32.mrb[177].mxu1 }
0x1131   :  { %v3788_v59 = vpop.f32.mrb[178].mxu1 }
0x1132   :  { %3814 = vrot.lane.b32.xlu1 %v3788_v59, %s5345_s1  ;;  %v5062_v10 = vpop.f32.mrb[179].mxu1 }
0x1135   :  { %v3793_v62 = vpop.f32.mrb[180].mxu1 }
0x1136   :  { %3816 = vrot.lane.b32.xlu0 %v3793_v62, %s5345_s1  ;;  %v5065_v44 = vpop.f32.mrb[181].mxu1 }
0x1190   :  { %v3805_v36 = vpop.permute.xlu0 %3804 }
0x1191   :  { %v3825_v12 = vadd.f32 %v3805_v36, %v3015_v34 }
0x1193   :  { %3839 = vrot.lane.b32.xlu1 %v3825_v12, %s5340_s26 }
0x1194   :  { %v3807_v40 = vpop.permute.xlu1 %3806 }
0x1195   :  { %v3826_v49 = vadd.f32 %v3807_v40, %v3016_v41 }
0x1197   :  { %3841 = vrot.lane.b32.xlu0 %v3826_v49, %s5340_s26 }
0x1198   :  { %v3809_v52 = vpop.permute.xlu0 %3808 }
0x1199   :  { %v3827_v45 = vadd.f32 %v3809_v52, %v3017_v0 }
0x119b   :  { %3843 = vrot.lane.b32.xlu1 %v3827_v45, %s5340_s26 }
0x119c   :  { %v3811_v32 = vpop.permute.xlu1 %3810 }
0x119d   :  { %v3828_v31 = vadd.f32 %v3811_v32, %v3018_v37 }
0x119f   :  { %3845 = vrot.lane.b32.xlu0 %v3828_v31, %s5340_s26 }
0x11a0   :  { %v3813_v54 = vpop.permute.xlu0 %3812 }
0x11a1   :  { %v3829_v50 = vadd.f32 %v3813_v54, %v3019_v2 }
0x11a3   :  { %3847 = vrot.lane.b32.xlu1 %v3829_v50, %s5340_s26 }
0x11a4   :  { %v3815_v51 = vpop.permute.xlu1 %3814 }
0x11a5   :  { %v3830_v26 = vadd.f32 %v3815_v51, %v3020_v14 }
0x11a7   :  { %3849 = vrot.lane.b32.xlu0 %v3830_v26, %s5340_s26 }
0x11a8   :  { %v3817_v7 = vpop.permute.xlu0 %3816 }
0x11a9   :  { %v3831_v60 = vadd.f32 %v3817_v7, %v3021_v18 }
0x11ab   :  { %3851 = vrot.lane.b32.xlu1 %v3831_v60, %s5340_s26 }
0x1205   :  { %v3840_v1 = vpop.permute.xlu1 %3839 }
0x1206   :  { %3861 = vst.msk [vmem:[%s6806_s3] sm:$0xff] %vm3860_vm11, %v3840_v1 }
0x1209   :  { %v3842_v5 = vpop.permute.xlu0 %3841 }
0x120a   :  { %3862 = vst.msk [vmem:[%s6806_s3 + $0x8] sm:$0xff] %vm3860_vm11, %v3842_v5 }
0x120d   :  { %v3844_v46 = vpop.permute.xlu1 %3843 }
0x120e   :  { %3863 = vst.msk [vmem:[%s6806_s3 + $0x10] sm:$0xff] %vm3860_vm11, %v3844_v46 }
0x1211   :  { %v3846_v11 = vpop.permute.xlu0 %3845 }
0x1212   :  { %3864 = vst.msk [vmem:[%s6806_s3 + $0x18] sm:$0xff] %vm3860_vm11, %v3846_v11 }
0x1215   :  { %v3848_v59 = vpop.permute.xlu1 %3847 }
0x1216   :  { %3865 = vst.msk [vmem:[%s6806_s3 + $0x20] sm:$0xff] %vm3860_vm11, %v3848_v59 }
0x1219   :  { %v3850_v10 = vpop.permute.xlu0 %3849 }
0x121a   :  { %3866 = vst.msk [vmem:[%s6806_s3 + $0x28] sm:$0xff] %vm3860_vm11, %v3850_v10 }
0x121d   :  { %v3852_v62 = vpop.permute.xlu1 %3851 }
0x121e   :  { %3868 = vst.msk [vmem:[%s6806_s3 + $0x30] sm:$0x3] %vm3867_vm12, %v3852_v62 }

</bundles_post_ra>
